<compile_context>
chip_gen: v5e
topology: v5e:2x2
jax: 0.10.0
libtpu: 0.0.40
codegen_flags: <defaults>
</compile_context>

<pallas_src>
import functools

import jax
import jax.numpy as jnp
from jax import lax
from jax.experimental import pallas as pl
from jax.experimental.pallas import tpu as pltpu

_VMEM_LIMIT = 32 * 1024 * 1024  # ample for the ~7 MB resident set, < physical VMEM on all gens


# ----------------------------------------------------------------------------
# Pallas kernel 1: lane-dense conv-as-matmul + one-pass BatchNorm(train) + ReLU
# ----------------------------------------------------------------------------
def _conv_bn_relu_kernel(w_ref, patches_ref, b_ref, gamma_ref, beta_ref, out_ref):
    # w: (Cout, K)   patches: (K, M)   b/gamma/beta: (Cout, 1)   out: (Cout, M)
    acc = jnp.dot(w_ref[...], patches_ref[...], preferred_element_type=jnp.float32)
    acc = acc + b_ref[...]
    m = acc.shape[1]
    inv_m = 1.0 / float(m)
    # one-pass stats over (B,H,W) == lanes, per channel (train-mode, biased var)
    s = jnp.sum(acc, axis=1, keepdims=True)
    sq = jnp.sum(acc * acc, axis=1, keepdims=True)
    mean = s * inv_m
    var = sq * inv_m - mean * mean
    scale = lax.rsqrt(var + 1e-5) * gamma_ref[...]
    shift = beta_ref[...] - mean * scale
    out_ref[...] = jnp.maximum(acc * scale + shift, 0.0)


def conv_bn_relu(w_mat, patches, bias, gamma, beta):
    cout = w_mat.shape[0]
    m = patches.shape[1]
    return pl.pallas_call(
        _conv_bn_relu_kernel,
        out_shape=jax.ShapeDtypeStruct((cout, m), jnp.float32),
        in_specs=[pl.BlockSpec(memory_space=pltpu.MemorySpace.VMEM)] * 5,
        out_specs=pl.BlockSpec(memory_space=pltpu.MemorySpace.VMEM),
        compiler_params=pltpu.CompilerParams(vmem_limit_bytes=_VMEM_LIMIT),
    )(w_mat, patches, bias.reshape(cout, 1), gamma.reshape(cout, 1),
      beta.reshape(cout, 1))


# ----------------------------------------------------------------------------
# Pallas kernel 2: 2-layer LSTM (time-major) + fc1
#   - hoisted layer-0 input projection into VMEM scratch
#   - block-diagonal fused recurrent matmul (B,2H)@(2H,8H)
#   - chunk-unrolled recurrence
# ----------------------------------------------------------------------------
def _lstm_fc_kernel(x_ref, h0_ref, c0_ref, wih0_ref, b0_ref, w_rec_ref,
                    wih1_ref, b1_ref, wfc_ref, bfc_ref, out_ref, xproj_ref,
                    *, hidden, seq_len, batch, chunk):
    H = hidden
    B = batch

    # --- hoisted layer-0 input projection: ONE (T*B,14)x(14,4H) matmul -------
    xproj_ref[...] = (jnp.dot(x_ref[...], wih0_ref[...],
                              preferred_element_type=jnp.float32) + b0_ref[...])

    # --- loop-invariant loads / broadcasts (hoisted out of the recurrence) ---
    w_rec = w_rec_ref[...]                        # (2H, 8H) block-diag [whh0 | whh1]
    wih1 = wih1_ref[...]                          # (H, 4H)
    b1b = jnp.broadcast_to(b1_ref[...], (B, 4 * H))

    def gates(g):                                 # PyTorch gate order: i, f, g, o
        i = jax.nn.sigmoid(g[:, 0 * H:1 * H])
        f = jax.nn.sigmoid(g[:, 1 * H:2 * H])
        n = jnp.tanh(g[:, 2 * H:3 * H])
        o = jax.nn.sigmoid(g[:, 3 * H:4 * H])
        return i, f, n, o

    rows_per_chunk = chunk * B                    # 16 rows -> 8-aligned loads

    def chunk_body(ci, carry):
        hcat, c1, c2 = carry                      # hcat = [h1 | h2], shape (B, 2H)
        base = pl.multiple_of(ci * rows_per_chunk, rows_per_chunk)
        xp = xproj_ref[pl.ds(base, rows_per_chunk), :]   # (chunk*B, 4H), aligned
        for j in range(chunk):                    # unrolled inner recurrence
            # fused recurrent matmul for BOTH layers (128-lane result)
            rec = jnp.dot(hcat, w_rec, preferred_element_type=jnp.float32)  # (B, 8H)
            # layer 0 (input projection already precomputed, bias folded in)
            g0 = xp[j * B:(j + 1) * B, :] + rec[:, :4 * H]
            i0, f0, n0, o0 = gates(g0)
            c1 = f0 * c1 + i0 * n0
            h1 = o0 * jnp.tanh(c1)
            # layer 1 (input = h1 of this timestep)
            g1 = (jnp.dot(h1, wih1, preferred_element_type=jnp.float32)
                  + b1b + rec[:, 4 * H:])
            i1, f1, n1, o1 = gates(g1)
            c2 = f1 * c2 + i1 * n1
            h2 = o1 * jnp.tanh(c2)
            hcat = jnp.concatenate([h1, h2], axis=1)
        return hcat, c1, c2

    hcat0 = jnp.concatenate([h0_ref[0], h0_ref[1]], axis=1)
    init = (hcat0, c0_ref[0], c0_ref[1])
    hcat, _, _ = lax.fori_loop(0, seq_len // chunk, chunk_body, init)

    # fc1 on the top-layer last-timestep hidden state (== out[:, -1, :])
    h2_last = hcat[:, H:]
    out_ref[...] = (jnp.dot(h2_last, wfc_ref[...], preferred_element_type=jnp.float32)
                    + bfc_ref[...])


def lstm_fc(x_tb_f, h0, c0, wih0, b0, w_rec, wih1, b1, wfc, bfc,
            *, seq_len, batch, hidden, num_classes, chunk=8):
    assert seq_len % chunk == 0
    kernel = functools.partial(_lstm_fc_kernel, hidden=hidden, seq_len=seq_len,
                               batch=batch, chunk=chunk)
    return pl.pallas_call(
        kernel,
        out_shape=jax.ShapeDtypeStruct((batch, num_classes), jnp.float32),
        in_specs=[pl.BlockSpec(memory_space=pltpu.MemorySpace.VMEM)] * 10,
        out_specs=pl.BlockSpec(memory_space=pltpu.MemorySpace.VMEM),
        scratch_shapes=[pltpu.VMEM((seq_len * batch, 4 * hidden), jnp.float32)],
        compiler_params=pltpu.CompilerParams(vmem_limit_bytes=_VMEM_LIMIT),
    )(x_tb_f, h0, c0, wih0, b0, w_rec, wih1, b1, wfc, bfc)


# ----------------------------------------------------------------------------
# Plain-JAX glue: transposed im2col (K, M), weight reshapes, layout plumbing
# ----------------------------------------------------------------------------
def im2col_t(x_cbhw, kh, kw, pad):
    # x: (C, B, H, W)  ->  patches (C*kh*kw, B*H*W), k = c*(kh*kw) + dy*kw + dx
    C, B, H, W = x_cbhw.shape
    xp = jnp.pad(x_cbhw, ((0, 0), (0, 0), (pad, pad), (pad, pad)))
    taps = [xp[:, :, dy:dy + H, dx:dx + W] for dy in range(kh) for dx in range(kw)]
    p = jnp.stack(taps, axis=1)                      # (C, kh*kw, B, H, W)
    return p.reshape(C * kh * kw, B * H * W)


def init_params(key, num_channels=3, c1=16, c2=8, hidden=16, num_layers=2,
                num_classes=6, batch_size=2, lstm_input=14):
    ks = jax.random.split(key, 16)

    def kaiming(k, shape, fan_in):
        return jax.random.normal(k, shape, jnp.float32) * jnp.sqrt(2.0 / fan_in)

    def uni(k, shape, bound):
        return jax.random.uniform(k, shape, jnp.float32, -bound, bound)

    p = {}
    # conv weights in PyTorch layout (Cout, Cin, kh, kw), kaiming-normal init
    p["w1"] = kaiming(ks[0], (c1, num_channels, 5, 5), num_channels * 25)
    p["bc1"] = uni(ks[1], (c1,), 1.0 / jnp.sqrt(num_channels * 25.0))
    p["w2"] = kaiming(ks[2], (c2, c1, 3, 3), c1 * 9)
    p["bc2"] = uni(ks[3], (c2,), 1.0 / jnp.sqrt(c1 * 9.0))
    p["w3"] = kaiming(ks[4], (1, c2, 3, 3), c2 * 9)
    p["bc3"] = uni(ks[5], (1,), 1.0 / jnp.sqrt(c2 * 9.0))
    # batchnorm affine params (PyTorch default: weight=1, bias=0)
    for i, c in zip((1, 2, 3), (c1, c2, 1)):
        p[f"gamma{i}"] = jnp.ones((c,), jnp.float32)
        p[f"beta{i}"] = jnp.zeros((c,), jnp.float32)
    # LSTM params, PyTorch default U(-1/sqrt(H), 1/sqrt(H)); stored transposed
    s = 1.0 / jnp.sqrt(float(hidden))
    p["wih0"] = uni(ks[6], (lstm_input, 4 * hidden), s)
    p["whh0"] = uni(ks[7], (hidden, 4 * hidden), s)
    p["b0"] = uni(ks[8], (1, 4 * hidden), s) + uni(ks[9], (1, 4 * hidden), s)
    p["wih1"] = uni(ks[10], (hidden, 4 * hidden), s)
    p["whh1"] = uni(ks[11], (hidden, 4 * hidden), s)
    p["b1"] = uni(ks[12], (1, 4 * hidden), s) + uni(ks[13], (1, 4 * hidden), s)
    # fc1 (kaiming weight), stored transposed (hidden, num_classes)
    p["wfc"] = kaiming(ks[14], (num_classes, hidden), hidden).T
    p["bfc"] = uni(ks[15], (1, num_classes), 1.0 / jnp.sqrt(float(hidden)))
    # h0 / c0 parameters (initialized to zeros in the module)
    p["h0"] = jnp.zeros((num_layers, batch_size, hidden), jnp.float32)
    p["c0"] = jnp.zeros((num_layers, batch_size, hidden), jnp.float32)
    return p


def cnn_lstm_d_forward(params, x_nchw, *, hidden=16, num_classes=6):
    B, C, H, W = x_nchw.shape
    x = jnp.transpose(x_nchw, (1, 0, 2, 3))               # NCHW -> (C, B, H, W)

    def conv_block(x_cbhw, w, b, gamma, beta, k, pad):
        cout = w.shape[0]
        patches = im2col_t(x_cbhw, k, k, pad)               # (K, B*H*W), lane-dense
        y = conv_bn_relu(w.reshape(cout, -1), patches, b, gamma, beta)  # (Cout, B*H*W)
        return y.reshape(cout, B, H, W)

    y = conv_block(x, params["w1"], params["bc1"], params["gamma1"], params["beta1"], 5, 2)
    y = conv_block(y, params["w2"], params["bc2"], params["gamma2"], params["beta2"], 3, 1)
    y = conv_block(y, params["w3"], params["bc3"], params["gamma3"], params["beta3"], 3, 1)

    # x.view(B, -1, 400).transpose(2, 1) -> (B, 400, 14); run time-major (T, B, F)
    flat = y.reshape(B, H * W)                             # conv3 channel dim == 1
    T = 400
    F = (H * W) // T
    x_tbf = jnp.transpose(flat.reshape(B, F, T), (2, 0, 1))  # (400, B, 14)
    x2 = x_tbf.reshape(T * B, F)                           # rows ordered t-major, then b

    # block-diagonal fused recurrent weight [[whh0, 0], [0, whh1]]  -> (2H, 8H)
    Hh = hidden
    z = jnp.zeros((Hh, 4 * Hh), jnp.float32)
    w_rec = jnp.concatenate(
        [jnp.concatenate([params["whh0"], z], axis=1),
         jnp.concatenate([z, params["whh1"]], axis=1)], axis=0)

    return lstm_fc(x2, params["h0"], params["c0"], params["wih0"], params["b0"],
                   w_rec, params["wih1"], params["b1"], params["wfc"], params["bfc"],
                   seq_len=T, batch=B, hidden=Hh, num_classes=num_classes)


if __name__ == "__main__":
    key = jax.random.PRNGKey(0)
    kp, kx = jax.random.split(key)
    # H*W must equal 5600 so that view(B, -1, 400) -> (B, 14, 400) feeds LSTM(14, ...)
    B, C, H, W = 2, 3, 70, 80
    params = init_params(kp, batch_size=B)
    x = jax.random.normal(kx, (B, C, H, W), jnp.float32)
    out = cnn_lstm_d_forward(params, x)
    out = jax.block_until_ready(out)
    assert out.shape == (B, 6) and out.dtype == jnp.float32
    print("KERNEL_OK")
</pallas_src>

<mosaic_0001>
module attributes {stable_mosaic.version = 11 : i64} {
  func.func @_conv_bn_relu_kernel(%arg0: memref<16x75xf32, #tpu.memory_space<vmem>>, %arg1: memref<75x11200xf32, #tpu.memory_space<vmem>>, %arg2: memref<16x1xf32, #tpu.memory_space<vmem>>, %arg3: memref<16x1xf32, #tpu.memory_space<vmem>>, %arg4: memref<16x1xf32, #tpu.memory_space<vmem>>, %arg5: memref<16x11200xf32, #tpu.memory_space<vmem>>) attributes {dimension_semantics = [], scalar_prefetch = 0 : i64, scratch_operands = 0 : i64, tpu.core_type = #tpu.core_type<tc>} {
    %c0 = arith.constant 0 : index
    %c0_0 = arith.constant 0 : index
    %0 = vector.load %arg0[%c0, %c0_0] : memref<16x75xf32, #tpu.memory_space<vmem>>, vector<16x75xf32>
    %c0_1 = arith.constant 0 : index
    %c0_2 = arith.constant 0 : index
    %1 = vector.load %arg1[%c0_1, %c0_2] : memref<75x11200xf32, #tpu.memory_space<vmem>>, vector<75x11200xf32>
    %cst = arith.constant dense<0.000000e+00> : vector<16x11200xf32>
    %2 = tpu.matmul %0, %1, %cst {dimension_numbers = #tpu.dot_dimension_numbers<[1], [0], [0], [1], [0, 0, 1, 1], [], []>} : vector<16x75xf32>, vector<75x11200xf32>, vector<16x11200xf32> -> vector<16x11200xf32>
    %c0_3 = arith.constant 0 : index
    %c0_4 = arith.constant 0 : index
    %3 = vector.load %arg2[%c0_3, %c0_4] : memref<16x1xf32, #tpu.memory_space<vmem>>, vector<16x1xf32>
    %4 = vector.broadcast %3 : vector<16x1xf32> to vector<16x11200xf32>
    %5 = arith.addf %2, %4 : vector<16x11200xf32>
    %cst_5 = arith.constant dense<0.000000e+00> : vector<16xf32>
    %6 = vector.multi_reduction <add>, %5, %cst_5 [1] : vector<16x11200xf32> to vector<16xf32>
    %7 = vector.shape_cast %6 : vector<16xf32> to vector<16x1xf32>
    %8 = arith.mulf %5, %5 : vector<16x11200xf32>
    %cst_6 = arith.constant dense<0.000000e+00> : vector<16xf32>
    %9 = vector.multi_reduction <add>, %8, %cst_6 [1] : vector<16x11200xf32> to vector<16xf32>
    %10 = vector.shape_cast %9 : vector<16xf32> to vector<16x1xf32>
    %cst_7 = arith.constant 8.92857133E-5 : f32
    %11 = vector.broadcast %cst_7 : f32 to vector<16x1xf32>
    %12 = arith.mulf %7, %11 : vector<16x1xf32>
    %cst_8 = arith.constant 8.92857133E-5 : f32
    %13 = vector.broadcast %cst_8 : f32 to vector<16x1xf32>
    %14 = arith.mulf %10, %13 : vector<16x1xf32>
    %15 = arith.mulf %12, %12 : vector<16x1xf32>
    %16 = arith.subf %14, %15 : vector<16x1xf32>
    %cst_9 = arith.constant 9.99999974E-6 : f32
    %17 = vector.broadcast %cst_9 : f32 to vector<16x1xf32>
    %18 = arith.addf %16, %17 : vector<16x1xf32>
    %19 = math.rsqrt %18 : vector<16x1xf32>
    %c0_10 = arith.constant 0 : index
    %c0_11 = arith.constant 0 : index
    %20 = vector.load %arg3[%c0_10, %c0_11] : memref<16x1xf32, #tpu.memory_space<vmem>>, vector<16x1xf32>
    %21 = arith.mulf %19, %20 : vector<16x1xf32>
    %c0_12 = arith.constant 0 : index
    %c0_13 = arith.constant 0 : index
    %22 = vector.load %arg4[%c0_12, %c0_13] : memref<16x1xf32, #tpu.memory_space<vmem>>, vector<16x1xf32>
    %23 = arith.mulf %12, %21 : vector<16x1xf32>
    %24 = arith.subf %22, %23 : vector<16x1xf32>
    %25 = vector.broadcast %21 : vector<16x1xf32> to vector<16x11200xf32>
    %26 = arith.mulf %5, %25 : vector<16x11200xf32>
    %27 = vector.broadcast %24 : vector<16x1xf32> to vector<16x11200xf32>
    %28 = arith.addf %26, %27 : vector<16x11200xf32>
    %cst_14 = arith.constant 0.000000e+00 : f32
    %29 = vector.broadcast %cst_14 : f32 to vector<16x11200xf32>
    %30 = arith.maximumf %28, %29 : vector<16x11200xf32>
    %c0_15 = arith.constant 0 : index
    %c0_16 = arith.constant 0 : index
    %31 = vector.load %arg5[%c0_15, %c0_16] : memref<16x11200xf32, #tpu.memory_space<vmem>>, vector<16x11200xf32>
    tpu.vector_store %arg5[%c0_15, %c0_16], %30 {strides = array<i32>} : memref<16x11200xf32, #tpu.memory_space<vmem>>, vector<16x11200xf32>,
    return
  }
}

</mosaic_0001>

<bundles_post_ra>
// kernel: tpu_custom_call.1
= control target key start
LH: loop header
LB: loop body
LE: loop exit
PB: predicated region body
PF: predicated region fallthrough
CT: control target
= control target key end

     0   :  { %10 = vsyncpa [#allocation3], 0  ;;  %s7563_s0 = inlined_call_operand.hbm [shape: f32[16,75], index: 0, kind: input, shape index: {}]   ;;  %s7564_s1 = inlined_call_operand.hbm [shape: f32[75,11200], index: 1, kind: input, shape index: {}]   ;;  %s7565_s2 = inlined_call_operand.vmem [shape: f32[16,1], index: 2, kind: input, shape index: {}]   ;;  %s7566_s3 = inlined_call_operand.vmem [shape: f32[16,1], index: 3, kind: input, shape index: {}]   ;;  %s7567_s4 = inlined_call_operand.vmem [shape: f32[16,1], index: 4, kind: input, shape index: {}]   ;;  %s7568_s5 = inlined_call_operand.hbm [shape: f32[16,11200], index: 5, kind: output, shape index: {}]  }
   0x1   :  { %11 = vsyncpa [#allocation6], 0 }
   0x2   :  { %12 = vsyncpa [#allocation4], 0  ;;  %s17_s20 = sshll.u32 %s7563_s0, 4  ;;  %s4929_s21 = smov [#allocation2]   ;;  %s18_s20 = int_to_ptr.hbm [resolvable:$true] %s17_s20 }
   0x3   :  { %s19_s22 = sshll.u32 %s4929_s21, 4  ;;  %s30_s25 = sshll.u32 %s7564_s1, 4  ;;  %s20_s22 = int_to_ptr.vmem [resolvable:$true] %s19_s22  ;;  %s31_s25 = int_to_ptr.hbm [resolvable:$true] %s30_s25 }
   0x4   :  { %s4930_s26 = smov 128   ;;  %s4931_s27 = smov 8  }
   0x5   :  { %25 = dma.hbm_to_vmem [thread:$0]  %s18_s20, 256, %s20_s22, [#allocation3], %s4930_s26, %s4930_s26, %s4931_s27  }
   0x6   :  { %s4932_s28 = smov [#allocation5]   ;;  %s4933_s30 = smov 11264  }
   0x7   :  { %s32_s29 = sshll.u32 %s4932_s28, 4  ;;  %s4934_s6 = smov 704   ;;  %s33_s29 = int_to_ptr.vmem [resolvable:$true] %s32_s29 }
   0x8   :  { %38 = dma.hbm_to_vmem [thread:$0]  %s31_s25, 112640, %s33_s29, [#allocation6], %s4933_s30, %s4933_s30, %s4934_s6  }
   0x9   :  { %4923 = dma.done.wait [#allocation3], 256  }
   0xa   :  { %4924 = vsyncadd [#allocation3], 4294967040 }
   0xb   :  { %4925 = dma.done.wait [#allocation6], 112640  }
   0xc   :  { %4926 = vsyncadd [#allocation6], 4294854656  ;;  %vm954_vm0 = vcmask 1042432   ;;  %v847_v0 = vld [vmem:[#allocation5 + $0x18c0] sm:$0x7]  ;;  %v760_v5 = vld [vmem:[#allocation5 + $0x1608] sm:$0xff] }
   0xd   :  { %v848_v1 = vld [vmem:[#allocation5 + $0x18c8] sm:$0x7]  ;;  %v849_v2 = vld [vmem:[#allocation5 + $0x18d0] sm:$0x7]  ;;  %4564 = vmatpush.msk.msra.mxu0 %vm954_vm0, %v847_v0  ;;  %v850_v3 = vld [vmem:[#allocation5 + $0x18d8] sm:$0x7] }
   0xe   :  { %4567 = vmatpush.msk.msra.mxu1 %vm954_vm0, %v848_v1  ;;  %v759_v4 = vld [vmem:[#allocation5 + $0x1600] sm:$0xff]  ;;  %4570 = vmatpush.msk.msra.mxu2 %vm954_vm0, %v849_v2  ;;  %v761_v6 = vld [vmem:[#allocation5 + $0x1610] sm:$0xff]  ;;  %v762_v7 = vld [vmem:[#allocation5 + $0x1618] sm:$0xff]  ;;  %vm947_vm1 = vcmask 613376   ;;  %vm3329_vm2 = vcmask 523264   ;;  %s4550_s18 = sshll.u32 %s7568_s5, 4  ;;  %s4551_s18 = int_to_ptr.hbm [resolvable:$true] %s4550_s18 }
   0xf   :  { %4573 = vmatpush.msk.msra.mxu3 %vm954_vm0, %v850_v3  ;;  %v671_v8 = vld [vmem:[#allocation5 + $0x1340] sm:$0xff]  ;;  %1226 = vmatpush.msra.mxu0 %v759_v4  ;;  %v672_v9 = vld [vmem:[#allocation5 + $0x1348] sm:$0xff]  ;;  %v673_v10 = vld [vmem:[#allocation5 + $0x1350] sm:$0xff] }
  0x10   :  { %1249 = vmatpush.msra.mxu1 %v760_v5  ;;  %v674_v11 = vld [vmem:[#allocation5 + $0x1358] sm:$0xff]  ;;  %1272 = vmatpush.msra.mxu2 %v761_v6  ;;  %v583_v12 = vld [vmem:[#allocation5 + $0x1080] sm:$0xff]  ;;  %v584_v13 = vld [vmem:[#allocation5 + $0x1088] sm:$0xff] }
  0x11   :  { %1295 = vmatpush.msra.mxu3 %v762_v7  ;;  %1227 = vmatpush.msra.mxu0 %v671_v8  ;;  %v585_v14 = vld [vmem:[#allocation5 + $0x1090] sm:$0xff]  ;;  %v586_v15 = vld [vmem:[#allocation5 + $0x1098] sm:$0xff]  ;;  %v495_v16 = vld [vmem:[#allocation5 + $0xdc0] sm:$0xff] }
  0x12   :  { %1250 = vmatpush.msra.mxu1 %v672_v9  ;;  %1273 = vmatpush.msra.mxu2 %v673_v10  ;;  %v496_v17 = vld [vmem:[#allocation5 + $0xdc8] sm:$0xff]  ;;  %v497_v18 = vld [vmem:[#allocation5 + $0xdd0] sm:$0xff]  ;;  %v498_v19 = vld [vmem:[#allocation5 + $0xdd8] sm:$0xff] }
  0x13   :  { %1296 = vmatpush.msra.mxu3 %v674_v11  ;;  %1228 = vmatpush.msra.mxu0 %v583_v12  ;;  %v407_v20 = vld [vmem:[#allocation5 + $0xb00] sm:$0xff]  ;;  %v408_v21 = vld [vmem:[#allocation5 + $0xb08] sm:$0xff]  ;;  %v409_v22 = vld [vmem:[#allocation5 + $0xb10] sm:$0xff] }
  0x14   :  { %1251 = vmatpush.msra.mxu1 %v584_v13  ;;  %1274 = vmatpush.msra.mxu2 %v585_v14  ;;  %v410_v23 = vld [vmem:[#allocation5 + $0xb18] sm:$0xff]  ;;  %v319_v24 = vld [vmem:[#allocation5 + $0x840] sm:$0xff]  ;;  %v320_v25 = vld [vmem:[#allocation5 + $0x848] sm:$0xff] }
  0x15   :  { %1297 = vmatpush.msra.mxu3 %v586_v15  ;;  %1229 = vmatpush.msra.mxu0 %v495_v16  ;;  %v321_v26 = vld [vmem:[#allocation5 + $0x850] sm:$0xff]  ;;  %v322_v27 = vld [vmem:[#allocation5 + $0x858] sm:$0xff]  ;;  %v231_v28 = vld [vmem:[#allocation5 + $0x580] sm:$0xff] }
  0x16   :  { %1252 = vmatpush.msra.mxu1 %v496_v17  ;;  %1275 = vmatpush.msra.mxu2 %v497_v18  ;;  %v232_v29 = vld [vmem:[#allocation5 + $0x588] sm:$0xff]  ;;  %v233_v30 = vld [vmem:[#allocation5 + $0x590] sm:$0xff]  ;;  %v234_v31 = vld [vmem:[#allocation5 + $0x598] sm:$0xff] }
  0x17   :  { %1298 = vmatpush.msra.mxu3 %v498_v19  ;;  %1230 = vmatpush.msra.mxu0 %v407_v20  ;;  %v143_v32 = vld [vmem:[#allocation5 + $0x2c0] sm:$0xff]  ;;  %v144_v33 = vld [vmem:[#allocation5 + $0x2c8] sm:$0xff]  ;;  %v145_v34 = vld [vmem:[#allocation5 + $0x2d0] sm:$0xff] }
  0x18   :  { %1253 = vmatpush.msra.mxu1 %v408_v21  ;;  %1276 = vmatpush.msra.mxu2 %v409_v22  ;;  %v146_v35 = vld [vmem:[#allocation5 + $0x2d8] sm:$0xff]  ;;  %v55_v36 = vld [vmem:[#allocation5] sm:$0xff]  ;;  %v56_v37 = vld [vmem:[#allocation5 + $0x8] sm:$0xff] }
  0x19   :  { %1299 = vmatpush.msra.mxu3 %v410_v23  ;;  %1231 = vmatpush.msra.mxu0 %v319_v24  ;;  %v57_v38 = vld [vmem:[#allocation5 + $0x10] sm:$0xff]  ;;  %v58_v39 = vld [vmem:[#allocation5 + $0x18] sm:$0xff]  ;;  %v851_v40 = vld [vmem:[#allocation5 + $0x18e0] sm:$0x7] }
  0x1a   :  { %1254 = vmatpush.msra.mxu1 %v320_v25  ;;  %1277 = vmatpush.msra.mxu2 %v321_v26  ;;  %v852_v41 = vld [vmem:[#allocation5 + $0x18e8] sm:$0x7]  ;;  %v853_v42 = vld [vmem:[#allocation5 + $0x18f0] sm:$0x7]  ;;  %v854_v43 = vld [vmem:[#allocation5 + $0x18f8] sm:$0x7] }
  0x1b   :  { %1300 = vmatpush.msra.mxu3 %v322_v27  ;;  %1232 = vmatpush.msra.mxu0 %v231_v28  ;;  %v763_v44 = vld [vmem:[#allocation5 + $0x1620] sm:$0xff]  ;;  %v764_v45 = vld [vmem:[#allocation5 + $0x1628] sm:$0xff]  ;;  %v765_v46 = vld [vmem:[#allocation5 + $0x1630] sm:$0xff] }
  0x1c   :  { %1255 = vmatpush.msra.mxu1 %v232_v29  ;;  %1278 = vmatpush.msra.mxu2 %v233_v30  ;;  %v766_v47 = vld [vmem:[#allocation5 + $0x1638] sm:$0xff]  ;;  %v675_v48 = vld [vmem:[#allocation5 + $0x1360] sm:$0xff]  ;;  %v676_v49 = vld [vmem:[#allocation5 + $0x1368] sm:$0xff] }
  0x1d   :  { %1301 = vmatpush.msra.mxu3 %v234_v31  ;;  %1233 = vmatpush.msra.mxu0 %v143_v32  ;;  %v677_v50 = vld [vmem:[#allocation5 + $0x1370] sm:$0xff]  ;;  %v678_v51 = vld [vmem:[#allocation5 + $0x1378] sm:$0xff]  ;;  %v587_v53 = vld [vmem:[#allocation5 + $0x10a0] sm:$0xff] }
  0x1e   :  { %1256 = vmatpush.msra.mxu1 %v144_v33  ;;  %1279 = vmatpush.msra.mxu2 %v145_v34  ;;  %v4984_v52 = vld [vmem:[#allocation2] sm:$0xff]  ;;  %v588_v54 = vld [vmem:[#allocation5 + $0x10a8] sm:$0xff]  ;;  %v590_v56 = vld [vmem:[#allocation5 + $0x10b8] sm:$0xff] }
  0x1f   :  { %1302 = vmatpush.msra.mxu3 %v146_v35  ;;  %1234 = vmatpush.msra.mxu0 %v55_v36  ;;  %v589_v55 = vld [vmem:[#allocation5 + $0x10b0] sm:$0xff]  ;;  %v499_v57 = vld [vmem:[#allocation5 + $0xde0] sm:$0xff]  ;;  %v500_v58 = vld [vmem:[#allocation5 + $0xde8] sm:$0xff] }
  0x20   :  { %1257 = vmatpush.msra.mxu1 %v56_v37  ;;  %1280 = vmatpush.msra.mxu2 %v57_v38  ;;  %v501_v59 = vld [vmem:[#allocation5 + $0xdf0] sm:$0xff]  ;;  %v502_v60 = vld [vmem:[#allocation5 + $0xdf8] sm:$0xff]  ;;  %v411_v61 = vld [vmem:[#allocation5 + $0xb20] sm:$0xff] }
  0x21   :  { %1303 = vmatpush.msra.mxu3 %v58_v39  ;;  %4576 = vmatpush.msk.msrb.mxu0 %vm954_vm0, %v851_v40  ;;  %v412_v62 = vld [vmem:[#allocation5 + $0xb28] sm:$0xff]  ;;  %v413_v63 = vld [vmem:[#allocation5 + $0xb30] sm:$0xff]  ;;  %v414_v0 = vld [vmem:[#allocation5 + $0xb38] sm:$0xff] }
  0x22   :  { %4579 = vmatpush.msk.msrb.mxu1 %vm954_vm0, %v852_v41  ;;  %4582 = vmatpush.msk.msrb.mxu2 %vm954_vm0, %v853_v42  ;;  %v323_v1 = vld [vmem:[#allocation5 + $0x860] sm:$0xff]  ;;  %v324_v2 = vld [vmem:[#allocation5 + $0x868] sm:$0xff]  ;;  %v325_v3 = vld [vmem:[#allocation5 + $0x870] sm:$0xff] }
  0x23   :  { %4585 = vmatpush.msk.msrb.mxu3 %vm954_vm0, %v854_v43  ;;  %1318 = vmatpush.msrb.mxu0 %v763_v44  ;;  %v326_v4 = vld [vmem:[#allocation5 + $0x878] sm:$0xff]  ;;  %v235_v6 = vld [vmem:[#allocation5 + $0x5a0] sm:$0xff]  ;;  %v236_v7 = vld [vmem:[#allocation5 + $0x5a8] sm:$0xff] }
  0x24   :  { %1341 = vmatpush.msrb.mxu1 %v764_v45  ;;  %1364 = vmatpush.msrb.mxu2 %v765_v46  ;;  %v4994_v5 = vld [vmem:[#allocation2 + $0x8] sm:$0xff]  ;;  %v237_v8 = vld [vmem:[#allocation5 + $0x5b0] sm:$0xff]  ;;  %v147_v10 = vld [vmem:[#allocation5 + $0x2e0] sm:$0xff] }
  0x25   :  { %1387 = vmatpush.msrb.mxu3 %v766_v47  ;;  %1319 = vmatpush.msrb.mxu0 %v675_v48  ;;  %v238_v9 = vld [vmem:[#allocation5 + $0x5b8] sm:$0xff]  ;;  %v148_v11 = vld [vmem:[#allocation5 + $0x2e8] sm:$0xff]  ;;  %v149_v12 = vld [vmem:[#allocation5 + $0x2f0] sm:$0xff]  ;;  %v7569_v47 = vmov 0  }
  0x26   :  { %1342 = vmatpush.msrb.mxu1 %v676_v49  ;;  %1365 = vmatpush.msrb.mxu2 %v677_v50  ;;  %v150_v13 = vld [vmem:[#allocation5 + $0x2f8] sm:$0xff]  ;;  %v59_v14 = vld [vmem:[#allocation5 + $0x20] sm:$0xff]  ;;  %v60_v15 = vld [vmem:[#allocation5 + $0x28] sm:$0xff] }
  0x27   :  { %1388 = vmatpush.msrb.mxu3 %v678_v51  ;;  %4565 = vmatmul.msk.f32.vlgmr.msra.gmra.mxu0 %vm947_vm1, %v4984_v52  ;;  %v61_v16 = vld [vmem:[#allocation5 + $0x30] sm:$0xff]  ;;  %v62_v17 = vld [vmem:[#allocation5 + $0x38] sm:$0xff]  ;;  %v855_v18 = vld [vmem:[#allocation5 + $0x1900] sm:$0x7] }
  0x28   :  { %4571 = vmatmul.msk.f32.vlgmr.msra.gmra.mxu2 %vm947_vm1, %v4984_v52  ;;  %1320 = vmatpush.msrb.mxu0 %v587_v53  ;;  %v856_v19 = vld [vmem:[#allocation5 + $0x1908] sm:$0x7]  ;;  %v857_v20 = vld [vmem:[#allocation5 + $0x1910] sm:$0x7]  ;;  %v858_v21 = vld [vmem:[#allocation5 + $0x1918] sm:$0x7] }
  0x29   :  { %1343 = vmatpush.msrb.mxu1 %v588_v54  ;;  %1366 = vmatpush.msrb.mxu2 %v589_v55  ;;  %v767_v22 = vld [vmem:[#allocation5 + $0x1640] sm:$0xff]  ;;  %v768_v23 = vld [vmem:[#allocation5 + $0x1648] sm:$0xff]  ;;  %v769_v24 = vld [vmem:[#allocation5 + $0x1650] sm:$0xff] }
  0x2a   :  { %1389 = vmatpush.msrb.mxu3 %v590_v56  ;;  %4568 = vmatmul.msk.f32.vlgmr.msra.gmra.mxu1 %vm947_vm1, %v4984_v52  ;;  %v770_v25 = vld [vmem:[#allocation5 + $0x1658] sm:$0xff]  ;;  %v679_v26 = vld [vmem:[#allocation5 + $0x1380] sm:$0xff]  ;;  %v680_v27 = vld [vmem:[#allocation5 + $0x1388] sm:$0xff] }
  0x2b   :  { %4574 = vmatmul.msk.f32.vlgmr.msra.gmra.mxu3 %vm947_vm1, %v4984_v52  ;;  %1321 = vmatpush.msrb.mxu0 %v499_v57  ;;  %v681_v28 = vld [vmem:[#allocation5 + $0x1390] sm:$0xff]  ;;  %v682_v29 = vld [vmem:[#allocation5 + $0x1398] sm:$0xff]  ;;  %v591_v30 = vld [vmem:[#allocation5 + $0x10c0] sm:$0xff] }
  0x2c   :  { %1344 = vmatpush.msrb.mxu1 %v500_v58  ;;  %1367 = vmatpush.msrb.mxu2 %v501_v59  ;;  %v592_v31 = vld [vmem:[#allocation5 + $0x10c8] sm:$0xff]  ;;  %v593_v32 = vld [vmem:[#allocation5 + $0x10d0] sm:$0xff]  ;;  %v594_v33 = vld [vmem:[#allocation5 + $0x10d8] sm:$0xff] }
  0x2d   :  { %1390 = vmatpush.msrb.mxu3 %v502_v60  ;;  %1322 = vmatpush.msrb.mxu0 %v411_v61  ;;  %v503_v34 = vld [vmem:[#allocation5 + $0xe00] sm:$0xff]  ;;  %v504_v35 = vld [vmem:[#allocation5 + $0xe08] sm:$0xff]  ;;  %v505_v36 = vld [vmem:[#allocation5 + $0xe10] sm:$0xff] }
  0x2e   :  { %1345 = vmatpush.msrb.mxu1 %v412_v62  ;;  %1368 = vmatpush.msrb.mxu2 %v413_v63  ;;  %v506_v37 = vld [vmem:[#allocation5 + $0xe18] sm:$0xff]  ;;  %v415_v38 = vld [vmem:[#allocation5 + $0xb40] sm:$0xff]  ;;  %v416_v39 = vld [vmem:[#allocation5 + $0xb48] sm:$0xff] }
  0x2f   :  { %1391 = vmatpush.msrb.mxu3 %v414_v0  ;;  %1323 = vmatpush.msrb.mxu0 %v323_v1  ;;  %v417_v40 = vld [vmem:[#allocation5 + $0xb50] sm:$0xff]  ;;  %v418_v41 = vld [vmem:[#allocation5 + $0xb58] sm:$0xff]  ;;  %v327_v42 = vld [vmem:[#allocation5 + $0x880] sm:$0xff] }
  0x30   :  { %1346 = vmatpush.msrb.mxu1 %v324_v2  ;;  %1369 = vmatpush.msrb.mxu2 %v325_v3  ;;  %v328_v43 = vld [vmem:[#allocation5 + $0x888] sm:$0xff]  ;;  %v329_v44 = vld [vmem:[#allocation5 + $0x890] sm:$0xff]  ;;  %v330_v45 = vld [vmem:[#allocation5 + $0x898] sm:$0xff] }
  0x31   :  { %1392 = vmatpush.msrb.mxu3 %v326_v4  ;;  %4566 = vmatmul.msk.f32.gmra.mxu0 %vm947_vm1, %v4994_v5  ;;  %v935_v46 = vld [vmem:[%s7565_s2] sm:$0xff]  ;;  %v239_v48 = vld [vmem:[#allocation5 + $0x5c0] sm:$0xff]  ;;  %v240_v49 = vld [vmem:[#allocation5 + $0x5c8] sm:$0xff] }
  0x32   :  { %4572 = vmatmul.msk.f32.gmra.mxu2 %vm947_vm1, %v4994_v5  ;;  %1324 = vmatpush.msrb.mxu0 %v235_v6  ;;  %v241_v50 = vld [vmem:[#allocation5 + $0x5d0] sm:$0xff]  ;;  %v242_v51 = vld [vmem:[#allocation5 + $0x5d8] sm:$0xff]  ;;  %v151_v53 = vld [vmem:[#allocation5 + $0x300] sm:$0xff] }
  0x33   :  { %1347 = vmatpush.msrb.mxu1 %v236_v7  ;;  %1370 = vmatpush.msrb.mxu2 %v237_v8  ;;  %v152_v54 = vld [vmem:[#allocation5 + $0x308] sm:$0xff]  ;;  %v153_v55 = vld [vmem:[#allocation5 + $0x310] sm:$0xff]  ;;  %v154_v56 = vld [vmem:[#allocation5 + $0x318] sm:$0xff] }
  0x34   :  { %1393 = vmatpush.msrb.mxu3 %v238_v9  ;;  %4569 = vmatmul.msk.f32.gmra.mxu1 %vm947_vm1, %v4994_v5  ;;  %v63_v57 = vld [vmem:[#allocation5 + $0x40] sm:$0xff]  ;;  %v64_v58 = vld [vmem:[#allocation5 + $0x48] sm:$0xff]  ;;  %v65_v59 = vld [vmem:[#allocation5 + $0x50] sm:$0xff] }
  0x35   :  { %4575 = vmatmul.msk.f32.gmra.mxu3 %vm947_vm1, %v4994_v5  ;;  %1325 = vmatpush.msrb.mxu0 %v147_v10  ;;  %v66_v60 = vld [vmem:[#allocation5 + $0x58] sm:$0xff]  ;;  %v859_v61 = vld [vmem:[#allocation5 + $0x1920] sm:$0x7]  ;;  %v860_v62 = vld [vmem:[#allocation5 + $0x1928] sm:$0x7] }
  0x36   :  { %1348 = vmatpush.msrb.mxu1 %v148_v11  ;;  %1371 = vmatpush.msrb.mxu2 %v149_v12  ;;  %v861_v63 = vld [vmem:[#allocation5 + $0x1930] sm:$0x7]  ;;  %v862_v0 = vld [vmem:[#allocation5 + $0x1938] sm:$0x7]  ;;  %v771_v1 = vld [vmem:[#allocation5 + $0x1660] sm:$0xff] }
  0x37   :  { %1394 = vmatpush.msrb.mxu3 %v150_v13  ;;  %1326 = vmatpush.msrb.mxu0 %v59_v14  ;;  %v772_v2 = vld [vmem:[#allocation5 + $0x1668] sm:$0xff]  ;;  %v773_v3 = vld [vmem:[#allocation5 + $0x1670] sm:$0xff]  ;;  %v774_v4 = vld [vmem:[#allocation5 + $0x1678] sm:$0xff] }
  0x38   :  { %1349 = vmatpush.msrb.mxu1 %v60_v15  ;;  %1372 = vmatpush.msrb.mxu2 %v61_v16  ;;  %v683_v6 = vld [vmem:[#allocation5 + $0x13a0] sm:$0xff]  ;;  %v684_v7 = vld [vmem:[#allocation5 + $0x13a8] sm:$0xff]  ;;  %v685_v8 = vld [vmem:[#allocation5 + $0x13b0] sm:$0xff] }
  0x39   :  { %1395 = vmatpush.msrb.mxu3 %v62_v17  ;;  %4588 = vmatpush.msk.msra.mxu0 %vm954_vm0, %v855_v18  ;;  %v686_v9 = vld [vmem:[#allocation5 + $0x13b8] sm:$0xff]  ;;  %v595_v11 = vld [vmem:[#allocation5 + $0x10e0] sm:$0xff]  ;;  %v596_v12 = vld [vmem:[#allocation5 + $0x10e8] sm:$0xff] }
  0x3a   :  { %4591 = vmatpush.msk.msra.mxu1 %vm954_vm0, %v856_v19  ;;  %4594 = vmatpush.msk.msra.mxu2 %vm954_vm0, %v857_v20  ;;  %v936_v10 = vld [vmem:[%s7565_s2 + $0x8] sm:$0xff]  ;;  %v597_v13 = vld [vmem:[#allocation5 + $0x10f0] sm:$0xff]  ;;  %v507_v15 = vld [vmem:[#allocation5 + $0xe20] sm:$0xff] }
  0x3b   :  { %4597 = vmatpush.msk.msra.mxu3 %vm954_vm0, %v858_v21  ;;  %1410 = vmatpush.msra.mxu0 %v767_v22  ;;  %v598_v14 = vld [vmem:[#allocation5 + $0x10f8] sm:$0xff]  ;;  %v508_v16 = vld [vmem:[#allocation5 + $0xe28] sm:$0xff]  ;;  %v509_v17 = vld [vmem:[#allocation5 + $0xe30] sm:$0xff] }
  0x3c   :  { %1433 = vmatpush.msra.mxu1 %v768_v23  ;;  %1456 = vmatpush.msra.mxu2 %v769_v24  ;;  %v510_v18 = vld [vmem:[#allocation5 + $0xe38] sm:$0xff]  ;;  %v419_v19 = vld [vmem:[#allocation5 + $0xb60] sm:$0xff]  ;;  %v420_v20 = vld [vmem:[#allocation5 + $0xb68] sm:$0xff] }
  0x3d   :  { %1479 = vmatpush.msra.mxu3 %v770_v25  ;;  %4577 = vmatmul.msk.f32.vlgmr.msrb.gmra.mxu0 %vm947_vm1, %v4984_v52  ;;  %v421_v21 = vld [vmem:[#allocation5 + $0xb70] sm:$0xff]  ;;  %v422_v22 = vld [vmem:[#allocation5 + $0xb78] sm:$0xff]  ;;  %v331_v23 = vld [vmem:[#allocation5 + $0x8a0] sm:$0xff] }
  0x3e   :  { %4583 = vmatmul.msk.f32.vlgmr.msrb.gmra.mxu2 %vm947_vm1, %v4984_v52  ;;  %1411 = vmatpush.msra.mxu0 %v679_v26  ;;  %v332_v24 = vld [vmem:[#allocation5 + $0x8a8] sm:$0xff]  ;;  %v333_v25 = vld [vmem:[#allocation5 + $0x8b0] sm:$0xff]  ;;  %v334_v26 = vld [vmem:[#allocation5 + $0x8b8] sm:$0xff] }
  0x3f   :  { %1434 = vmatpush.msra.mxu1 %v680_v27  ;;  %1457 = vmatpush.msra.mxu2 %v681_v28  ;;  %v243_v27 = vld [vmem:[#allocation5 + $0x5e0] sm:$0xff]  ;;  %v244_v28 = vld [vmem:[#allocation5 + $0x5e8] sm:$0xff] }
  0x40   :  { %1480 = vmatpush.msra.mxu3 %v682_v29  ;;  %4580 = vmatmul.msk.f32.vlgmr.msrb.gmra.mxu1 %vm947_vm1, %v4984_v52  ;;  %v245_v29 = vld [vmem:[#allocation5 + $0x5f0] sm:$0xff] }
  0x41   :  { %4586 = vmatmul.msk.f32.vlgmr.msrb.gmra.mxu3 %vm947_vm1, %v4984_v52  ;;  %1412 = vmatpush.msra.mxu0 %v591_v30  ;;  %v246_v30 = vld [vmem:[#allocation5 + $0x5f8] sm:$0xff] }
  0x42   :  { %1435 = vmatpush.msra.mxu1 %v592_v31  ;;  %1458 = vmatpush.msra.mxu2 %v593_v32  ;;  %v155_v31 = vld [vmem:[#allocation5 + $0x320] sm:$0xff]  ;;  %v156_v32 = vld [vmem:[#allocation5 + $0x328] sm:$0xff] }
  0x43   :  { %1481 = vmatpush.msra.mxu3 %v594_v33  ;;  %1413 = vmatpush.msra.mxu0 %v503_v34  ;;  %v157_v33 = vld [vmem:[#allocation5 + $0x330] sm:$0xff]  ;;  %v158_v34 = vld [vmem:[#allocation5 + $0x338] sm:$0xff] }
  0x44   :  { %1436 = vmatpush.msra.mxu1 %v504_v35  ;;  %1459 = vmatpush.msra.mxu2 %v505_v36  ;;  %v67_v35 = vld [vmem:[#allocation5 + $0x60] sm:$0xff]  ;;  %v68_v36 = vld [vmem:[#allocation5 + $0x68] sm:$0xff] }
  0x45   :  { %1482 = vmatpush.msra.mxu3 %v506_v37  ;;  %1414 = vmatpush.msra.mxu0 %v415_v38  ;;  %v69_v37 = vld [vmem:[#allocation5 + $0x70] sm:$0xff]  ;;  %v70_v38 = vld [vmem:[#allocation5 + $0x78] sm:$0xff] }
  0x46   :  { %1437 = vmatpush.msra.mxu1 %v416_v39  ;;  %1460 = vmatpush.msra.mxu2 %v417_v40  ;;  %v863_v39 = vld [vmem:[#allocation5 + $0x1940] sm:$0x7]  ;;  %v864_v40 = vld [vmem:[#allocation5 + $0x1948] sm:$0x7] }
  0x47   :  { %1483 = vmatpush.msra.mxu3 %v418_v41  ;;  %4578 = vmatmul.msk.f32.gmra.mxu0 %vm947_vm1, %v4994_v5  ;;  %v865_v41 = vld [vmem:[#allocation5 + $0x1950] sm:$0x7] }
  0x48   :  { %4584 = vmatmul.msk.f32.gmra.mxu2 %vm947_vm1, %v4994_v5  ;;  %4836 = vset.pattern.permute.xlu0 %v7569_v47  ;;  %v205_v47 = vld [vmem:[#allocation5 + $0x4b0] sm:$0xff] }
  0x49   :  { %1415 = vmatpush.msra.mxu0 %v327_v42  ;;  %1438 = vmatpush.msra.mxu1 %v328_v43  ;;  %v866_v42 = vld [vmem:[#allocation5 + $0x1958] sm:$0x7]  ;;  %v775_v43 = vld [vmem:[#allocation5 + $0x1680] sm:$0xff] }
  0x4a   :  { %1461 = vmatpush.msra.mxu2 %v329_v44  ;;  %1484 = vmatpush.msra.mxu3 %v330_v45  ;;  %v776_v44 = vld [vmem:[#allocation5 + $0x1688] sm:$0xff]  ;;  %v777_v45 = vld [vmem:[#allocation5 + $0x1690] sm:$0xff] }
  0x4b   :  { %939 = vperm.xlu0 %4836, %v935_v46   ;;  %4581 = vmatmul.msk.f32.gmra.mxu1 %vm947_vm1, %v4994_v5  ;;  %v778_v46 = vld [vmem:[#allocation5 + $0x1698] sm:$0xff] }
  0x4c   :  { %4587 = vmatmul.msk.f32.gmra.mxu3 %vm947_vm1, %v4994_v5  ;;  %1416 = vmatpush.msra.mxu0 %v239_v48  ;;  %v687_v48 = vld [vmem:[#allocation5 + $0x13c0] sm:$0xff] }
  0x4d   :  { %1439 = vmatpush.msra.mxu1 %v240_v49  ;;  %1462 = vmatpush.msra.mxu2 %v241_v50  ;;  %v688_v49 = vld [vmem:[#allocation5 + $0x13c8] sm:$0xff]  ;;  %v689_v50 = vld [vmem:[#allocation5 + $0x13d0] sm:$0xff] }
  0x4e   :  { %1485 = vmatpush.msra.mxu3 %v242_v51  ;;  %1417 = vmatpush.msra.mxu0 %v151_v53  ;;  %v690_v51 = vld [vmem:[#allocation5 + $0x13d8] sm:$0xff]  ;;  %v599_v53 = vld [vmem:[#allocation5 + $0x1100] sm:$0xff] }
  0x4f   :  { %1440 = vmatpush.msra.mxu1 %v152_v54  ;;  %1463 = vmatpush.msra.mxu2 %v153_v55  ;;  %v600_v54 = vld [vmem:[#allocation5 + $0x1108] sm:$0xff]  ;;  %v601_v55 = vld [vmem:[#allocation5 + $0x1110] sm:$0xff] }
  0x50   :  { %1486 = vmatpush.msra.mxu3 %v154_v56  ;;  %1418 = vmatpush.msra.mxu0 %v63_v57  ;;  %v602_v56 = vld [vmem:[#allocation5 + $0x1118] sm:$0xff]  ;;  %v511_v57 = vld [vmem:[#allocation5 + $0xe40] sm:$0xff] }
  0x51   :  { %1441 = vmatpush.msra.mxu1 %v64_v58  ;;  %1464 = vmatpush.msra.mxu2 %v65_v59  ;;  %v512_v58 = vld [vmem:[#allocation5 + $0xe48] sm:$0xff]  ;;  %v513_v59 = vld [vmem:[#allocation5 + $0xe50] sm:$0xff] }
  0x52   :  { %1487 = vmatpush.msra.mxu3 %v66_v60  ;;  %4589 = vmatmul.msk.f32.vlgmr.msra.gmra.mxu0 %vm947_vm1, %v4984_v52  ;;  %v514_v60 = vld [vmem:[#allocation5 + $0xe58] sm:$0xff] }
  0x53   :  { %4595 = vmatmul.msk.f32.vlgmr.msra.gmra.mxu2 %vm947_vm1, %v4984_v52  ;;  %4600 = vmatpush.msk.msrb.mxu0 %vm954_vm0, %v859_v61  ;;  %v423_v61 = vld [vmem:[#allocation5 + $0xb80] sm:$0xff] }
  0x54   :  { %4603 = vmatpush.msk.msrb.mxu1 %vm954_vm0, %v860_v62  ;;  %4606 = vmatpush.msk.msrb.mxu2 %vm954_vm0, %v861_v63  ;;  %v424_v62 = vld [vmem:[#allocation5 + $0xb88] sm:$0xff]  ;;  %v425_v63 = vld [vmem:[#allocation5 + $0xb90] sm:$0xff] }
  0x55   :  { %4609 = vmatpush.msk.msrb.mxu3 %vm954_vm0, %v862_v0  ;;  %4592 = vmatmul.msk.f32.vlgmr.msra.gmra.mxu1 %vm947_vm1, %v4984_v52  ;;  %v426_v0 = vld [vmem:[#allocation5 + $0xb98] sm:$0xff] }
  0x56   :  { %4598 = vmatmul.msk.f32.vlgmr.msra.gmra.mxu3 %vm947_vm1, %v4984_v52  ;;  %1502 = vmatpush.msrb.mxu0 %v771_v1  ;;  %v335_v1 = vld [vmem:[#allocation5 + $0x8c0] sm:$0xff] }
  0x57   :  { %1525 = vmatpush.msrb.mxu1 %v772_v2  ;;  %1548 = vmatpush.msrb.mxu2 %v773_v3  ;;  %v336_v2 = vld [vmem:[#allocation5 + $0x8c8] sm:$0xff]  ;;  %v337_v3 = vld [vmem:[#allocation5 + $0x8d0] sm:$0xff] }
  0x58   :  { %1571 = vmatpush.msrb.mxu3 %v774_v4  ;;  %1503 = vmatpush.msrb.mxu0 %v683_v6  ;;  %v338_v4 = vld [vmem:[#allocation5 + $0x8d8] sm:$0xff]  ;;  %v247_v6 = vld [vmem:[#allocation5 + $0x600] sm:$0xff] }
  0x59   :  { %1526 = vmatpush.msrb.mxu1 %v684_v7  ;;  %1549 = vmatpush.msrb.mxu2 %v685_v8  ;;  %v248_v7 = vld [vmem:[#allocation5 + $0x608] sm:$0xff]  ;;  %v249_v8 = vld [vmem:[#allocation5 + $0x610] sm:$0xff] }
  0x5a   :  { %1572 = vmatpush.msrb.mxu3 %v686_v9  ;;  %944 = vperm.xlu0 %4836, %v936_v10   ;;  %v250_v9 = vld [vmem:[#allocation5 + $0x618] sm:$0xff]  ;;  %v159_v10 = vld [vmem:[#allocation5 + $0x340] sm:$0xff] }
  0x5b   :  { %1504 = vmatpush.msrb.mxu0 %v595_v11  ;;  %1527 = vmatpush.msrb.mxu1 %v596_v12  ;;  %v160_v11 = vld [vmem:[#allocation5 + $0x348] sm:$0xff]  ;;  %v161_v12 = vld [vmem:[#allocation5 + $0x350] sm:$0xff] }
  0x5c   :  { %1550 = vmatpush.msrb.mxu2 %v597_v13  ;;  %1573 = vmatpush.msrb.mxu3 %v598_v14  ;;  %v162_v13 = vld [vmem:[#allocation5 + $0x358] sm:$0xff]  ;;  %v71_v14 = vld [vmem:[#allocation5 + $0x80] sm:$0xff] }
  0x5d   :  { %4590 = vmatmul.msk.f32.gmra.mxu0 %vm947_vm1, %v4994_v5  ;;  %4596 = vmatmul.msk.f32.gmra.mxu2 %vm947_vm1, %v4994_v5 }
  0x5e   :  { %1505 = vmatpush.msrb.mxu0 %v507_v15  ;;  %1528 = vmatpush.msrb.mxu1 %v508_v16  ;;  %v72_v15 = vld [vmem:[#allocation5 + $0x88] sm:$0xff]  ;;  %v73_v16 = vld [vmem:[#allocation5 + $0x90] sm:$0xff] }
  0x5f   :  { %1551 = vmatpush.msrb.mxu2 %v509_v17  ;;  %1574 = vmatpush.msrb.mxu3 %v510_v18  ;;  %v74_v17 = vld [vmem:[#allocation5 + $0x98] sm:$0xff]  ;;  %v867_v18 = vld [vmem:[#allocation5 + $0x1960] sm:$0x7] }
  0x60   :  { %4593 = vmatmul.msk.f32.gmra.mxu1 %vm947_vm1, %v4994_v5  ;;  %4599 = vmatmul.msk.f32.gmra.mxu3 %vm947_vm1, %v4994_v5 }
  0x61   :  { %1506 = vmatpush.msrb.mxu0 %v419_v19  ;;  %1529 = vmatpush.msrb.mxu1 %v420_v20  ;;  %v868_v19 = vld [vmem:[#allocation5 + $0x1968] sm:$0x7]  ;;  %v869_v20 = vld [vmem:[#allocation5 + $0x1970] sm:$0x7] }
  0x62   :  { %1552 = vmatpush.msrb.mxu2 %v421_v21  ;;  %1575 = vmatpush.msrb.mxu3 %v422_v22  ;;  %v870_v21 = vld [vmem:[#allocation5 + $0x1978] sm:$0x7]  ;;  %v779_v22 = vld [vmem:[#allocation5 + $0x16a0] sm:$0xff] }
  0x63   :  { %1507 = vmatpush.msrb.mxu0 %v331_v23  ;;  %1530 = vmatpush.msrb.mxu1 %v332_v24  ;;  %v780_v23 = vld [vmem:[#allocation5 + $0x16a8] sm:$0xff]  ;;  %v781_v24 = vld [vmem:[#allocation5 + $0x16b0] sm:$0xff] }
  0x64   :  { %1553 = vmatpush.msrb.mxu2 %v333_v25  ;;  %1576 = vmatpush.msrb.mxu3 %v334_v26  ;;  %v782_v25 = vld [vmem:[#allocation5 + $0x16b8] sm:$0xff]  ;;  %v691_v26 = vld [vmem:[#allocation5 + $0x13e0] sm:$0xff] }
  0x65   :  { %1508 = vmatpush.msrb.mxu0 %v243_v27  ;;  %1531 = vmatpush.msrb.mxu1 %v244_v28  ;;  %v692_v27 = vld [vmem:[#allocation5 + $0x13e8] sm:$0xff]  ;;  %v693_v28 = vld [vmem:[#allocation5 + $0x13f0] sm:$0xff] }
  0x66   :  { %1554 = vmatpush.msrb.mxu2 %v245_v29  ;;  %1577 = vmatpush.msrb.mxu3 %v246_v30  ;;  %v694_v29 = vld [vmem:[#allocation5 + $0x13f8] sm:$0xff]  ;;  %v603_v30 = vld [vmem:[#allocation5 + $0x1120] sm:$0xff] }
  0x67   :  { %1509 = vmatpush.msrb.mxu0 %v155_v31  ;;  %1532 = vmatpush.msrb.mxu1 %v156_v32  ;;  %v604_v31 = vld [vmem:[#allocation5 + $0x1128] sm:$0xff]  ;;  %v605_v32 = vld [vmem:[#allocation5 + $0x1130] sm:$0xff] }
  0x68   :  { %1555 = vmatpush.msrb.mxu2 %v157_v33  ;;  %1578 = vmatpush.msrb.mxu3 %v158_v34  ;;  %v606_v33 = vld [vmem:[#allocation5 + $0x1138] sm:$0xff]  ;;  %v515_v34 = vld [vmem:[#allocation5 + $0xe60] sm:$0xff] }
  0x69   :  { %1510 = vmatpush.msrb.mxu0 %v67_v35  ;;  %1533 = vmatpush.msrb.mxu1 %v68_v36  ;;  %v516_v35 = vld [vmem:[#allocation5 + $0xe68] sm:$0xff]  ;;  %v517_v36 = vld [vmem:[#allocation5 + $0xe70] sm:$0xff] }
  0x6a   :  { %1556 = vmatpush.msrb.mxu2 %v69_v37  ;;  %1579 = vmatpush.msrb.mxu3 %v70_v38  ;;  %v518_v37 = vld [vmem:[#allocation5 + $0xe78] sm:$0xff]  ;;  %v427_v38 = vld [vmem:[#allocation5 + $0xba0] sm:$0xff] }
  0x6b   :  { %4601 = vmatmul.msk.f32.vlgmr.msrb.gmra.mxu0 %vm947_vm1, %v4984_v52  ;;  %4607 = vmatmul.msk.f32.vlgmr.msrb.gmra.mxu2 %vm947_vm1, %v4984_v52 }
  0x6c   :  { %4612 = vmatpush.msk.msra.mxu0 %vm954_vm0, %v863_v39  ;;  %4615 = vmatpush.msk.msra.mxu1 %vm954_vm0, %v864_v40  ;;  %v428_v39 = vld [vmem:[#allocation5 + $0xba8] sm:$0xff]  ;;  %v429_v40 = vld [vmem:[#allocation5 + $0xbb0] sm:$0xff] }
  0x6d   :  { %4618 = vmatpush.msk.msra.mxu2 %vm954_vm0, %v865_v41  ;;  %4621 = vmatpush.msk.msra.mxu3 %vm954_vm0, %v866_v42  ;;  %v430_v41 = vld [vmem:[#allocation5 + $0xbb8] sm:$0xff]  ;;  %v339_v42 = vld [vmem:[#allocation5 + $0x8e0] sm:$0xff] }
  0x6e   :  { %4604 = vmatmul.msk.f32.vlgmr.msrb.gmra.mxu1 %vm947_vm1, %v4984_v52  ;;  %4610 = vmatmul.msk.f32.vlgmr.msrb.gmra.mxu3 %vm947_vm1, %v4984_v52 }
  0x6f   :  { %1594 = vmatpush.msra.mxu0 %v775_v43  ;;  %1617 = vmatpush.msra.mxu1 %v776_v44  ;;  %v340_v43 = vld [vmem:[#allocation5 + $0x8e8] sm:$0xff]  ;;  %v341_v44 = vld [vmem:[#allocation5 + $0x8f0] sm:$0xff] }
  0x70   :  { %1640 = vmatpush.msra.mxu2 %v777_v45  ;;  %1663 = vmatpush.msra.mxu3 %v778_v46  ;;  %v342_v45 = vld [vmem:[#allocation5 + $0x8f8] sm:$0xff]  ;;  %v251_v46 = vld [vmem:[#allocation5 + $0x620] sm:$0xff] }
  0x71   :  { %1595 = vmatpush.msra.mxu0 %v687_v48  ;;  %1618 = vmatpush.msra.mxu1 %v688_v49  ;;  %v252_v48 = vld [vmem:[#allocation5 + $0x628] sm:$0xff]  ;;  %v253_v49 = vld [vmem:[#allocation5 + $0x630] sm:$0xff] }
  0x72   :  { %1641 = vmatpush.msra.mxu2 %v689_v50  ;;  %1664 = vmatpush.msra.mxu3 %v690_v51  ;;  %v254_v50 = vld [vmem:[#allocation5 + $0x638] sm:$0xff]  ;;  %v163_v51 = vld [vmem:[#allocation5 + $0x360] sm:$0xff] }
  0x73   :  { %1596 = vmatpush.msra.mxu0 %v599_v53  ;;  %1619 = vmatpush.msra.mxu1 %v600_v54  ;;  %v164_v53 = vld [vmem:[#allocation5 + $0x368] sm:$0xff]  ;;  %v165_v54 = vld [vmem:[#allocation5 + $0x370] sm:$0xff] }
  0x74   :  { %1642 = vmatpush.msra.mxu2 %v601_v55  ;;  %1665 = vmatpush.msra.mxu3 %v602_v56  ;;  %v166_v55 = vld [vmem:[#allocation5 + $0x378] sm:$0xff]  ;;  %v75_v56 = vld [vmem:[#allocation5 + $0xa0] sm:$0xff] }
  0x75   :  { %4602 = vmatmul.msk.f32.gmra.mxu0 %vm947_vm1, %v4994_v5  ;;  %4608 = vmatmul.msk.f32.gmra.mxu2 %vm947_vm1, %v4994_v5 }
  0x76   :  { %1597 = vmatpush.msra.mxu0 %v511_v57  ;;  %1620 = vmatpush.msra.mxu1 %v512_v58  ;;  %v76_v57 = vld [vmem:[#allocation5 + $0xa8] sm:$0xff]  ;;  %v77_v58 = vld [vmem:[#allocation5 + $0xb0] sm:$0xff] }
  0x77   :  { %1643 = vmatpush.msra.mxu2 %v513_v59  ;;  %1666 = vmatpush.msra.mxu3 %v514_v60  ;;  %v78_v59 = vld [vmem:[#allocation5 + $0xb8] sm:$0xff]  ;;  %v871_v60 = vld [vmem:[#allocation5 + $0x1980] sm:$0x7] }
  0x78   :  { %4605 = vmatmul.msk.f32.gmra.mxu1 %vm947_vm1, %v4994_v5  ;;  %4611 = vmatmul.msk.f32.gmra.mxu3 %vm947_vm1, %v4994_v5 }
  0x79   :  { %1598 = vmatpush.msra.mxu0 %v423_v61  ;;  %1621 = vmatpush.msra.mxu1 %v424_v62  ;;  %v872_v61 = vld [vmem:[#allocation5 + $0x1988] sm:$0x7]  ;;  %v873_v62 = vld [vmem:[#allocation5 + $0x1990] sm:$0x7] }
  0x7a   :  { %1644 = vmatpush.msra.mxu2 %v425_v63  ;;  %1667 = vmatpush.msra.mxu3 %v426_v0  ;;  %v874_v63 = vld [vmem:[#allocation5 + $0x1998] sm:$0x7]  ;;  %v783_v0 = vld [vmem:[#allocation5 + $0x16c0] sm:$0xff] }
  0x7b   :  { %1599 = vmatpush.msra.mxu0 %v335_v1  ;;  %1622 = vmatpush.msra.mxu1 %v336_v2  ;;  %v784_v1 = vld [vmem:[#allocation5 + $0x16c8] sm:$0xff]  ;;  %v785_v2 = vld [vmem:[#allocation5 + $0x16d0] sm:$0xff] }
  0x7c   :  { %1645 = vmatpush.msra.mxu2 %v337_v3  ;;  %1668 = vmatpush.msra.mxu3 %v338_v4  ;;  %v786_v3 = vld [vmem:[#allocation5 + $0x16d8] sm:$0xff]  ;;  %v695_v4 = vld [vmem:[#allocation5 + $0x1400] sm:$0xff] }
  0x7d   :  { %1600 = vmatpush.msra.mxu0 %v247_v6  ;;  %1623 = vmatpush.msra.mxu1 %v248_v7  ;;  %v696_v6 = vld [vmem:[#allocation5 + $0x1408] sm:$0xff]  ;;  %v697_v7 = vld [vmem:[#allocation5 + $0x1410] sm:$0xff] }
  0x7e   :  { %1646 = vmatpush.msra.mxu2 %v249_v8  ;;  %1669 = vmatpush.msra.mxu3 %v250_v9  ;;  %v698_v8 = vld [vmem:[#allocation5 + $0x1418] sm:$0xff]  ;;  %v607_v9 = vld [vmem:[#allocation5 + $0x1140] sm:$0xff] }
  0x7f   :  { %1601 = vmatpush.msra.mxu0 %v159_v10  ;;  %1624 = vmatpush.msra.mxu1 %v160_v11  ;;  %v608_v10 = vld [vmem:[#allocation5 + $0x1148] sm:$0xff]  ;;  %v609_v11 = vld [vmem:[#allocation5 + $0x1150] sm:$0xff] }
  0x80   :  { %1647 = vmatpush.msra.mxu2 %v161_v12  ;;  %1670 = vmatpush.msra.mxu3 %v162_v13  ;;  %v610_v12 = vld [vmem:[#allocation5 + $0x1158] sm:$0xff]  ;;  %v519_v13 = vld [vmem:[#allocation5 + $0xe80] sm:$0xff] }
  0x81   :  { %1602 = vmatpush.msra.mxu0 %v71_v14  ;;  %1625 = vmatpush.msra.mxu1 %v72_v15  ;;  %v521_v14 = vld [vmem:[#allocation5 + $0xe90] sm:$0xff]  ;;  %v522_v15 = vld [vmem:[#allocation5 + $0xe98] sm:$0xff] }
  0x82   :  { %1648 = vmatpush.msra.mxu2 %v73_v16  ;;  %1671 = vmatpush.msra.mxu3 %v74_v17  ;;  %v431_v16 = vld [vmem:[#allocation5 + $0xbc0] sm:$0xff]  ;;  %v432_v17 = vld [vmem:[#allocation5 + $0xbc8] sm:$0xff] }
  0x83   :  { %4613 = vmatmul.msk.f32.vlgmr.msra.gmra.mxu0 %vm947_vm1, %v4984_v52  ;;  %4619 = vmatmul.msk.f32.vlgmr.msra.gmra.mxu2 %vm947_vm1, %v4984_v52 }
  0x84   :  { %4624 = vmatpush.msk.msrb.mxu0 %vm954_vm0, %v867_v18  ;;  %4627 = vmatpush.msk.msrb.mxu1 %vm954_vm0, %v868_v19  ;;  %v433_v18 = vld [vmem:[#allocation5 + $0xbd0] sm:$0xff]  ;;  %v434_v19 = vld [vmem:[#allocation5 + $0xbd8] sm:$0xff] }
  0x85   :  { %4630 = vmatpush.msk.msrb.mxu2 %vm954_vm0, %v869_v20  ;;  %4633 = vmatpush.msk.msrb.mxu3 %vm954_vm0, %v870_v21  ;;  %v343_v20 = vld [vmem:[#allocation5 + $0x900] sm:$0xff]  ;;  %v344_v21 = vld [vmem:[#allocation5 + $0x908] sm:$0xff] }
  0x86   :  { %4616 = vmatmul.msk.f32.vlgmr.msra.gmra.mxu1 %vm947_vm1, %v4984_v52  ;;  %4622 = vmatmul.msk.f32.vlgmr.msra.gmra.mxu3 %vm947_vm1, %v4984_v52 }
  0x87   :  { %1686 = vmatpush.msrb.mxu0 %v779_v22  ;;  %1709 = vmatpush.msrb.mxu1 %v780_v23  ;;  %v345_v22 = vld [vmem:[#allocation5 + $0x910] sm:$0xff]  ;;  %v346_v23 = vld [vmem:[#allocation5 + $0x918] sm:$0xff] }
  0x88   :  { %1732 = vmatpush.msrb.mxu2 %v781_v24  ;;  %1755 = vmatpush.msrb.mxu3 %v782_v25  ;;  %v255_v24 = vld [vmem:[#allocation5 + $0x640] sm:$0xff]  ;;  %v256_v25 = vld [vmem:[#allocation5 + $0x648] sm:$0xff] }
  0x89   :  { %1687 = vmatpush.msrb.mxu0 %v691_v26  ;;  %1710 = vmatpush.msrb.mxu1 %v692_v27  ;;  %v257_v26 = vld [vmem:[#allocation5 + $0x650] sm:$0xff]  ;;  %v258_v27 = vld [vmem:[#allocation5 + $0x658] sm:$0xff] }
  0x8a   :  { %1733 = vmatpush.msrb.mxu2 %v693_v28  ;;  %1756 = vmatpush.msrb.mxu3 %v694_v29  ;;  %v167_v28 = vld [vmem:[#allocation5 + $0x380] sm:$0xff]  ;;  %v168_v29 = vld [vmem:[#allocation5 + $0x388] sm:$0xff] }
  0x8b   :  { %1688 = vmatpush.msrb.mxu0 %v603_v30  ;;  %1711 = vmatpush.msrb.mxu1 %v604_v31  ;;  %v169_v30 = vld [vmem:[#allocation5 + $0x390] sm:$0xff]  ;;  %v79_v31 = vld [vmem:[#allocation5 + $0xc0] sm:$0xff] }
  0x8c   :  { %1734 = vmatpush.msrb.mxu2 %v605_v32  ;;  %1757 = vmatpush.msrb.mxu3 %v606_v33  ;;  %v80_v32 = vld [vmem:[#allocation5 + $0xc8] sm:$0xff]  ;;  %v81_v33 = vld [vmem:[#allocation5 + $0xd0] sm:$0xff] }
  0x8d   :  { %4614 = vmatmul.msk.f32.gmra.mxu0 %vm947_vm1, %v4994_v5  ;;  %4620 = vmatmul.msk.f32.gmra.mxu2 %vm947_vm1, %v4994_v5 }
  0x8e   :  { %1689 = vmatpush.msrb.mxu0 %v515_v34  ;;  %1712 = vmatpush.msrb.mxu1 %v516_v35  ;;  %v82_v34 = vld [vmem:[#allocation5 + $0xd8] sm:$0xff]  ;;  %v875_v35 = vld [vmem:[#allocation5 + $0x19a0] sm:$0x7] }
  0x8f   :  { %1735 = vmatpush.msrb.mxu2 %v517_v36  ;;  %1758 = vmatpush.msrb.mxu3 %v518_v37  ;;  %v876_v36 = vld [vmem:[#allocation5 + $0x19a8] sm:$0x7]  ;;  %v877_v37 = vld [vmem:[#allocation5 + $0x19b0] sm:$0x7] }
  0x90   :  { %4617 = vmatmul.msk.f32.gmra.mxu1 %vm947_vm1, %v4994_v5  ;;  %4623 = vmatmul.msk.f32.gmra.mxu3 %vm947_vm1, %v4994_v5 }
  0x91   :  { %1690 = vmatpush.msrb.mxu0 %v427_v38  ;;  %1713 = vmatpush.msrb.mxu1 %v428_v39  ;;  %v5111_v38 = vld [vmem:[#allocation2] sm:$0xff]  ;;  %v878_v39 = vld [vmem:[#allocation5 + $0x19b8] sm:$0x7] }
  0x92   :  { %1736 = vmatpush.msrb.mxu2 %v429_v40  ;;  %1759 = vmatpush.msrb.mxu3 %v430_v41  ;;  %v787_v40 = vld [vmem:[#allocation5 + $0x16e0] sm:$0xff]  ;;  %v788_v41 = vld [vmem:[#allocation5 + $0x16e8] sm:$0xff] }
  0x93   :  { %1691 = vmatpush.msrb.mxu0 %v339_v42  ;;  %1714 = vmatpush.msrb.mxu1 %v340_v43  ;;  %v789_v42 = vld [vmem:[#allocation5 + $0x16f0] sm:$0xff]  ;;  %v790_v43 = vld [vmem:[#allocation5 + $0x16f8] sm:$0xff] }
  0x94   :  { %1737 = vmatpush.msrb.mxu2 %v341_v44  ;;  %1760 = vmatpush.msrb.mxu3 %v342_v45  ;;  %v699_v44 = vld [vmem:[#allocation5 + $0x1420] sm:$0xff]  ;;  %v700_v45 = vld [vmem:[#allocation5 + $0x1428] sm:$0xff] }
  0x95   :  { %1692 = vmatpush.msrb.mxu0 %v251_v46  ;;  %1715 = vmatpush.msrb.mxu1 %v252_v48  ;;  %v701_v46 = vld [vmem:[#allocation5 + $0x1430] sm:$0xff]  ;;  %v702_v48 = vld [vmem:[#allocation5 + $0x1438] sm:$0xff] }
  0x96   :  { %1738 = vmatpush.msrb.mxu2 %v253_v49  ;;  %1761 = vmatpush.msrb.mxu3 %v254_v50  ;;  %v611_v49 = vld [vmem:[#allocation5 + $0x1160] sm:$0xff]  ;;  %v612_v50 = vld [vmem:[#allocation5 + $0x1168] sm:$0xff] }
  0x97   :  { %1693 = vmatpush.msrb.mxu0 %v163_v51  ;;  %1716 = vmatpush.msrb.mxu1 %v164_v53  ;;  %v613_v51 = vld [vmem:[#allocation5 + $0x1170] sm:$0xff]  ;;  %v614_v53 = vld [vmem:[#allocation5 + $0x1178] sm:$0xff] }
  0x98   :  { %1739 = vmatpush.msrb.mxu2 %v165_v54  ;;  %1762 = vmatpush.msrb.mxu3 %v166_v55  ;;  %v523_v54 = vld [vmem:[#allocation5 + $0xea0] sm:$0xff]  ;;  %v524_v55 = vld [vmem:[#allocation5 + $0xea8] sm:$0xff] }
  0x99   :  { %1694 = vmatpush.msrb.mxu0 %v75_v56  ;;  %1717 = vmatpush.msrb.mxu1 %v76_v57  ;;  %v525_v56 = vld [vmem:[#allocation5 + $0xeb0] sm:$0xff]  ;;  %v5125_v57 = vld [vmem:[#allocation2 + $0x8] sm:$0xff] }
  0x9a   :  { %1740 = vmatpush.msrb.mxu2 %v77_v58  ;;  %1763 = vmatpush.msrb.mxu3 %v78_v59  ;;  %v526_v58 = vld [vmem:[#allocation5 + $0xeb8] sm:$0xff]  ;;  %v435_v59 = vld [vmem:[#allocation5 + $0xbe0] sm:$0xff] }
  0x9b   :  { %4625 = vmatmul.msk.f32.vlgmr.msrb.gmra.mxu0 %vm947_vm1, %v4984_v52  ;;  %4631 = vmatmul.msk.f32.vlgmr.msrb.gmra.mxu2 %vm947_vm1, %v4984_v52 }
  0x9c   :  { %4636 = vmatpush.msk.msra.mxu0 %vm954_vm0, %v871_v60  ;;  %4639 = vmatpush.msk.msra.mxu1 %vm954_vm0, %v872_v61  ;;  %v436_v60 = vld [vmem:[#allocation5 + $0xbe8] sm:$0xff]  ;;  %v437_v61 = vld [vmem:[#allocation5 + $0xbf0] sm:$0xff] }
  0x9d   :  { %4642 = vmatpush.msk.msra.mxu2 %vm954_vm0, %v873_v62  ;;  %4645 = vmatpush.msk.msra.mxu3 %vm954_vm0, %v874_v63  ;;  %v438_v62 = vld [vmem:[#allocation5 + $0xbf8] sm:$0xff]  ;;  %v347_v63 = vld [vmem:[#allocation5 + $0x920] sm:$0xff] }
  0x9e   :  { %4628 = vmatmul.msk.f32.vlgmr.msrb.gmra.mxu1 %vm947_vm1, %v4984_v52  ;;  %4634 = vmatmul.msk.f32.vlgmr.msrb.gmra.mxu3 %vm947_vm1, %v4984_v52  ;;  %v520_v52 = vld [vmem:[#allocation5 + $0xe88] sm:$0xff] }
  0x9f   :  { %1778 = vmatpush.msra.mxu0 %v783_v0  ;;  %1801 = vmatpush.msra.mxu1 %v784_v1  ;;  %v348_v0 = vld [vmem:[#allocation5 + $0x928] sm:$0xff]  ;;  %v349_v1 = vld [vmem:[#allocation5 + $0x930] sm:$0xff] }
  0xa0   :  { %1824 = vmatpush.msra.mxu2 %v785_v2  ;;  %1847 = vmatpush.msra.mxu3 %v786_v3  ;;  %v350_v2 = vld [vmem:[#allocation5 + $0x938] sm:$0xff]  ;;  %v259_v3 = vld [vmem:[#allocation5 + $0x660] sm:$0xff] }
  0xa1   :  { %1779 = vmatpush.msra.mxu0 %v695_v4  ;;  %1802 = vmatpush.msra.mxu1 %v696_v6  ;;  %v260_v4 = vld [vmem:[#allocation5 + $0x668] sm:$0xff]  ;;  %v261_v6 = vld [vmem:[#allocation5 + $0x670] sm:$0xff] }
  0xa2   :  { %1825 = vmatpush.msra.mxu2 %v697_v7  ;;  %1848 = vmatpush.msra.mxu3 %v698_v8  ;;  %v262_v7 = vld [vmem:[#allocation5 + $0x678] sm:$0xff]  ;;  %v171_v8 = vld [vmem:[#allocation5 + $0x3a0] sm:$0xff] }
  0xa3   :  { %1780 = vmatpush.msra.mxu0 %v607_v9  ;;  %1803 = vmatpush.msra.mxu1 %v608_v10  ;;  %v172_v9 = vld [vmem:[#allocation5 + $0x3a8] sm:$0xff]  ;;  %v173_v10 = vld [vmem:[#allocation5 + $0x3b0] sm:$0xff] }
  0xa4   :  { %1826 = vmatpush.msra.mxu2 %v609_v11  ;;  %1849 = vmatpush.msra.mxu3 %v610_v12  ;;  %v174_v11 = vld [vmem:[#allocation5 + $0x3b8] sm:$0xff]  ;;  %v83_v12 = vld [vmem:[#allocation5 + $0xe0] sm:$0xff] }
  0xa5   :  { %4626 = vmatmul.msk.f32.gmra.mxu0 %vm947_vm1, %v4994_v5  ;;  %4632 = vmatmul.msk.f32.gmra.mxu2 %vm947_vm1, %v4994_v5 }
  0xa6   :  { %1781 = vmatpush.msra.mxu0 %v519_v13  ;;  %1804 = vmatpush.msra.mxu1 %v520_v52  ;;  %v84_v13 = vld [vmem:[#allocation5 + $0xe8] sm:$0xff]  ;;  %v85_v52 = vld [vmem:[#allocation5 + $0xf0] sm:$0xff] }
  0xa7   :  { %1827 = vmatpush.msra.mxu2 %v521_v14  ;;  %1850 = vmatpush.msra.mxu3 %v522_v15  ;;  %v86_v14 = vld [vmem:[#allocation5 + $0xf8] sm:$0xff]  ;;  %v879_v15 = vld [vmem:[#allocation5 + $0x19c0] sm:$0x7] }
  0xa8   :  { %4629 = vmatmul.msk.f32.gmra.mxu1 %vm947_vm1, %v4994_v5  ;;  %4635 = vmatmul.msk.f32.gmra.mxu3 %vm947_vm1, %v4994_v5  ;;  %v170_v5 = vld [vmem:[#allocation5 + $0x398] sm:$0xff] }
  0xa9   :  { %1782 = vmatpush.msra.mxu0 %v431_v16  ;;  %1805 = vmatpush.msra.mxu1 %v432_v17  ;;  %v880_v16 = vld [vmem:[#allocation5 + $0x19c8] sm:$0x7]  ;;  %v881_v17 = vld [vmem:[#allocation5 + $0x19d0] sm:$0x7] }
  0xaa   :  { %1828 = vmatpush.msra.mxu2 %v433_v18  ;;  %1851 = vmatpush.msra.mxu3 %v434_v19  ;;  %v882_v18 = vld [vmem:[#allocation5 + $0x19d8] sm:$0x7]  ;;  %v791_v19 = vld [vmem:[#allocation5 + $0x1700] sm:$0xff] }
  0xab   :  { %1783 = vmatpush.msra.mxu0 %v343_v20  ;;  %1806 = vmatpush.msra.mxu1 %v344_v21  ;;  %v792_v20 = vld [vmem:[#allocation5 + $0x1708] sm:$0xff]  ;;  %v793_v21 = vld [vmem:[#allocation5 + $0x1710] sm:$0xff] }
  0xac   :  { %1829 = vmatpush.msra.mxu2 %v345_v22  ;;  %1852 = vmatpush.msra.mxu3 %v346_v23  ;;  %v794_v22 = vld [vmem:[#allocation5 + $0x1718] sm:$0xff]  ;;  %v703_v23 = vld [vmem:[#allocation5 + $0x1440] sm:$0xff] }
  0xad   :  { %1784 = vmatpush.msra.mxu0 %v255_v24  ;;  %1807 = vmatpush.msra.mxu1 %v256_v25  ;;  %v704_v24 = vld [vmem:[#allocation5 + $0x1448] sm:$0xff]  ;;  %v705_v25 = vld [vmem:[#allocation5 + $0x1450] sm:$0xff] }
  0xae   :  { %1830 = vmatpush.msra.mxu2 %v257_v26  ;;  %1853 = vmatpush.msra.mxu3 %v258_v27  ;;  %v706_v26 = vld [vmem:[#allocation5 + $0x1458] sm:$0xff]  ;;  %v615_v27 = vld [vmem:[#allocation5 + $0x1180] sm:$0xff] }
  0xaf   :  { %1785 = vmatpush.msra.mxu0 %v167_v28  ;;  %1808 = vmatpush.msra.mxu1 %v168_v29  ;;  %v616_v28 = vld [vmem:[#allocation5 + $0x1188] sm:$0xff]  ;;  %v617_v29 = vld [vmem:[#allocation5 + $0x1190] sm:$0xff] }
  0xb0   :  { %1831 = vmatpush.msra.mxu2 %v169_v30  ;;  %1854 = vmatpush.msra.mxu3 %v170_v5  ;;  %v618_v30 = vld [vmem:[#allocation5 + $0x1198] sm:$0xff]  ;;  %v527_v5 = vld [vmem:[#allocation5 + $0xec0] sm:$0xff] }
  0xb1   :  { %1786 = vmatpush.msra.mxu0 %v79_v31  ;;  %1809 = vmatpush.msra.mxu1 %v80_v32  ;;  %v528_v31 = vld [vmem:[#allocation5 + $0xec8] sm:$0xff]  ;;  %v529_v32 = vld [vmem:[#allocation5 + $0xed0] sm:$0xff] }
  0xb2   :  { %1832 = vmatpush.msra.mxu2 %v81_v33  ;;  %1855 = vmatpush.msra.mxu3 %v82_v34  ;;  %v530_v33 = vld [vmem:[#allocation5 + $0xed8] sm:$0xff]  ;;  %v439_v34 = vld [vmem:[#allocation5 + $0xc00] sm:$0xff] }
  0xb3   :  { %4637 = vmatmul.msk.f32.vlgmr.msra.gmra.mxu0 %vm947_vm1, %v5111_v38  ;;  %4643 = vmatmul.msk.f32.vlgmr.msra.gmra.mxu2 %vm947_vm1, %v5111_v38 }
  0xb4   :  { %4648 = vmatpush.msk.msrb.mxu0 %vm954_vm0, %v875_v35  ;;  %4651 = vmatpush.msk.msrb.mxu1 %vm954_vm0, %v876_v36  ;;  %v440_v35 = vld [vmem:[#allocation5 + $0xc08] sm:$0xff]  ;;  %v441_v36 = vld [vmem:[#allocation5 + $0xc10] sm:$0xff] }
  0xb5   :  { %4654 = vmatpush.msk.msrb.mxu2 %vm954_vm0, %v877_v37  ;;  %4657 = vmatpush.msk.msrb.mxu3 %vm954_vm0, %v878_v39  ;;  %v442_v37 = vld [vmem:[#allocation5 + $0xc18] sm:$0xff]  ;;  %v351_v39 = vld [vmem:[#allocation5 + $0x940] sm:$0xff] }
  0xb6   :  { %4640 = vmatmul.msk.f32.vlgmr.msra.gmra.mxu1 %vm947_vm1, %v5111_v38  ;;  %4646 = vmatmul.msk.f32.vlgmr.msra.gmra.mxu3 %vm947_vm1, %v5111_v38 }
  0xb7   :  { %1870 = vmatpush.msrb.mxu0 %v787_v40  ;;  %1893 = vmatpush.msrb.mxu1 %v788_v41  ;;  %v352_v40 = vld [vmem:[#allocation5 + $0x948] sm:$0xff]  ;;  %v353_v41 = vld [vmem:[#allocation5 + $0x950] sm:$0xff] }
  0xb8   :  { %1916 = vmatpush.msrb.mxu2 %v789_v42  ;;  %1939 = vmatpush.msrb.mxu3 %v790_v43  ;;  %v354_v42 = vld [vmem:[#allocation5 + $0x958] sm:$0xff]  ;;  %v263_v43 = vld [vmem:[#allocation5 + $0x680] sm:$0xff] }
  0xb9   :  { %1871 = vmatpush.msrb.mxu0 %v699_v44  ;;  %1894 = vmatpush.msrb.mxu1 %v700_v45  ;;  %v264_v44 = vld [vmem:[#allocation5 + $0x688] sm:$0xff]  ;;  %v265_v45 = vld [vmem:[#allocation5 + $0x690] sm:$0xff] }
  0xba   :  { %1917 = vmatpush.msrb.mxu2 %v701_v46  ;;  %1940 = vmatpush.msrb.mxu3 %v702_v48  ;;  %v266_v46 = vld [vmem:[#allocation5 + $0x698] sm:$0xff]  ;;  %v175_v48 = vld [vmem:[#allocation5 + $0x3c0] sm:$0xff] }
  0xbb   :  { %1872 = vmatpush.msrb.mxu0 %v611_v49  ;;  %1895 = vmatpush.msrb.mxu1 %v612_v50  ;;  %v176_v49 = vld [vmem:[#allocation5 + $0x3c8] sm:$0xff]  ;;  %v177_v50 = vld [vmem:[#allocation5 + $0x3d0] sm:$0xff] }
  0xbc   :  { %1918 = vmatpush.msrb.mxu2 %v613_v51  ;;  %1941 = vmatpush.msrb.mxu3 %v614_v53  ;;  %v178_v51 = vld [vmem:[#allocation5 + $0x3d8] sm:$0xff]  ;;  %v87_v53 = vld [vmem:[#allocation5 + $0x100] sm:$0xff] }
  0xbd   :  { %4638 = vmatmul.msk.f32.gmra.mxu0 %vm947_vm1, %v5125_v57  ;;  %4644 = vmatmul.msk.f32.gmra.mxu2 %vm947_vm1, %v5125_v57 }
  0xbe   :  { %1873 = vmatpush.msrb.mxu0 %v523_v54  ;;  %1896 = vmatpush.msrb.mxu1 %v524_v55  ;;  %v88_v54 = vld [vmem:[#allocation5 + $0x108] sm:$0xff]  ;;  %v89_v55 = vld [vmem:[#allocation5 + $0x110] sm:$0xff] }
  0xbf   :  { %1919 = vmatpush.msrb.mxu2 %v525_v56  ;;  %1942 = vmatpush.msrb.mxu3 %v526_v58  ;;  %v90_v56 = vld [vmem:[#allocation5 + $0x118] sm:$0xff]  ;;  %v883_v58 = vld [vmem:[#allocation5 + $0x19e0] sm:$0x7] }
  0xc0   :  { %4641 = vmatmul.msk.f32.gmra.mxu1 %vm947_vm1, %v5125_v57  ;;  %4647 = vmatmul.msk.f32.gmra.mxu3 %vm947_vm1, %v5125_v57 }
  0xc1   :  { %1874 = vmatpush.msrb.mxu0 %v435_v59  ;;  %1897 = vmatpush.msrb.mxu1 %v436_v60  ;;  %v884_v59 = vld [vmem:[#allocation5 + $0x19e8] sm:$0x7]  ;;  %v885_v60 = vld [vmem:[#allocation5 + $0x19f0] sm:$0x7] }
  0xc2   :  { %1920 = vmatpush.msrb.mxu2 %v437_v61  ;;  %1943 = vmatpush.msrb.mxu3 %v438_v62  ;;  %v886_v61 = vld [vmem:[#allocation5 + $0x19f8] sm:$0x7]  ;;  %v795_v62 = vld [vmem:[#allocation5 + $0x1720] sm:$0xff] }
  0xc3   :  { %1875 = vmatpush.msrb.mxu0 %v347_v63  ;;  %1898 = vmatpush.msrb.mxu1 %v348_v0  ;;  %v796_v63 = vld [vmem:[#allocation5 + $0x1728] sm:$0xff]  ;;  %v797_v0 = vld [vmem:[#allocation5 + $0x1730] sm:$0xff] }
  0xc4   :  { %1921 = vmatpush.msrb.mxu2 %v349_v1  ;;  %1944 = vmatpush.msrb.mxu3 %v350_v2  ;;  %v798_v1 = vld [vmem:[#allocation5 + $0x1738] sm:$0xff]  ;;  %v707_v2 = vld [vmem:[#allocation5 + $0x1460] sm:$0xff] }
  0xc5   :  { %1876 = vmatpush.msrb.mxu0 %v259_v3  ;;  %1899 = vmatpush.msrb.mxu1 %v260_v4  ;;  %v708_v3 = vld [vmem:[#allocation5 + $0x1468] sm:$0xff]  ;;  %v709_v4 = vld [vmem:[#allocation5 + $0x1470] sm:$0xff] }
  0xc6   :  { %1922 = vmatpush.msrb.mxu2 %v261_v6  ;;  %1945 = vmatpush.msrb.mxu3 %v262_v7  ;;  %v710_v6 = vld [vmem:[#allocation5 + $0x1478] sm:$0xff]  ;;  %v619_v7 = vld [vmem:[#allocation5 + $0x11a0] sm:$0xff] }
  0xc7   :  { %1877 = vmatpush.msrb.mxu0 %v171_v8  ;;  %1900 = vmatpush.msrb.mxu1 %v172_v9  ;;  %v620_v8 = vld [vmem:[#allocation5 + $0x11a8] sm:$0xff]  ;;  %v621_v9 = vld [vmem:[#allocation5 + $0x11b0] sm:$0xff] }
  0xc8   :  { %1923 = vmatpush.msrb.mxu2 %v173_v10  ;;  %1946 = vmatpush.msrb.mxu3 %v174_v11  ;;  %v622_v10 = vld [vmem:[#allocation5 + $0x11b8] sm:$0xff]  ;;  %v531_v11 = vld [vmem:[#allocation5 + $0xee0] sm:$0xff] }
  0xc9   :  { %1878 = vmatpush.msrb.mxu0 %v83_v12  ;;  %1901 = vmatpush.msrb.mxu1 %v84_v13  ;;  %v532_v12 = vld [vmem:[#allocation5 + $0xee8] sm:$0xff]  ;;  %v533_v13 = vld [vmem:[#allocation5 + $0xef0] sm:$0xff] }
  0xca   :  { %1924 = vmatpush.msrb.mxu2 %v85_v52  ;;  %1947 = vmatpush.msrb.mxu3 %v86_v14  ;;  %v534_v52 = vld [vmem:[#allocation5 + $0xef8] sm:$0xff]  ;;  %v443_v14 = vld [vmem:[#allocation5 + $0xc20] sm:$0xff] }
  0xcb   :  { %4649 = vmatmul.msk.f32.vlgmr.msrb.gmra.mxu0 %vm947_vm1, %v5111_v38  ;;  %4655 = vmatmul.msk.f32.vlgmr.msrb.gmra.mxu2 %vm947_vm1, %v5111_v38 }
  0xcc   :  { %4660 = vmatpush.msk.msra.mxu0 %vm954_vm0, %v879_v15  ;;  %4663 = vmatpush.msk.msra.mxu1 %vm954_vm0, %v880_v16  ;;  %v444_v15 = vld [vmem:[#allocation5 + $0xc28] sm:$0xff]  ;;  %v445_v16 = vld [vmem:[#allocation5 + $0xc30] sm:$0xff] }
  0xcd   :  { %4666 = vmatpush.msk.msra.mxu2 %vm954_vm0, %v881_v17  ;;  %4669 = vmatpush.msk.msra.mxu3 %vm954_vm0, %v882_v18  ;;  %v446_v17 = vld [vmem:[#allocation5 + $0xc38] sm:$0xff]  ;;  %v355_v18 = vld [vmem:[#allocation5 + $0x960] sm:$0xff] }
  0xce   :  { %4652 = vmatmul.msk.f32.vlgmr.msrb.gmra.mxu1 %vm947_vm1, %v5111_v38  ;;  %4658 = vmatmul.msk.f32.vlgmr.msrb.gmra.mxu3 %vm947_vm1, %v5111_v38 }
  0xcf   :  { %1962 = vmatpush.msra.mxu0 %v791_v19  ;;  %1985 = vmatpush.msra.mxu1 %v792_v20  ;;  %v356_v19 = vld [vmem:[#allocation5 + $0x968] sm:$0xff]  ;;  %v357_v20 = vld [vmem:[#allocation5 + $0x970] sm:$0xff] }
  0xd0   :  { %2008 = vmatpush.msra.mxu2 %v793_v21  ;;  %2031 = vmatpush.msra.mxu3 %v794_v22  ;;  %v358_v21 = vld [vmem:[#allocation5 + $0x978] sm:$0xff]  ;;  %v267_v22 = vld [vmem:[#allocation5 + $0x6a0] sm:$0xff] }
  0xd1   :  { %1963 = vmatpush.msra.mxu0 %v703_v23  ;;  %1986 = vmatpush.msra.mxu1 %v704_v24  ;;  %v268_v23 = vld [vmem:[#allocation5 + $0x6a8] sm:$0xff]  ;;  %v269_v24 = vld [vmem:[#allocation5 + $0x6b0] sm:$0xff] }
  0xd2   :  { %2009 = vmatpush.msra.mxu2 %v705_v25  ;;  %2032 = vmatpush.msra.mxu3 %v706_v26  ;;  %v270_v25 = vld [vmem:[#allocation5 + $0x6b8] sm:$0xff]  ;;  %v179_v26 = vld [vmem:[#allocation5 + $0x3e0] sm:$0xff] }
  0xd3   :  { %1964 = vmatpush.msra.mxu0 %v615_v27  ;;  %1987 = vmatpush.msra.mxu1 %v616_v28  ;;  %v180_v27 = vld [vmem:[#allocation5 + $0x3e8] sm:$0xff]  ;;  %v181_v28 = vld [vmem:[#allocation5 + $0x3f0] sm:$0xff] }
  0xd4   :  { %2010 = vmatpush.msra.mxu2 %v617_v29  ;;  %2033 = vmatpush.msra.mxu3 %v618_v30  ;;  %v182_v29 = vld [vmem:[#allocation5 + $0x3f8] sm:$0xff]  ;;  %v91_v30 = vld [vmem:[#allocation5 + $0x120] sm:$0xff] }
  0xd5   :  { %4650 = vmatmul.msk.f32.gmra.mxu0 %vm947_vm1, %v5125_v57  ;;  %4656 = vmatmul.msk.f32.gmra.mxu2 %vm947_vm1, %v5125_v57 }
  0xd6   :  { %1965 = vmatpush.msra.mxu0 %v527_v5  ;;  %1988 = vmatpush.msra.mxu1 %v528_v31  ;;  %v92_v5 = vld [vmem:[#allocation5 + $0x128] sm:$0xff]  ;;  %v93_v31 = vld [vmem:[#allocation5 + $0x130] sm:$0xff] }
  0xd7   :  { %2011 = vmatpush.msra.mxu2 %v529_v32  ;;  %2034 = vmatpush.msra.mxu3 %v530_v33  ;;  %v94_v32 = vld [vmem:[#allocation5 + $0x138] sm:$0xff]  ;;  %v887_v33 = vld [vmem:[#allocation5 + $0x1a00] sm:$0x7] }
  0xd8   :  { %4653 = vmatmul.msk.f32.gmra.mxu1 %vm947_vm1, %v5125_v57  ;;  %4659 = vmatmul.msk.f32.gmra.mxu3 %vm947_vm1, %v5125_v57 }
  0xd9   :  { %1966 = vmatpush.msra.mxu0 %v439_v34  ;;  %1989 = vmatpush.msra.mxu1 %v440_v35  ;;  %v888_v34 = vld [vmem:[#allocation5 + $0x1a08] sm:$0x7]  ;;  %v889_v35 = vld [vmem:[#allocation5 + $0x1a10] sm:$0x7] }
  0xda   :  { %2012 = vmatpush.msra.mxu2 %v441_v36  ;;  %2035 = vmatpush.msra.mxu3 %v442_v37  ;;  %v890_v36 = vld [vmem:[#allocation5 + $0x1a18] sm:$0x7]  ;;  %v799_v37 = vld [vmem:[#allocation5 + $0x1740] sm:$0xff] }
  0xdb   :  { %1967 = vmatpush.msra.mxu0 %v351_v39  ;;  %1990 = vmatpush.msra.mxu1 %v352_v40  ;;  %v800_v39 = vld [vmem:[#allocation5 + $0x1748] sm:$0xff]  ;;  %v801_v40 = vld [vmem:[#allocation5 + $0x1750] sm:$0xff] }
  0xdc   :  { %2013 = vmatpush.msra.mxu2 %v353_v41  ;;  %2036 = vmatpush.msra.mxu3 %v354_v42  ;;  %v802_v41 = vld [vmem:[#allocation5 + $0x1758] sm:$0xff]  ;;  %v711_v42 = vld [vmem:[#allocation5 + $0x1480] sm:$0xff] }
  0xdd   :  { %1968 = vmatpush.msra.mxu0 %v263_v43  ;;  %1991 = vmatpush.msra.mxu1 %v264_v44  ;;  %v712_v43 = vld [vmem:[#allocation5 + $0x1488] sm:$0xff]  ;;  %v713_v44 = vld [vmem:[#allocation5 + $0x1490] sm:$0xff] }
  0xde   :  { %2014 = vmatpush.msra.mxu2 %v265_v45  ;;  %2037 = vmatpush.msra.mxu3 %v266_v46  ;;  %v714_v45 = vld [vmem:[#allocation5 + $0x1498] sm:$0xff]  ;;  %v623_v46 = vld [vmem:[#allocation5 + $0x11c0] sm:$0xff] }
  0xdf   :  { %1969 = vmatpush.msra.mxu0 %v175_v48  ;;  %1992 = vmatpush.msra.mxu1 %v176_v49  ;;  %v624_v48 = vld [vmem:[#allocation5 + $0x11c8] sm:$0xff]  ;;  %v625_v49 = vld [vmem:[#allocation5 + $0x11d0] sm:$0xff] }
  0xe0   :  { %2015 = vmatpush.msra.mxu2 %v177_v50  ;;  %2038 = vmatpush.msra.mxu3 %v178_v51  ;;  %v626_v50 = vld [vmem:[#allocation5 + $0x11d8] sm:$0xff]  ;;  %v535_v51 = vld [vmem:[#allocation5 + $0xf00] sm:$0xff] }
  0xe1   :  { %1970 = vmatpush.msra.mxu0 %v87_v53  ;;  %1993 = vmatpush.msra.mxu1 %v88_v54  ;;  %v536_v53 = vld [vmem:[#allocation5 + $0xf08] sm:$0xff]  ;;  %v537_v54 = vld [vmem:[#allocation5 + $0xf10] sm:$0xff] }
  0xe2   :  { %2016 = vmatpush.msra.mxu2 %v89_v55  ;;  %2039 = vmatpush.msra.mxu3 %v90_v56  ;;  %v538_v55 = vld [vmem:[#allocation5 + $0xf18] sm:$0xff]  ;;  %v447_v56 = vld [vmem:[#allocation5 + $0xc40] sm:$0xff] }
  0xe3   :  { %4661 = vmatmul.msk.f32.vlgmr.msra.gmra.mxu0 %vm947_vm1, %v5111_v38  ;;  %4667 = vmatmul.msk.f32.vlgmr.msra.gmra.mxu2 %vm947_vm1, %v5111_v38 }
  0xe4   :  { %4672 = vmatpush.msk.msrb.mxu0 %vm954_vm0, %v883_v58  ;;  %4675 = vmatpush.msk.msrb.mxu1 %vm954_vm0, %v884_v59  ;;  %v448_v58 = vld [vmem:[#allocation5 + $0xc48] sm:$0xff]  ;;  %v449_v59 = vld [vmem:[#allocation5 + $0xc50] sm:$0xff] }
  0xe5   :  { %4678 = vmatpush.msk.msrb.mxu2 %vm954_vm0, %v885_v60  ;;  %4681 = vmatpush.msk.msrb.mxu3 %vm954_vm0, %v886_v61  ;;  %v450_v60 = vld [vmem:[#allocation5 + $0xc58] sm:$0xff]  ;;  %v359_v61 = vld [vmem:[#allocation5 + $0x980] sm:$0xff] }
  0xe6   :  { %4664 = vmatmul.msk.f32.vlgmr.msra.gmra.mxu1 %vm947_vm1, %v5111_v38  ;;  %4670 = vmatmul.msk.f32.vlgmr.msra.gmra.mxu3 %vm947_vm1, %v5111_v38 }
  0xe7   :  { %2054 = vmatpush.msrb.mxu0 %v795_v62  ;;  %2077 = vmatpush.msrb.mxu1 %v796_v63  ;;  %v360_v62 = vld [vmem:[#allocation5 + $0x988] sm:$0xff]  ;;  %v361_v63 = vld [vmem:[#allocation5 + $0x990] sm:$0xff] }
  0xe8   :  { %2100 = vmatpush.msrb.mxu2 %v797_v0  ;;  %2123 = vmatpush.msrb.mxu3 %v798_v1  ;;  %v362_v0 = vld [vmem:[#allocation5 + $0x998] sm:$0xff]  ;;  %v271_v1 = vld [vmem:[#allocation5 + $0x6c0] sm:$0xff] }
  0xe9   :  { %2055 = vmatpush.msrb.mxu0 %v707_v2  ;;  %2078 = vmatpush.msrb.mxu1 %v708_v3  ;;  %v272_v2 = vld [vmem:[#allocation5 + $0x6c8] sm:$0xff]  ;;  %v273_v3 = vld [vmem:[#allocation5 + $0x6d0] sm:$0xff] }
  0xea   :  { %2101 = vmatpush.msrb.mxu2 %v709_v4  ;;  %2124 = vmatpush.msrb.mxu3 %v710_v6  ;;  %v274_v4 = vld [vmem:[#allocation5 + $0x6d8] sm:$0xff]  ;;  %v183_v6 = vld [vmem:[#allocation5 + $0x400] sm:$0xff] }
  0xeb   :  { %2056 = vmatpush.msrb.mxu0 %v619_v7  ;;  %2079 = vmatpush.msrb.mxu1 %v620_v8  ;;  %v184_v7 = vld [vmem:[#allocation5 + $0x408] sm:$0xff]  ;;  %v185_v8 = vld [vmem:[#allocation5 + $0x410] sm:$0xff] }
  0xec   :  { %2102 = vmatpush.msrb.mxu2 %v621_v9  ;;  %2125 = vmatpush.msrb.mxu3 %v622_v10  ;;  %v186_v9 = vld [vmem:[#allocation5 + $0x418] sm:$0xff]  ;;  %v95_v10 = vld [vmem:[#allocation5 + $0x140] sm:$0xff] }
  0xed   :  { %4662 = vmatmul.msk.f32.gmra.mxu0 %vm947_vm1, %v5125_v57  ;;  %4668 = vmatmul.msk.f32.gmra.mxu2 %vm947_vm1, %v5125_v57 }
  0xee   :  { %2057 = vmatpush.msrb.mxu0 %v531_v11  ;;  %2080 = vmatpush.msrb.mxu1 %v532_v12  ;;  %v96_v11 = vld [vmem:[#allocation5 + $0x148] sm:$0xff]  ;;  %v97_v12 = vld [vmem:[#allocation5 + $0x150] sm:$0xff] }
  0xef   :  { %2103 = vmatpush.msrb.mxu2 %v533_v13  ;;  %2126 = vmatpush.msrb.mxu3 %v534_v52  ;;  %v98_v13 = vld [vmem:[#allocation5 + $0x158] sm:$0xff]  ;;  %v891_v52 = vld [vmem:[#allocation5 + $0x1a20] sm:$0x7] }
  0xf0   :  { %4665 = vmatmul.msk.f32.gmra.mxu1 %vm947_vm1, %v5125_v57  ;;  %4671 = vmatmul.msk.f32.gmra.mxu3 %vm947_vm1, %v5125_v57 }
  0xf1   :  { %2058 = vmatpush.msrb.mxu0 %v443_v14  ;;  %2081 = vmatpush.msrb.mxu1 %v444_v15  ;;  %v892_v14 = vld [vmem:[#allocation5 + $0x1a28] sm:$0x7]  ;;  %v893_v15 = vld [vmem:[#allocation5 + $0x1a30] sm:$0x7] }
  0xf2   :  { %2104 = vmatpush.msrb.mxu2 %v445_v16  ;;  %2127 = vmatpush.msrb.mxu3 %v446_v17  ;;  %v894_v16 = vld [vmem:[#allocation5 + $0x1a38] sm:$0x7]  ;;  %v803_v17 = vld [vmem:[#allocation5 + $0x1760] sm:$0xff] }
  0xf3   :  { %2059 = vmatpush.msrb.mxu0 %v355_v18  ;;  %2082 = vmatpush.msrb.mxu1 %v356_v19  ;;  %v804_v18 = vld [vmem:[#allocation5 + $0x1768] sm:$0xff]  ;;  %v805_v19 = vld [vmem:[#allocation5 + $0x1770] sm:$0xff] }
  0xf4   :  { %2105 = vmatpush.msrb.mxu2 %v357_v20  ;;  %2128 = vmatpush.msrb.mxu3 %v358_v21  ;;  %v806_v20 = vld [vmem:[#allocation5 + $0x1778] sm:$0xff]  ;;  %v715_v21 = vld [vmem:[#allocation5 + $0x14a0] sm:$0xff] }
  0xf5   :  { %2060 = vmatpush.msrb.mxu0 %v267_v22  ;;  %2083 = vmatpush.msrb.mxu1 %v268_v23  ;;  %v716_v22 = vld [vmem:[#allocation5 + $0x14a8] sm:$0xff]  ;;  %v717_v23 = vld [vmem:[#allocation5 + $0x14b0] sm:$0xff] }
  0xf6   :  { %2106 = vmatpush.msrb.mxu2 %v269_v24  ;;  %2129 = vmatpush.msrb.mxu3 %v270_v25  ;;  %v5207_v24 = vpop.f32.mrf.mxu0  ;;  %v718_v25 = vld [vmem:[#allocation5 + $0x14b8] sm:$0xff] }
  0xf7   :  { %2061 = vmatpush.msrb.mxu0 %v179_v26  ;;  %2084 = vmatpush.msrb.mxu1 %v180_v27  ;;  %v627_v26 = vld [vmem:[#allocation5 + $0x11e0] sm:$0xff]  ;;  %v5209_v27 = vpop.f32.mrf.mxu1 }
  0xf8   :  { %2107 = vmatpush.msrb.mxu2 %v181_v28  ;;  %2130 = vmatpush.msrb.mxu3 %v182_v29  ;;  %v628_v28 = vld [vmem:[#allocation5 + $0x11e8] sm:$0xff]  ;;  %v629_v29 = vld [vmem:[#allocation5 + $0x11f0] sm:$0xff] }
  0xf9   :  { %2062 = vmatpush.msrb.mxu0 %v91_v30  ;;  %2085 = vmatpush.msrb.mxu1 %v92_v5  ;;  %v630_v30 = vld [vmem:[#allocation5 + $0x11f8] sm:$0xff]  ;;  %v539_v5 = vld [vmem:[#allocation5 + $0xf20] sm:$0xff] }
  0xfa   :  { %2108 = vmatpush.msrb.mxu2 %v93_v31  ;;  %2131 = vmatpush.msrb.mxu3 %v94_v32  ;;  %v540_v31 = vld [vmem:[#allocation5 + $0xf28] sm:$0xff]  ;;  %v541_v32 = vld [vmem:[#allocation5 + $0xf30] sm:$0xff] }
  0xfb   :  { %4673 = vmatmul.msk.f32.vlgmr.msrb.gmra.mxu0 %vm947_vm1, %v5111_v38  ;;  %4679 = vmatmul.msk.f32.vlgmr.msrb.gmra.mxu2 %vm947_vm1, %v5111_v38 }
  0xfc   :  { %4684 = vmatpush.msk.msra.mxu0 %vm954_vm0, %v887_v33  ;;  %4687 = vmatpush.msk.msra.mxu1 %vm954_vm0, %v888_v34  ;;  %v542_v33 = vld [vmem:[#allocation5 + $0xf38] sm:$0xff]  ;;  %v5213_v34 = vpop.f32.mrf.mxu2 }
  0xfd   :  { %4690 = vmatpush.msk.msra.mxu2 %vm954_vm0, %v889_v35  ;;  %4693 = vmatpush.msk.msra.mxu3 %vm954_vm0, %v890_v36  ;;  %v451_v35 = vld [vmem:[#allocation5 + $0xc60] sm:$0xff]  ;;  %v452_v36 = vld [vmem:[#allocation5 + $0xc68] sm:$0xff] }
  0xfe   :  { %4676 = vmatmul.msk.f32.vlgmr.msrb.gmra.mxu1 %vm947_vm1, %v5111_v38  ;;  %4682 = vmatmul.msk.f32.vlgmr.msrb.gmra.mxu3 %vm947_vm1, %v5111_v38 }
  0xff   :  { %2146 = vmatpush.msra.mxu0 %v799_v37  ;;  %2169 = vmatpush.msra.mxu1 %v800_v39  ;;  %v453_v37 = vld [vmem:[#allocation5 + $0xc70] sm:$0xff]  ;;  %v5217_v39 = vpop.f32.mrf.mxu3 }
 0x100   :  { %2192 = vmatpush.msra.mxu2 %v801_v40  ;;  %2215 = vmatpush.msra.mxu3 %v802_v41  ;;  %v454_v40 = vld [vmem:[#allocation5 + $0xc78] sm:$0xff]  ;;  %v363_v41 = vld [vmem:[#allocation5 + $0x9a0] sm:$0xff] }
 0x101   :  { %2147 = vmatpush.msra.mxu0 %v711_v42  ;;  %2170 = vmatpush.msra.mxu1 %v712_v43  ;;  %v364_v42 = vld [vmem:[#allocation5 + $0x9a8] sm:$0xff]  ;;  %v365_v43 = vld [vmem:[#allocation5 + $0x9b0] sm:$0xff] }
 0x102   :  { %2193 = vmatpush.msra.mxu2 %v713_v44  ;;  %2216 = vmatpush.msra.mxu3 %v714_v45  ;;  %v5223_v44 = vpop.f32.mrf.mxu0  ;;  %v366_v45 = vld [vmem:[#allocation5 + $0x9b8] sm:$0xff] }
 0x103   :  { %2148 = vmatpush.msra.mxu0 %v623_v46  ;;  %2171 = vmatpush.msra.mxu1 %v624_v48  ;;  %v275_v46 = vld [vmem:[#allocation5 + $0x6e0] sm:$0xff]  ;;  %v5225_v48 = vpop.f32.mrf.mxu1 }
 0x104   :  { %2194 = vmatpush.msra.mxu2 %v625_v49  ;;  %2217 = vmatpush.msra.mxu3 %v626_v50  ;;  %v276_v49 = vld [vmem:[#allocation5 + $0x6e8] sm:$0xff]  ;;  %v277_v50 = vld [vmem:[#allocation5 + $0x6f0] sm:$0xff] }
 0x105   :  { %4674 = vmatmul.msk.f32.gmra.mxu0 %vm947_vm1, %v5125_v57  ;;  %4680 = vmatmul.msk.f32.gmra.mxu2 %vm947_vm1, %v5125_v57 }
 0x106   :  { %2149 = vmatpush.msra.mxu0 %v535_v51  ;;  %2172 = vmatpush.msra.mxu1 %v536_v53  ;;  %v278_v51 = vld [vmem:[#allocation5 + $0x6f8] sm:$0xff]  ;;  %v187_v53 = vld [vmem:[#allocation5 + $0x420] sm:$0xff] }
 0x107   :  { %2195 = vmatpush.msra.mxu2 %v537_v54  ;;  %2218 = vmatpush.msra.mxu3 %v538_v55  ;;  %v188_v54 = vld [vmem:[#allocation5 + $0x428] sm:$0xff]  ;;  %v189_v55 = vld [vmem:[#allocation5 + $0x430] sm:$0xff] }
 0x108   :  { %4677 = vmatmul.msk.f32.gmra.mxu1 %vm947_vm1, %v5125_v57  ;;  %4683 = vmatmul.msk.f32.gmra.mxu3 %vm947_vm1, %v5125_v57 }
 0x109   :  { %2150 = vmatpush.msra.mxu0 %v447_v56  ;;  %2173 = vmatpush.msra.mxu1 %v448_v58  ;;  %v190_v56 = vld [vmem:[#allocation5 + $0x438] sm:$0xff]  ;;  %v99_v58 = vld [vmem:[#allocation5 + $0x160] sm:$0xff] }
 0x10a   :  { %2196 = vmatpush.msra.mxu2 %v449_v59  ;;  %2219 = vmatpush.msra.mxu3 %v450_v60  ;;  %v100_v59 = vld [vmem:[#allocation5 + $0x168] sm:$0xff]  ;;  %v101_v60 = vld [vmem:[#allocation5 + $0x170] sm:$0xff] }
 0x10b   :  { %2151 = vmatpush.msra.mxu0 %v359_v61  ;;  %2174 = vmatpush.msra.mxu1 %v360_v62  ;;  %v5227_v61 = vpop.f32.mrf.mxu2  ;;  %v102_v62 = vld [vmem:[#allocation5 + $0x178] sm:$0xff] }
 0x10c   :  { %2197 = vmatpush.msra.mxu2 %v361_v63  ;;  %2220 = vmatpush.msra.mxu3 %v362_v0  ;;  %v895_v63 = vld [vmem:[#allocation5 + $0x1a40] sm:$0x7]  ;;  %v5229_v0 = vpop.f32.mrf.mxu3 }
 0x10d   :  { %2152 = vmatpush.msra.mxu0 %v271_v1  ;;  %2175 = vmatpush.msra.mxu1 %v272_v2  ;;  %v896_v1 = vld [vmem:[#allocation5 + $0x1a48] sm:$0x7]  ;;  %v897_v2 = vld [vmem:[#allocation5 + $0x1a50] sm:$0x7] }
 0x10e   :  { %2198 = vmatpush.msra.mxu2 %v273_v3  ;;  %2221 = vmatpush.msra.mxu3 %v274_v4  ;;  %v898_v3 = vld [vmem:[#allocation5 + $0x1a58] sm:$0x7]  ;;  %v5233_v4 = vpop.f32.mrf.mxu0 }
 0x10f   :  { %2153 = vmatpush.msra.mxu0 %v183_v6  ;;  %2176 = vmatpush.msra.mxu1 %v184_v7  ;;  %v807_v6 = vld [vmem:[#allocation5 + $0x1780] sm:$0xff]  ;;  %v5238_v7 = vpop.f32.mrf.mxu1 }
 0x110   :  { %2199 = vmatpush.msra.mxu2 %v185_v8  ;;  %2222 = vmatpush.msra.mxu3 %v186_v9  ;;  %v808_v8 = vld [vmem:[#allocation5 + $0x1788] sm:$0xff]  ;;  %v809_v9 = vld [vmem:[#allocation5 + $0x1790] sm:$0xff] }
 0x111   :  { %2154 = vmatpush.msra.mxu0 %v95_v10  ;;  %2177 = vmatpush.msra.mxu1 %v96_v11  ;;  %v810_v10 = vld [vmem:[#allocation5 + $0x1798] sm:$0xff]  ;;  %v719_v11 = vld [vmem:[#allocation5 + $0x14c0] sm:$0xff] }
 0x112   :  { %2200 = vmatpush.msra.mxu2 %v97_v12  ;;  %2223 = vmatpush.msra.mxu3 %v98_v13  ;;  %v720_v12 = vld [vmem:[#allocation5 + $0x14c8] sm:$0xff]  ;;  %v721_v13 = vld [vmem:[#allocation5 + $0x14d0] sm:$0xff] }
 0x113   :  { %4685 = vmatmul.msk.f32.vlgmr.msra.gmra.mxu0 %vm947_vm1, %v5111_v38  ;;  %4691 = vmatmul.msk.f32.vlgmr.msra.gmra.mxu2 %vm947_vm1, %v5111_v38 }
 0x114   :  { %4696 = vmatpush.msk.msrb.mxu0 %vm954_vm0, %v891_v52  ;;  %4699 = vmatpush.msk.msrb.mxu1 %vm954_vm0, %v892_v14  ;;  %v722_v52 = vld [vmem:[#allocation5 + $0x14d8] sm:$0xff]  ;;  %v631_v14 = vld [vmem:[#allocation5 + $0x1200] sm:$0xff] }
 0x115   :  { %4702 = vmatpush.msk.msrb.mxu2 %vm954_vm0, %v893_v15  ;;  %4705 = vmatpush.msk.msrb.mxu3 %vm954_vm0, %v894_v16  ;;  %v632_v15 = vld [vmem:[#allocation5 + $0x1208] sm:$0xff]  ;;  %v633_v16 = vld [vmem:[#allocation5 + $0x1210] sm:$0xff] }
 0x116   :  { %4688 = vmatmul.msk.f32.vlgmr.msra.gmra.mxu1 %vm947_vm1, %v5111_v38  ;;  %4694 = vmatmul.msk.f32.vlgmr.msra.gmra.mxu3 %vm947_vm1, %v5111_v38 }
 0x117   :  { %2238 = vmatpush.msrb.mxu0 %v803_v17  ;;  %2261 = vmatpush.msrb.mxu1 %v804_v18  ;;  %v5247_v17 = vpop.f32.mrf.mxu2  ;;  %v634_v18 = vld [vmem:[#allocation5 + $0x1218] sm:$0xff] }
 0x118   :  { %2284 = vmatpush.msrb.mxu2 %v805_v19  ;;  %2307 = vmatpush.msrb.mxu3 %v806_v20  ;;  %v543_v19 = vld [vmem:[#allocation5 + $0xf40] sm:$0xff]  ;;  %v544_v20 = vld [vmem:[#allocation5 + $0xf48] sm:$0xff] }
 0x119   :  { %2239 = vmatpush.msrb.mxu0 %v715_v21  ;;  %2262 = vmatpush.msrb.mxu1 %v716_v22  ;;  %v545_v21 = vld [vmem:[#allocation5 + $0xf50] sm:$0xff]  ;;  %v546_v22 = vld [vmem:[#allocation5 + $0xf58] sm:$0xff] }
 0x11a   :  { %2285 = vmatpush.msrb.mxu2 %v717_v23  ;;  %2308 = vmatpush.msrb.mxu3 %v718_v25  ;;  %v5253_v23 = vpop.f32.mrf.mxu0  ;;  %v455_v25 = vld [vmem:[#allocation5 + $0xc80] sm:$0xff] }
 0x11b   :  { %2240 = vmatpush.msrb.mxu0 %v627_v26  ;;  %2263 = vmatpush.msrb.mxu1 %v628_v28  ;;  %v5257_v26 = vpop.f32.mrf.mxu1  ;;  %v456_v28 = vld [vmem:[#allocation5 + $0xc88] sm:$0xff] }
 0x11c   :  { %2286 = vmatpush.msrb.mxu2 %v629_v29  ;;  %2309 = vmatpush.msrb.mxu3 %v630_v30  ;;  %v457_v29 = vld [vmem:[#allocation5 + $0xc90] sm:$0xff]  ;;  %v458_v30 = vld [vmem:[#allocation5 + $0xc98] sm:$0xff] }
 0x11d   :  { %4686 = vmatmul.msk.f32.gmra.mxu0 %vm947_vm1, %v5125_v57  ;;  %4692 = vmatmul.msk.f32.gmra.mxu2 %vm947_vm1, %v5125_v57 }
 0x11e   :  { %2241 = vmatpush.msrb.mxu0 %v539_v5  ;;  %2264 = vmatpush.msrb.mxu1 %v540_v31  ;;  %v367_v5 = vld [vmem:[#allocation5 + $0x9c0] sm:$0xff]  ;;  %v368_v31 = vld [vmem:[#allocation5 + $0x9c8] sm:$0xff] }
 0x11f   :  { %2287 = vmatpush.msrb.mxu2 %v541_v32  ;;  %2310 = vmatpush.msrb.mxu3 %v542_v33  ;;  %v369_v32 = vld [vmem:[#allocation5 + $0x9d0] sm:$0xff]  ;;  %v370_v33 = vld [vmem:[#allocation5 + $0x9d8] sm:$0xff] }
 0x120   :  { %4689 = vmatmul.msk.f32.gmra.mxu1 %vm947_vm1, %v5125_v57  ;;  %4695 = vmatmul.msk.f32.gmra.mxu3 %vm947_vm1, %v5125_v57 }
 0x121   :  { %2242 = vmatpush.msrb.mxu0 %v451_v35  ;;  %2265 = vmatpush.msrb.mxu1 %v452_v36  ;;  %v279_v35 = vld [vmem:[#allocation5 + $0x700] sm:$0xff]  ;;  %v280_v36 = vld [vmem:[#allocation5 + $0x708] sm:$0xff] }
 0x122   :  { %2288 = vmatpush.msrb.mxu2 %v453_v37  ;;  %2311 = vmatpush.msrb.mxu3 %v454_v40  ;;  %v281_v37 = vld [vmem:[#allocation5 + $0x710] sm:$0xff]  ;;  %v5263_v40 = vpop.f32.mrf.mxu2 }
 0x123   :  { %2243 = vmatpush.msrb.mxu0 %v363_v41  ;;  %2266 = vmatpush.msrb.mxu1 %v364_v42  ;;  %v282_v41 = vld [vmem:[#allocation5 + $0x718] sm:$0xff]  ;;  %v191_v42 = vld [vmem:[#allocation5 + $0x440] sm:$0xff] }
 0x124   :  { %2289 = vmatpush.msrb.mxu2 %v365_v43  ;;  %2312 = vmatpush.msrb.mxu3 %v366_v45  ;;  %v193_v43 = vld [vmem:[#allocation5 + $0x450] sm:$0xff] }
 0x125   :  { %2244 = vmatpush.msrb.mxu0 %v275_v46  ;;  %2267 = vmatpush.msrb.mxu1 %v276_v49  ;;  %v194_v46 = vld [vmem:[#allocation5 + $0x458] sm:$0xff]  ;;  %v103_v49 = vld [vmem:[#allocation5 + $0x180] sm:$0xff] }
 0x126   :  { %2290 = vmatpush.msrb.mxu2 %v277_v50  ;;  %2313 = vmatpush.msrb.mxu3 %v278_v51  ;;  %v104_v50 = vld [vmem:[#allocation5 + $0x188] sm:$0xff]  ;;  %v105_v51 = vld [vmem:[#allocation5 + $0x190] sm:$0xff] }
 0x127   :  { %2245 = vmatpush.msrb.mxu0 %v187_v53  ;;  %2268 = vmatpush.msrb.mxu1 %v188_v54  ;;  %v5267_v53 = vpop.f32.mrf.mxu0  ;;  %v106_v54 = vld [vmem:[#allocation5 + $0x198] sm:$0xff] }
 0x128   :  { %2291 = vmatpush.msrb.mxu2 %v189_v55  ;;  %2314 = vmatpush.msrb.mxu3 %v190_v56  ;;  %v5269_v55 = vpop.f32.mrf.mxu1  ;;  %v899_v56 = vld [vmem:[#allocation5 + $0x1a60] sm:$0x7] }
 0x129   :  { %2246 = vmatpush.msrb.mxu0 %v99_v58  ;;  %2269 = vmatpush.msrb.mxu1 %v100_v59  ;;  %v5271_v58 = vld [vmem:[#allocation2] sm:$0xff]  ;;  %v900_v59 = vld [vmem:[#allocation5 + $0x1a68] sm:$0x7] }
 0x12a   :  { %2292 = vmatpush.msrb.mxu2 %v101_v60  ;;  %2315 = vmatpush.msrb.mxu3 %v102_v62  ;;  %v901_v60 = vld [vmem:[#allocation5 + $0x1a70] sm:$0x7]  ;;  %v902_v62 = vld [vmem:[#allocation5 + $0x1a78] sm:$0x7] }
 0x12b   :  { %4697 = vmatmul.msk.f32.vlgmr.msrb.gmra.mxu0 %vm947_vm1, %v5111_v38  ;;  %4703 = vmatmul.msk.f32.vlgmr.msrb.gmra.mxu2 %vm947_vm1, %v5111_v38 }
 0x12c   :  { %4708 = vmatpush.msk.msra.mxu0 %vm954_vm0, %v895_v63  ;;  %4711 = vmatpush.msk.msra.mxu1 %vm954_vm0, %v896_v1  ;;  %v811_v63 = vld [vmem:[#allocation5 + $0x17a0] sm:$0xff]  ;;  %v812_v1 = vld [vmem:[#allocation5 + $0x17a8] sm:$0xff] }
 0x12d   :  { %4714 = vmatpush.msk.msra.mxu2 %vm954_vm0, %v897_v2  ;;  %4717 = vmatpush.msk.msra.mxu3 %vm954_vm0, %v898_v3  ;;  %v813_v2 = vld [vmem:[#allocation5 + $0x17b0] sm:$0xff]  ;;  %v5282_v3 = vpop.f32.mrf.mxu2 }
 0x12e   :  { %4700 = vmatmul.msk.f32.vlgmr.msrb.gmra.mxu1 %vm947_vm1, %v5111_v38  ;;  %4706 = vmatmul.msk.f32.vlgmr.msrb.gmra.mxu3 %vm947_vm1, %v5111_v38  ;;  %v5249_v38 = vpop.f32.mrf.mxu3 }
 0x12f   :  { %2330 = vmatpush.msra.mxu0 %v807_v6  ;;  %2353 = vmatpush.msra.mxu1 %v808_v8  ;;  %v814_v6 = vld [vmem:[#allocation5 + $0x17b8] sm:$0xff]  ;;  %v723_v8 = vld [vmem:[#allocation5 + $0x14e0] sm:$0xff] }
 0x130   :  { %2376 = vmatpush.msra.mxu2 %v809_v9  ;;  %2399 = vmatpush.msra.mxu3 %v810_v10  ;;  %v724_v9 = vld [vmem:[#allocation5 + $0x14e8] sm:$0xff]  ;;  %v725_v10 = vld [vmem:[#allocation5 + $0x14f0] sm:$0xff] }
 0x131   :  { %2331 = vmatpush.msra.mxu0 %v719_v11  ;;  %2354 = vmatpush.msra.mxu1 %v720_v12  ;;  %v726_v12 = vld [vmem:[#allocation5 + $0x14f8] sm:$0xff] }
 0x132   :  { %2377 = vmatpush.msra.mxu2 %v721_v13  ;;  %2400 = vmatpush.msra.mxu3 %v722_v52  ;;  %v635_v13 = vld [vmem:[#allocation5 + $0x1220] sm:$0xff]  ;;  %v636_v52 = vld [vmem:[#allocation5 + $0x1228] sm:$0xff] }
 0x133   :  { %2332 = vmatpush.msra.mxu0 %v631_v14  ;;  %2355 = vmatpush.msra.mxu1 %v632_v15  ;;  %v637_v14 = vld [vmem:[#allocation5 + $0x1230] sm:$0xff]  ;;  %v5289_v15 = vpop.f32.mrf.mxu0 }
 0x134   :  { %2378 = vmatpush.msra.mxu2 %v633_v16  ;;  %2401 = vmatpush.msra.mxu3 %v634_v18  ;;  %v638_v16 = vld [vmem:[#allocation5 + $0x1238] sm:$0xff]  ;;  %v5291_v18 = vpop.f32.mrf.mxu1 }
 0x135   :  { %4698 = vmatmul.msk.f32.gmra.mxu0 %vm947_vm1, %v5125_v57  ;;  %4704 = vmatmul.msk.f32.gmra.mxu2 %vm947_vm1, %v5125_v57 }
 0x136   :  { %2333 = vmatpush.msra.mxu0 %v543_v19  ;;  %2356 = vmatpush.msra.mxu1 %v544_v20  ;;  %v5265_v45 = vpop.f32.mrf.mxu3  ;;  %v547_v19 = vld [vmem:[#allocation5 + $0xf60] sm:$0xff]  ;;  %v5293_v20 = vld [vmem:[#allocation2 + $0x8] sm:$0xff] }
 0x137   :  { %2379 = vmatpush.msra.mxu2 %v545_v21  ;;  %2402 = vmatpush.msra.mxu3 %v546_v22  ;;  %v548_v21 = vld [vmem:[#allocation5 + $0xf68] sm:$0xff]  ;;  %v549_v22 = vld [vmem:[#allocation5 + $0xf70] sm:$0xff] }
 0x138   :  { %4701 = vmatmul.msk.f32.gmra.mxu1 %vm947_vm1, %v5125_v57  ;;  %4707 = vmatmul.msk.f32.gmra.mxu3 %vm947_vm1, %v5125_v57  ;;  %v192_v57 = vld [vmem:[#allocation5 + $0x448] sm:$0xff] }
 0x139   :  { %2334 = vmatpush.msra.mxu0 %v455_v25  ;;  %2357 = vmatpush.msra.mxu1 %v456_v28  ;;  %v550_v25 = vld [vmem:[#allocation5 + $0xf78] sm:$0xff]  ;;  %v459_v28 = vld [vmem:[#allocation5 + $0xca0] sm:$0xff] }
 0x13a   :  { %2380 = vmatpush.msra.mxu2 %v457_v29  ;;  %2403 = vmatpush.msra.mxu3 %v458_v30  ;;  %v460_v29 = vld [vmem:[#allocation5 + $0xca8] sm:$0xff]  ;;  %v461_v30 = vld [vmem:[#allocation5 + $0xcb0] sm:$0xff] }
 0x13b   :  { %2335 = vmatpush.msra.mxu0 %v367_v5  ;;  %2358 = vmatpush.msra.mxu1 %v368_v31  ;;  %v5303_v5 = vpop.f32.mrf.mxu2  ;;  %v462_v31 = vld [vmem:[#allocation5 + $0xcb8] sm:$0xff] }
 0x13c   :  { %2381 = vmatpush.msra.mxu2 %v369_v32  ;;  %2404 = vmatpush.msra.mxu3 %v370_v33  ;;  %v371_v32 = vld [vmem:[#allocation5 + $0x9e0] sm:$0xff]  ;;  %v372_v33 = vld [vmem:[#allocation5 + $0x9e8] sm:$0xff] }
 0x13d   :  { %2336 = vmatpush.msra.mxu0 %v279_v35  ;;  %2359 = vmatpush.msra.mxu1 %v280_v36  ;;  %v373_v35 = vld [vmem:[#allocation5 + $0x9f0] sm:$0xff] }
 0x13e   :  { %2382 = vmatpush.msra.mxu2 %v281_v37  ;;  %2405 = vmatpush.msra.mxu3 %v282_v41  ;;  %v5287_v11 = vpop.f32.mrf.mxu3  ;;  %v5307_v37 = vpop.f32.mrf.mxu0  ;;  %v374_v41 = vld [vmem:[#allocation5 + $0x9f8] sm:$0xff] }
 0x13f   :  { %2337 = vmatpush.msra.mxu0 %v191_v42  ;;  %2360 = vmatpush.msra.mxu1 %v192_v57  ;;  %v283_v42 = vld [vmem:[#allocation5 + $0x720] sm:$0xff]  ;;  %v5309_v57 = vpop.f32.mrf.mxu1 }
 0x140   :  { %2383 = vmatpush.msra.mxu2 %v193_v43  ;;  %2406 = vmatpush.msra.mxu3 %v194_v46  ;;  %v284_v43 = vld [vmem:[#allocation5 + $0x728] sm:$0xff]  ;;  %v285_v46 = vld [vmem:[#allocation5 + $0x730] sm:$0xff] }
 0x141   :  { %2338 = vmatpush.msra.mxu0 %v103_v49  ;;  %2361 = vmatpush.msra.mxu1 %v104_v50  ;;  %v286_v49 = vld [vmem:[#allocation5 + $0x738] sm:$0xff]  ;;  %v195_v50 = vld [vmem:[#allocation5 + $0x460] sm:$0xff] }
 0x142   :  { %2384 = vmatpush.msra.mxu2 %v105_v51  ;;  %2407 = vmatpush.msra.mxu3 %v106_v54  ;;  %v196_v51 = vld [vmem:[#allocation5 + $0x468] sm:$0xff]  ;;  %v197_v54 = vld [vmem:[#allocation5 + $0x470] sm:$0xff] }
 0x143   :  { %4709 = vmatmul.msk.f32.vlgmr.msra.gmra.mxu0 %vm947_vm1, %v5271_v58  ;;  %4712 = vmatmul.msk.f32.vlgmr.msra.gmra.mxu1 %vm947_vm1, %v5271_v58 }
 0x144   :  { %4715 = vmatmul.msk.f32.vlgmr.msra.gmra.mxu2 %vm947_vm1, %v5271_v58  ;;  %4718 = vmatmul.msk.f32.vlgmr.msra.gmra.mxu3 %vm947_vm1, %v5271_v58 }
 0x145   :  { %4720 = vmatpush.msk.msrb.mxu0 %vm954_vm0, %v899_v56  ;;  %4723 = vmatpush.msk.msrb.mxu1 %vm954_vm0, %v900_v59  ;;  %v198_v56 = vld [vmem:[#allocation5 + $0x478] sm:$0xff]  ;;  %v107_v59 = vld [vmem:[#allocation5 + $0x1a0] sm:$0xff] }
 0x146   :  { %4726 = vmatpush.msk.msrb.mxu2 %vm954_vm0, %v901_v60  ;;  %4729 = vmatpush.msk.msrb.mxu3 %vm954_vm0, %v902_v62  ;;  %v5305_v36 = vpop.f32.mrf.mxu3  ;;  %v108_v60 = vld [vmem:[#allocation5 + $0x1a8] sm:$0xff]  ;;  %v109_v62 = vld [vmem:[#allocation5 + $0x1b0] sm:$0xff] }
 0x147   :  { %2422 = vmatpush.msrb.mxu0 %v811_v63  ;;  %2445 = vmatpush.msrb.mxu1 %v812_v1  ;;  %v5311_v63 = vpop.f32.mrf.mxu2  ;;  %v110_v1 = vld [vmem:[#allocation5 + $0x1b8] sm:$0xff] }
 0x148   :  { %2468 = vmatpush.msrb.mxu2 %v813_v2  ;;  %2491 = vmatpush.msrb.mxu3 %v814_v6  ;;  %v903_v6 = vld [vmem:[#allocation5 + $0x1a80] sm:$0x7] }
 0x149   :  { %2423 = vmatpush.msrb.mxu0 %v723_v8  ;;  %2446 = vmatpush.msrb.mxu1 %v724_v9  ;;  %v904_v8 = vld [vmem:[#allocation5 + $0x1a88] sm:$0x7]  ;;  %v905_v9 = vld [vmem:[#allocation5 + $0x1a90] sm:$0x7] }
 0x14a   :  { %2469 = vmatpush.msrb.mxu2 %v725_v10  ;;  %2492 = vmatpush.msrb.mxu3 %v726_v12  ;;  %v5317_v10 = vpop.f32.mrf.mxu0  ;;  %v906_v12 = vld [vmem:[#allocation5 + $0x1a98] sm:$0x7] }
 0x14b   :  { %2424 = vmatpush.msrb.mxu0 %v635_v13  ;;  %2447 = vmatpush.msrb.mxu1 %v636_v52  ;;  %v815_v13 = vld [vmem:[#allocation5 + $0x17c0] sm:$0xff]  ;;  %v5323_v52 = vpop.f32.mrf.mxu1 }
 0x14c   :  { %2470 = vmatpush.msrb.mxu2 %v637_v14  ;;  %2493 = vmatpush.msrb.mxu3 %v638_v16  ;;  %v816_v14 = vld [vmem:[#allocation5 + $0x17c8] sm:$0xff]  ;;  %v817_v16 = vld [vmem:[#allocation5 + $0x17d0] sm:$0xff] }
 0x14d   :  { %4710 = vmatmul.msk.f32.gmra.mxu0 %vm947_vm1, %v5293_v20  ;;  %4713 = vmatmul.msk.f32.gmra.mxu1 %vm947_vm1, %v5293_v20 }
 0x14e   :  { %4716 = vmatmul.msk.f32.gmra.mxu2 %vm947_vm1, %v5293_v20  ;;  %4719 = vmatmul.msk.f32.gmra.mxu3 %vm947_vm1, %v5293_v20  ;;  %v5313_v2 = vpop.f32.mrf.mxu3 }
 0x14f   :  { %2425 = vmatpush.msrb.mxu0 %v547_v19  ;;  %2448 = vmatpush.msrb.mxu1 %v548_v21  ;;  %v818_v19 = vld [vmem:[#allocation5 + $0x17d8] sm:$0xff]  ;;  %v727_v21 = vld [vmem:[#allocation5 + $0x1500] sm:$0xff] }
 0x150   :  { %2471 = vmatpush.msrb.mxu2 %v549_v22  ;;  %2494 = vmatpush.msrb.mxu3 %v550_v25  ;;  %v728_v22 = vld [vmem:[#allocation5 + $0x1508] sm:$0xff]  ;;  %v729_v25 = vld [vmem:[#allocation5 + $0x1510] sm:$0xff] }
 0x151   :  { %2426 = vmatpush.msrb.mxu0 %v459_v28  ;;  %2449 = vmatpush.msrb.mxu1 %v460_v29  ;;  %v730_v28 = vld [vmem:[#allocation5 + $0x1518] sm:$0xff]  ;;  %v639_v29 = vld [vmem:[#allocation5 + $0x1240] sm:$0xff] }
 0x152   :  { %2472 = vmatpush.msrb.mxu2 %v461_v30  ;;  %2495 = vmatpush.msrb.mxu3 %v462_v31  ;;  %v640_v30 = vld [vmem:[#allocation5 + $0x1248] sm:$0xff]  ;;  %v641_v31 = vld [vmem:[#allocation5 + $0x1250] sm:$0xff] }
 0x153   :  { %2427 = vmatpush.msrb.mxu0 %v371_v32  ;;  %2450 = vmatpush.msrb.mxu1 %v372_v33  ;;  %v5331_v32 = vpop.f32.mrf.mxu2  ;;  %v642_v33 = vld [vmem:[#allocation5 + $0x1258] sm:$0xff] }
 0x154   :  { %2473 = vmatpush.msrb.mxu2 %v373_v35  ;;  %2496 = vmatpush.msrb.mxu3 %v374_v41  ;;  %v5335_v41 = vpop.f32.mrf.mxu0 }
 0x155   :  { %2428 = vmatpush.msrb.mxu0 %v283_v42  ;;  %2451 = vmatpush.msrb.mxu1 %v284_v43  ;;  %v551_v42 = vld [vmem:[#allocation5 + $0xf80] sm:$0xff]  ;;  %v5337_v43 = vpop.f32.mrf.mxu1 }
 0x156   :  { %2474 = vmatpush.msrb.mxu2 %v285_v46  ;;  %2497 = vmatpush.msrb.mxu3 %v286_v49  ;;  %v5333_v35 = vpop.f32.mrf.mxu3  ;;  %v552_v46 = vld [vmem:[#allocation5 + $0xf88] sm:$0xff]  ;;  %v553_v49 = vld [vmem:[#allocation5 + $0xf90] sm:$0xff] }
 0x157   :  { %2429 = vmatpush.msrb.mxu0 %v195_v50  ;;  %2452 = vmatpush.msrb.mxu1 %v196_v51  ;;  %v554_v50 = vld [vmem:[#allocation5 + $0xf98] sm:$0xff]  ;;  %v463_v51 = vld [vmem:[#allocation5 + $0xcc0] sm:$0xff] }
 0x158   :  { %2475 = vmatpush.msrb.mxu2 %v197_v54  ;;  %2498 = vmatpush.msrb.mxu3 %v198_v56  ;;  %v464_v54 = vld [vmem:[#allocation5 + $0xcc8] sm:$0xff]  ;;  %v465_v56 = vld [vmem:[#allocation5 + $0xcd0] sm:$0xff] }
 0x159   :  { %2430 = vmatpush.msrb.mxu0 %v107_v59  ;;  %2453 = vmatpush.msrb.mxu1 %v108_v60  ;;  %v466_v59 = vld [vmem:[#allocation5 + $0xcd8] sm:$0xff]  ;;  %v375_v60 = vld [vmem:[#allocation5 + $0xa00] sm:$0xff] }
 0x15a   :  { %2476 = vmatpush.msrb.mxu2 %v109_v62  ;;  %2499 = vmatpush.msrb.mxu3 %v110_v1  ;;  %v376_v62 = vld [vmem:[#allocation5 + $0xa08] sm:$0xff]  ;;  %v377_v1 = vld [vmem:[#allocation5 + $0xa10] sm:$0xff] }
 0x15b   :  { %4721 = vmatmul.msk.f32.vlgmr.msrb.gmra.mxu0 %vm947_vm1, %v5271_v58  ;;  %4724 = vmatmul.msk.f32.vlgmr.msrb.gmra.mxu1 %vm947_vm1, %v5271_v58 }
 0x15c   :  { %4727 = vmatmul.msk.f32.vlgmr.msrb.gmra.mxu2 %vm947_vm1, %v5271_v58  ;;  %4730 = vmatmul.msk.f32.vlgmr.msrb.gmra.mxu3 %vm947_vm1, %v5271_v58 }
 0x15d   :  { %4732 = vmatpush.msk.msra.mxu0 %vm954_vm0, %v903_v6  ;;  %4735 = vmatpush.msk.msra.mxu1 %vm954_vm0, %v904_v8  ;;  %v5347_v6 = vpop.f32.mrf.mxu2  ;;  %v378_v8 = vld [vmem:[#allocation5 + $0xa18] sm:$0xff] }
 0x15e   :  { %4738 = vmatpush.msk.msra.mxu2 %vm954_vm0, %v905_v9  ;;  %4741 = vmatpush.msk.msra.mxu3 %vm954_vm0, %v906_v12  ;;  %v287_v9 = vld [vmem:[#allocation5 + $0x740] sm:$0xff]  ;;  %v288_v12 = vld [vmem:[#allocation5 + $0x748] sm:$0xff] }
 0x15f   :  { %2514 = vmatpush.msra.mxu0 %v815_v13  ;;  %2537 = vmatpush.msra.mxu1 %v816_v14  ;;  %v289_v13 = vld [vmem:[#allocation5 + $0x750] sm:$0xff]  ;;  %v5349_v14 = vpop.f32.mrf.mxu3 }
 0x160   :  { %2560 = vmatpush.msra.mxu2 %v817_v16  ;;  %2583 = vmatpush.msra.mxu3 %v818_v19  ;;  %v290_v16 = vld [vmem:[#allocation5 + $0x758] sm:$0xff]  ;;  %v199_v19 = vld [vmem:[#allocation5 + $0x480] sm:$0xff] }
 0x161   :  { %2515 = vmatpush.msra.mxu0 %v727_v21  ;;  %2538 = vmatpush.msra.mxu1 %v728_v22  ;;  %v200_v21 = vld [vmem:[#allocation5 + $0x488] sm:$0xff]  ;;  %v201_v22 = vld [vmem:[#allocation5 + $0x490] sm:$0xff] }
 0x162   :  { %2561 = vmatpush.msra.mxu2 %v729_v25  ;;  %2584 = vmatpush.msra.mxu3 %v730_v28  ;;  %v5351_v25 = vpop.f32.mrf.mxu0  ;;  %v202_v28 = vld [vmem:[#allocation5 + $0x498] sm:$0xff] }
 0x163   :  { %2516 = vmatpush.msra.mxu0 %v639_v29  ;;  %2539 = vmatpush.msra.mxu1 %v640_v30  ;;  %v111_v29 = vld [vmem:[#allocation5 + $0x1c0] sm:$0xff]  ;;  %v5353_v30 = vpop.f32.mrf.mxu1 }
 0x164   :  { %2562 = vmatpush.msra.mxu2 %v641_v31  ;;  %2585 = vmatpush.msra.mxu3 %v642_v33  ;;  %v112_v31 = vld [vmem:[#allocation5 + $0x1c8] sm:$0xff]  ;;  %v113_v33 = vld [vmem:[#allocation5 + $0x1d0] sm:$0xff] }
 0x165   :  { %4722 = vmatmul.msk.f32.gmra.mxu0 %vm947_vm1, %v5293_v20  ;;  %4725 = vmatmul.msk.f32.gmra.mxu1 %vm947_vm1, %v5293_v20 }
 0x166   :  { %4728 = vmatmul.msk.f32.gmra.mxu2 %vm947_vm1, %v5293_v20  ;;  %4731 = vmatmul.msk.f32.gmra.mxu3 %vm947_vm1, %v5293_v20 }
 0x167   :  { %2517 = vmatpush.msra.mxu0 %v551_v42  ;;  %2540 = vmatpush.msra.mxu1 %v552_v46  ;;  %v114_v42 = vld [vmem:[#allocation5 + $0x1d8] sm:$0xff]  ;;  %v907_v46 = vld [vmem:[#allocation5 + $0x1aa0] sm:$0x7] }
 0x168   :  { %2563 = vmatpush.msra.mxu2 %v553_v49  ;;  %2586 = vmatpush.msra.mxu3 %v554_v50  ;;  %v908_v49 = vld [vmem:[#allocation5 + $0x1aa8] sm:$0x7]  ;;  %v909_v50 = vld [vmem:[#allocation5 + $0x1ab0] sm:$0x7] }
 0x169   :  { %2518 = vmatpush.msra.mxu0 %v463_v51  ;;  %2541 = vmatpush.msra.mxu1 %v464_v54  ;;  %v5357_v51 = vpop.f32.mrf.mxu2  ;;  %v910_v54 = vld [vmem:[#allocation5 + $0x1ab8] sm:$0x7] }
 0x16a   :  { %2564 = vmatpush.msra.mxu2 %v465_v56  ;;  %2587 = vmatpush.msra.mxu3 %v466_v59  ;;  %v819_v56 = vld [vmem:[#allocation5 + $0x17e0] sm:$0xff]  ;;  %v820_v59 = vld [vmem:[#allocation5 + $0x17e8] sm:$0xff] }
 0x16b   :  { %2519 = vmatpush.msra.mxu0 %v375_v60  ;;  %2542 = vmatpush.msra.mxu1 %v376_v62  ;;  %v821_v60 = vld [vmem:[#allocation5 + $0x17f0] sm:$0xff]  ;;  %v5366_v62 = vpop.f32.mrf.mxu3 }
 0x16c   :  { %2565 = vmatpush.msra.mxu2 %v377_v1  ;;  %2588 = vmatpush.msra.mxu3 %v378_v8  ;;  %7710 = vst [vmem:[#allocation11_spill] sm:$0xff] %v5366_v62  ;;  %v5368_v1 = vpop.f32.mrf.mxu0  ;;  %v822_v8 = vld [vmem:[#allocation5 + $0x17f8] sm:$0xff]  ;;  %v207_v62 = vld [vmem:[#allocation5 + $0x4c0] sm:$0xff] }
 0x16d   :  { %2520 = vmatpush.msra.mxu0 %v287_v9  ;;  %2543 = vmatpush.msra.mxu1 %v288_v12  ;;  %v731_v9 = vld [vmem:[#allocation5 + $0x1520] sm:$0xff]  ;;  %v5372_v12 = vpop.f32.mrf.mxu1 }
 0x16e   :  { %2566 = vmatpush.msra.mxu2 %v289_v13  ;;  %2589 = vmatpush.msra.mxu3 %v290_v16  ;;  %v732_v13 = vld [vmem:[#allocation5 + $0x1528] sm:$0xff]  ;;  %v733_v16 = vld [vmem:[#allocation5 + $0x1530] sm:$0xff] }
 0x16f   :  { %2521 = vmatpush.msra.mxu0 %v199_v19  ;;  %2544 = vmatpush.msra.mxu1 %v200_v21  ;;  %v734_v19 = vld [vmem:[#allocation5 + $0x1538] sm:$0xff]  ;;  %v643_v21 = vld [vmem:[#allocation5 + $0x1260] sm:$0xff] }
 0x170   :  { %2567 = vmatpush.msra.mxu2 %v201_v22  ;;  %2590 = vmatpush.msra.mxu3 %v202_v28  ;;  %v644_v22 = vld [vmem:[#allocation5 + $0x1268] sm:$0xff]  ;;  %v645_v28 = vld [vmem:[#allocation5 + $0x1270] sm:$0xff] }
 0x171   :  { %2522 = vmatpush.msra.mxu0 %v111_v29  ;;  %2545 = vmatpush.msra.mxu1 %v112_v31  ;;  %v646_v29 = vld [vmem:[#allocation5 + $0x1278] sm:$0xff]  ;;  %v5375_v31 = vpop.f32.mrf.mxu2 }
 0x172   :  { %2568 = vmatpush.msra.mxu2 %v113_v33  ;;  %2591 = vmatpush.msra.mxu3 %v114_v42  ;;  %v555_v33 = vld [vmem:[#allocation5 + $0xfa0] sm:$0xff]  ;;  %v556_v42 = vld [vmem:[#allocation5 + $0xfa8] sm:$0xff] }
 0x173   :  { %4733 = vmatmul.msk.f32.vlgmr.msra.gmra.mxu0 %vm947_vm1, %v5271_v58  ;;  %4736 = vmatmul.msk.f32.vlgmr.msra.gmra.mxu1 %vm947_vm1, %v5271_v58 }
 0x174   :  { %4739 = vmatmul.msk.f32.vlgmr.msra.gmra.mxu2 %vm947_vm1, %v5271_v58  ;;  %4742 = vmatmul.msk.f32.vlgmr.msra.gmra.mxu3 %vm947_vm1, %v5271_v58 }
 0x175   :  { %4744 = vmatpush.msk.msrb.mxu0 %vm954_vm0, %v907_v46  ;;  %4747 = vmatpush.msk.msrb.mxu1 %vm954_vm0, %v908_v49  ;;  %v557_v46 = vld [vmem:[#allocation5 + $0xfb0] sm:$0xff]  ;;  %v5379_v49 = vpop.f32.mrf.mxu3 }
 0x176   :  { %4750 = vmatpush.msk.msrb.mxu2 %vm954_vm0, %v909_v50  ;;  %4753 = vmatpush.msk.msrb.mxu3 %vm954_vm0, %v910_v54  ;;  %7711 = vst [vmem:[#allocation12_spill] sm:$0xff] %v5379_v49  ;;  %v558_v50 = vld [vmem:[#allocation5 + $0xfb8] sm:$0xff]  ;;  %v467_v54 = vld [vmem:[#allocation5 + $0xce0] sm:$0xff] }
 0x177   :  { %2606 = vmatpush.msrb.mxu0 %v819_v56  ;;  %2629 = vmatpush.msrb.mxu1 %v820_v59  ;;  %v468_v56 = vld [vmem:[#allocation5 + $0xce8] sm:$0xff]  ;;  %v469_v59 = vld [vmem:[#allocation5 + $0xcf0] sm:$0xff] }
 0x178   :  { %2652 = vmatpush.msrb.mxu2 %v821_v60  ;;  %2675 = vmatpush.msrb.mxu3 %v822_v8  ;;  %v5387_v60 = vpop.f32.mrf.mxu0  ;;  %v470_v8 = vld [vmem:[#allocation5 + $0xcf8] sm:$0xff] }
 0x179   :  { %2607 = vmatpush.msrb.mxu0 %v731_v9  ;;  %2630 = vmatpush.msrb.mxu1 %v732_v13  ;;  %7712 = vst [vmem:[#allocation13_spill] sm:$0xff] %v5387_v60  ;;  %v379_v9 = vld [vmem:[#allocation5 + $0xa20] sm:$0xff]  ;;  %v5389_v13 = vpop.f32.mrf.mxu1  ;;  %v298_v60 = vld [vmem:[#allocation5 + $0x798] sm:$0xff] }
 0x17a   :  { %2653 = vmatpush.msrb.mxu2 %v733_v16  ;;  %2676 = vmatpush.msrb.mxu3 %v734_v19  ;;  %7713 = vst [vmem:[#allocation14_spill] sm:$0xff] %v5389_v13  ;;  %v380_v16 = vld [vmem:[#allocation5 + $0xa28] sm:$0xff]  ;;  %v381_v19 = vld [vmem:[#allocation5 + $0xa30] sm:$0xff] }
 0x17b   :  { %2608 = vmatpush.msrb.mxu0 %v643_v21  ;;  %2631 = vmatpush.msrb.mxu1 %v644_v22  ;;  %v382_v21 = vld [vmem:[#allocation5 + $0xa38] sm:$0xff]  ;;  %v291_v22 = vld [vmem:[#allocation5 + $0x760] sm:$0xff] }
 0x17c   :  { %2654 = vmatpush.msrb.mxu2 %v645_v28  ;;  %2677 = vmatpush.msrb.mxu3 %v646_v29  ;;  %v292_v28 = vld [vmem:[#allocation5 + $0x768] sm:$0xff]  ;;  %v293_v29 = vld [vmem:[#allocation5 + $0x770] sm:$0xff] }
 0x17d   :  { %4734 = vmatmul.msk.f32.gmra.mxu0 %vm947_vm1, %v5293_v20  ;;  %4737 = vmatmul.msk.f32.gmra.mxu1 %vm947_vm1, %v5293_v20 }
 0x17e   :  { %4740 = vmatmul.msk.f32.gmra.mxu2 %vm947_vm1, %v5293_v20  ;;  %4743 = vmatmul.msk.f32.gmra.mxu3 %vm947_vm1, %v5293_v20 }
 0x17f   :  { %2609 = vmatpush.msrb.mxu0 %v555_v33  ;;  %2632 = vmatpush.msrb.mxu1 %v556_v42  ;;  %v294_v33 = vld [vmem:[#allocation5 + $0x778] sm:$0xff]  ;;  %v203_v42 = vld [vmem:[#allocation5 + $0x4a0] sm:$0xff] }
 0x180   :  { %2655 = vmatpush.msrb.mxu2 %v557_v46  ;;  %2678 = vmatpush.msrb.mxu3 %v558_v50  ;;  %v204_v46 = vld [vmem:[#allocation5 + $0x4a8] sm:$0xff]  ;;  %v5391_v50 = vpop.f32.mrf.mxu2 }
 0x181   :  { %2610 = vmatpush.msrb.mxu0 %v467_v54  ;;  %2633 = vmatpush.msrb.mxu1 %v468_v56  ;;  %7714 = vst [vmem:[#allocation15_spill] sm:$0xff] %v5391_v50  ;;  %v206_v54 = vld [vmem:[#allocation5 + $0x4b8] sm:$0xff]  ;;  %v115_v56 = vld [vmem:[#allocation5 + $0x1e0] sm:$0xff]  ;;  %v5415_v50 = vpop.permute.xlu0 %939 }
 0x182   :  { %2656 = vmatpush.msrb.mxu2 %v469_v59  ;;  %2679 = vmatpush.msrb.mxu3 %v470_v8  ;;  %v116_v59 = vld [vmem:[#allocation5 + $0x1e8] sm:$0xff]  ;;  %v117_v8 = vld [vmem:[#allocation5 + $0x1f0] sm:$0xff] }
 0x183   :  { %2611 = vmatpush.msrb.mxu0 %v379_v9  ;;  %2634 = vmatpush.msrb.mxu1 %v380_v16  ;;  %v5393_v9 = vpop.f32.mrf.mxu3  ;;  %v5395_v16 = vpop.f32.mrf.mxu0 }
 0x184   :  { %2657 = vmatpush.msrb.mxu2 %v381_v19  ;;  %2680 = vmatpush.msrb.mxu3 %v382_v21  ;;  %7715 = vst [vmem:[#allocation16_spill] sm:$0xff] %v5393_v9  ;;  %v118_v19 = vld [vmem:[#allocation5 + $0x1f8] sm:$0xff]  ;;  %v5397_v21 = vpop.f32.mrf.mxu1 }
 0x185   :  { %2612 = vmatpush.msrb.mxu0 %v291_v22  ;;  %2635 = vmatpush.msrb.mxu1 %v292_v28  ;;  %7716 = vst [vmem:[#allocation17_spill] sm:$0xff] %v5395_v16  ;;  %v911_v22 = vld [vmem:[#allocation5 + $0x1ac0] sm:$0x7]  ;;  %v912_v28 = vld [vmem:[#allocation5 + $0x1ac8] sm:$0x7]  ;;  %v297_v16 = vld [vmem:[#allocation5 + $0x790] sm:$0xff] }
 0x186   :  { %2658 = vmatpush.msrb.mxu2 %v293_v29  ;;  %2681 = vmatpush.msrb.mxu3 %v294_v33  ;;  %7717 = vst [vmem:[#allocation18_spill] sm:$0xff] %v5397_v21  ;;  %v913_v29 = vld [vmem:[#allocation5 + $0x1ad0] sm:$0x7]  ;;  %v823_v33 = vld [vmem:[#allocation5 + $0x1800] sm:$0xff] }
 0x187   :  { %2613 = vmatpush.msrb.mxu0 %v203_v42  ;;  %2636 = vmatpush.msrb.mxu1 %v204_v46  ;;  %v824_v42 = vld [vmem:[#allocation5 + $0x1808] sm:$0xff]  ;;  %v825_v46 = vld [vmem:[#allocation5 + $0x1810] sm:$0xff]  ;;  %v647_v21 = vld [vmem:[#allocation5 + $0x1280] sm:$0xff] }
 0x188   :  { %2659 = vmatpush.msrb.mxu2 %v205_v47  ;;  %2682 = vmatpush.msrb.mxu3 %v206_v54  ;;  %v914_v47 = vld [vmem:[#allocation5 + $0x1ad8] sm:$0x7]  ;;  %v5408_v54 = vpop.f32.mrf.mxu2 }
 0x189   :  { %2614 = vmatpush.msrb.mxu0 %v115_v56  ;;  %2637 = vmatpush.msrb.mxu1 %v116_v59  ;;  %7718 = vst [vmem:[#allocation19_spill] sm:$0xff] %v5408_v54  ;;  %v826_v56 = vld [vmem:[#allocation5 + $0x1818] sm:$0xff]  ;;  %v735_v59 = vld [vmem:[#allocation5 + $0x1540] sm:$0xff]  ;;  %v649_v54 = vld [vmem:[#allocation5 + $0x1290] sm:$0xff] }
 0x18a   :  { %2660 = vmatpush.msrb.mxu2 %v117_v8  ;;  %2683 = vmatpush.msrb.mxu3 %v118_v19  ;;  %v736_v8 = vld [vmem:[#allocation5 + $0x1548] sm:$0xff]  ;;  %v737_v19 = vld [vmem:[#allocation5 + $0x1550] sm:$0xff] }
 0x18b   :  { %4745 = vmatmul.msk.f32.vlgmr.msrb.gmra.mxu0 %vm947_vm1, %v5271_v58  ;;  %4748 = vmatmul.msk.f32.vlgmr.msrb.gmra.mxu1 %vm947_vm1, %v5271_v58  ;;  %v5413_v9 = vpop.f32.mrf.mxu3 }
 0x18c   :  { %4751 = vmatmul.msk.f32.vlgmr.msrb.gmra.mxu2 %vm947_vm1, %v5271_v58  ;;  %4754 = vmatmul.msk.f32.vlgmr.msrb.gmra.mxu3 %vm947_vm1, %v5271_v58  ;;  %7719 = vst [vmem:[#allocation20_spill] sm:$0xff] %v5413_v9  ;;  %v385_v9 = vld [vmem:[#allocation5 + $0xa50] sm:$0xff] }
 0x18d   :  { %4756 = vmatpush.msk.msra.mxu0 %vm954_vm0, %v911_v22  ;;  %4759 = vmatpush.msk.msra.mxu1 %vm954_vm0, %v912_v28  ;;  %v738_v22 = vld [vmem:[#allocation5 + $0x1558] sm:$0xff]  ;;  %v648_v28 = vld [vmem:[#allocation5 + $0x1288] sm:$0xff] }
 0x18e   :  { %4762 = vmatpush.msk.msra.mxu2 %vm954_vm0, %v913_v29  ;;  %4765 = vmatpush.msk.msra.mxu3 %vm954_vm0, %v914_v47  ;;  %v5417_v29 = vpop.f32.mrf.mxu0  ;;  %v650_v47 = vld [vmem:[#allocation5 + $0x1298] sm:$0xff] }
 0x18f   :  { %2698 = vmatpush.msra.mxu0 %v823_v33  ;;  %2721 = vmatpush.msra.mxu1 %v824_v42  ;;  %7720 = vst [vmem:[#allocation21_spill] sm:$0xff] %v5417_v29  ;;  %v5419_v33 = vpop.f32.mrf.mxu1  ;;  %v559_v42 = vld [vmem:[#allocation5 + $0xfc0] sm:$0xff]  ;;  %v5443_v29 = vadd.f32 %v5213_v34, %v5415_v50  ;;  %v296_v34 = vld [vmem:[#allocation5 + $0x788] sm:$0xff] }
 0x190   :  { %2744 = vmatpush.msra.mxu2 %v825_v46  ;;  %2767 = vmatpush.msra.mxu3 %v826_v56  ;;  %7721 = vst [vmem:[#allocation22_spill] sm:$0xff] %v5419_v33  ;;  %v560_v46 = vld [vmem:[#allocation5 + $0xfc8] sm:$0xff]  ;;  %v561_v56 = vld [vmem:[#allocation5 + $0xfd0] sm:$0xff] }
 0x191   :  { %2699 = vmatpush.msra.mxu0 %v735_v59  ;;  %2722 = vmatpush.msra.mxu1 %v736_v8  ;;  %v5425_v59 = vadd.f32 %v5207_v24, %v5415_v50  ;;  %v5429_v8 = vadd.f32 %v5209_v27, %v5415_v50  ;;  %v5437_v24 = vpop.f32.mrf.mxu2  ;;  %v474_v27 = vld [vmem:[#allocation5 + $0xd18] sm:$0xff]  ;;  %v384_v33 = vld [vmem:[#allocation5 + $0xa48] sm:$0xff]  ;;  %7725 = vst [vmem:[#allocation26_spill] sm:$0xff] %v5443_v29 }
 0x192   :  { %2745 = vmatpush.msra.mxu2 %v737_v19  ;;  %2768 = vmatpush.msra.mxu3 %v738_v22  ;;  %v472_v19 = vld [vmem:[#allocation5 + $0xd08] sm:$0xff]  ;;  %v473_v22 = vld [vmem:[#allocation5 + $0xd10] sm:$0xff]  ;;  %7724 = vst [vmem:[#allocation25_spill] sm:$0xff] %v5437_v24 }
 0x193   :  { %2700 = vmatpush.msra.mxu0 %v647_v21  ;;  %2723 = vmatpush.msra.mxu1 %v648_v28  ;;  %7722 = vst [vmem:[#allocation23_spill] sm:$0xff] %v5425_v59  ;;  %v562_v21 = vld [vmem:[#allocation5 + $0xfd8] sm:$0xff]  ;;  %v383_v28 = vld [vmem:[#allocation5 + $0xa40] sm:$0xff]  ;;  %v3425_v24 = vmul.f32 %v5429_v8, %v5429_v8  ;;  %v3243_v49 = vadd.f32 %v5429_v8, %v5425_v59 }
 0x194   :  { %2746 = vmatpush.msra.mxu2 %v649_v54  ;;  %2769 = vmatpush.msra.mxu3 %v650_v47  ;;  %7723 = vst [vmem:[#allocation24_spill] sm:$0xff] %v5429_v8  ;;  %v471_v54 = vld [vmem:[#allocation5 + $0xd00] sm:$0xff]  ;;  %v5439_v47 = vpop.permute.xlu0 %944 }
 0x195   :  { %4746 = vmatmul.msk.f32.gmra.mxu0 %vm947_vm1, %v5293_v20  ;;  %4749 = vmatmul.msk.f32.gmra.mxu1 %vm947_vm1, %v5293_v20  ;;  %v119_v8 = vld [vmem:[#allocation5 + $0x200] sm:$0xff] }
 0x196   :  { %4752 = vmatmul.msk.f32.gmra.mxu2 %vm947_vm1, %v5293_v20  ;;  %4755 = vmatmul.msk.f32.gmra.mxu3 %vm947_vm1, %v5293_v20 }
 0x197   :  { %2701 = vmatpush.msra.mxu0 %v559_v42  ;;  %2724 = vmatpush.msra.mxu1 %v560_v46  ;;  %v3424_v42 = vmul.f32 %v5425_v59, %v5425_v59  ;;  %v5449_v46 = vpop.f32.mrf.mxu3  ;;  %v5453_v13 = vpop.f32.mrf.mxu1  ;;  %v121_v59 = vld [vmem:[#allocation5 + $0x210] sm:$0xff] }
 0x198   :  { %2747 = vmatpush.msra.mxu2 %v561_v56  ;;  %2770 = vmatpush.msra.mxu3 %v562_v21  ;;  %7726 = vst [vmem:[#allocation27_spill] sm:$0xff] %v5449_v46  ;;  %v5451_v56 = vpop.f32.mrf.mxu0  ;;  %v386_v21 = vld [vmem:[#allocation5 + $0xa58] sm:$0xff]  ;;  %v5459_v46 = vadd.f32 %v5223_v44, %v5439_v47 }
 0x199   :  { %2702 = vmatpush.msra.mxu0 %v471_v54  ;;  %2725 = vmatpush.msra.mxu1 %v472_v19  ;;  %v295_v54 = vld [vmem:[#allocation5 + $0x780] sm:$0xff]  ;;  %7727 = vst [vmem:[#allocation28_spill] sm:$0xff] %v5453_v13  ;;  %v5463_v19 = vadd.f32 %v5225_v48, %v5439_v47  ;;  %v210_v44 = vld [vmem:[#allocation5 + $0x4d8] sm:$0xff]  ;;  %v120_v48 = vld [vmem:[#allocation5 + $0x208] sm:$0xff]  ;;  %v5476_v13 = vadd.f32 %v5227_v61, %v5439_v47 }
 0x19a   :  { %2748 = vmatpush.msra.mxu2 %v473_v22  ;;  %2771 = vmatpush.msra.mxu3 %v474_v27  ;;  %7728 = vst [vmem:[#allocation29_spill] sm:$0xff] %v5459_v46  ;;  %v208_v22 = vld [vmem:[#allocation5 + $0x4c8] sm:$0xff]  ;;  %v209_v27 = vld [vmem:[#allocation5 + $0x4d0] sm:$0xff]  ;;  %v915_v61 = vld [vmem:[#allocation5 + $0x1ae0] sm:$0x7] }
 0x19b   :  { %2703 = vmatpush.msra.mxu0 %v383_v28  ;;  %2726 = vmatpush.msra.mxu1 %v384_v33  ;;  %7729 = vst [vmem:[#allocation30_spill] sm:$0xff] %v5463_v19  ;;  %v5467_v28 = vadd.f32 %v5217_v39, %v5415_v50  ;;  %v3600_v33 = vadd.f32 %v3425_v24, %v3424_v42  ;;  %v122_v39 = vld [vmem:[#allocation5 + $0x218] sm:$0xff] }
 0x19c   :  { %2749 = vmatpush.msra.mxu2 %v385_v9  ;;  %2772 = vmatpush.msra.mxu3 %v386_v21  ;;  %v3426_v9 = vmul.f32 %v5443_v29, %v5443_v29  ;;  %v3244_v21 = vadd.f32 %v3243_v49, %v5443_v29  ;;  %7731 = vst [vmem:[#allocation32_spill] sm:$0xff] %v5476_v13  ;;  %v741_v29 = vld [vmem:[#allocation5 + $0x1570] sm:$0xff] }
 0x19d   :  { %2704 = vmatpush.msra.mxu0 %v295_v54  ;;  %7730 = vst [vmem:[#allocation31_spill] sm:$0xff] %v5467_v28  ;;  %2727 = vmatpush.msra.mxu1 %v296_v34  ;;  %v5472_v54 = vpop.f32.mrf.mxu2  ;;  %v3427_v49 = vmul.f32 %v5467_v28, %v5467_v28  ;;  %v3334_v34 = vadd.f32 %v5463_v19, %v5459_v46 }
 0x19e   :  { %2750 = vmatpush.msra.mxu2 %v297_v16  ;;  %2773 = vmatpush.msra.mxu3 %v298_v60  ;;  %v3512_v16 = vmul.f32 %v5459_v46, %v5459_v46  ;;  %v3513_v60 = vmul.f32 %v5463_v19, %v5463_v19  ;;  %v3601_v24 = vadd.f32 %v3600_v33, %v3426_v9  ;;  %v827_v9 = vld [vmem:[#allocation5 + $0x1820] sm:$0xff]  ;;  %v829_v19 = vld [vmem:[#allocation5 + $0x1830] sm:$0xff] }
 0x19f   :  { %2705 = vmatpush.msra.mxu0 %v207_v62  ;;  %2728 = vmatpush.msra.mxu1 %v208_v22  ;;  %v5484_v62 = vadd.f32 %v5233_v4, %v5415_v50  ;;  %v5488_v42 = vpop.f32.mrf.mxu3  ;;  %v917_v22 = vld [vmem:[#allocation5 + $0x1af0] sm:$0x7]  ;;  %v3245_v4 = vadd.f32 %v3244_v21, %v5467_v28  ;;  %v5503_v33 = vadd.f32 %v5229_v0, %v5439_v47  ;;  %v828_v21 = vld [vmem:[#allocation5 + $0x1828] sm:$0xff] }
 0x1a0   :  { %2751 = vmatpush.msra.mxu2 %v209_v27  ;;  %2774 = vmatpush.msra.mxu3 %v210_v44  ;;  %v5495_v27 = vpop.f32.mrf.mxu0  ;;  %v3514_v44 = vmul.f32 %v5476_v13, %v5476_v13  ;;  %v3602_v28 = vadd.f32 %v3601_v24, %v3427_v49  ;;  %v5516_v0 = vadd.f32 %v5238_v7, %v5415_v50  ;;  %v742_v49 = vld [vmem:[#allocation5 + $0x1578] sm:$0xff]  ;;  %v651_v7 = vld [vmem:[#allocation5 + $0x12a0] sm:$0xff] }
 0x1a1   :  { %2706 = vmatpush.msra.mxu0 %v119_v8  ;;  %7732 = vst [vmem:[#allocation33_spill] sm:$0xff] %v5484_v62  ;;  %2729 = vmatpush.msra.mxu1 %v120_v48  ;;  %v916_v8 = vld [vmem:[#allocation5 + $0x1ae8] sm:$0x7]  ;;  %v3690_v48 = vadd.f32 %v3513_v60, %v3512_v16  ;;  %v3428_v46 = vmul.f32 %v5484_v62, %v5484_v62  ;;  %v830_v16 = vld [vmem:[#allocation5 + $0x1838] sm:$0xff]  ;;  %v739_v60 = vld [vmem:[#allocation5 + $0x1560] sm:$0xff] }
 0x1a2   :  { %2752 = vmatpush.msra.mxu2 %v121_v59  ;;  %2775 = vmatpush.msra.mxu3 %v122_v39  ;;  %v918_v59 = vld [vmem:[#allocation5 + $0x1af8] sm:$0x7]  ;;  %7733 = vst [vmem:[#allocation34_spill] sm:$0xff] %v5503_v33  ;;  %v5507_v39 = vpop.f32.mrf.mxu1  ;;  %v5525_v24 = vadd.f32 %v5253_v23, %v5439_v47 }
 0x1a3   :  { %4757 = vmatmul.msk.f32.vlgmr.msra.gmra.mxu0 %vm947_vm1, %v5271_v58  ;;  %4760 = vmatmul.msk.f32.vlgmr.msra.gmra.mxu1 %vm947_vm1, %v5271_v58  ;;  %7734 = vst [vmem:[#allocation35_spill] sm:$0xff] %v5507_v39  ;;  %v3246_v39 = vadd.f32 %v3245_v4, %v5484_v62  ;;  %v3429_v4 = vmul.f32 %v5516_v0, %v5516_v0  ;;  %v654_v23 = vld [vmem:[#allocation5 + $0x12b8] sm:$0xff] }
 0x1a4   :  { %4763 = vmatmul.msk.f32.vlgmr.msra.gmra.mxu2 %vm947_vm1, %v5271_v58  ;;  %4766 = vmatmul.msk.f32.vlgmr.msra.gmra.mxu3 %vm947_vm1, %v5271_v58  ;;  %7735 = vst [vmem:[#allocation36_spill] sm:$0xff] %v5516_v0  ;;  %v3335_v58 = vadd.f32 %v3334_v34, %v5476_v13  ;;  %v652_v34 = vld [vmem:[#allocation5 + $0x12a8] sm:$0xff] }
 0x1a5   :  { %4768 = vmatpush.msk.msrb.mxu0 %vm954_vm0, %v915_v61  ;;  %4771 = vmatpush.msk.msrb.mxu1 %vm954_vm0, %v916_v8  ;;  %v740_v61 = vld [vmem:[#allocation5 + $0x1568] sm:$0xff]  ;;  %7736 = vst [vmem:[#allocation37_spill] sm:$0xff] %v5525_v24  ;;  %v3515_v8 = vmul.f32 %v5503_v33, %v5503_v33 }
 0x1a6   :  { %4774 = vmatpush.msk.msrb.mxu2 %vm954_vm0, %v917_v22  ;;  %4777 = vmatpush.msk.msrb.mxu3 %vm954_vm0, %v918_v59  ;;  %v3691_v22 = vadd.f32 %v3690_v48, %v3514_v44  ;;  %v653_v59 = vld [vmem:[#allocation5 + $0x12b0] sm:$0xff]  ;;  %v3336_v13 = vadd.f32 %v3335_v58, %v5503_v33  ;;  %v3247_v44 = vadd.f32 %v3246_v39, %v5516_v0  ;;  %v564_v39 = vld [vmem:[#allocation5 + $0xfe8] sm:$0xff]  ;;  %v390_v0 = vld [vmem:[#allocation5 + $0xa78] sm:$0xff] }
 0x1a7   :  { %2790 = vmatpush.msrb.mxu0 %v827_v9  ;;  %2813 = vmatpush.msrb.mxu1 %v828_v21  ;;  %v3603_v9 = vadd.f32 %v3602_v28, %v3428_v46  ;;  %v5535_v21 = vpop.f32.mrf.mxu2  ;;  %v5539_v48 = vpop.f32.mrf.mxu3  ;;  %v563_v28 = vld [vmem:[#allocation5 + $0xfe0] sm:$0xff]  ;;  %v565_v58 = vld [vmem:[#allocation5 + $0xff0] sm:$0xff] }
 0x1a8   :  { %2836 = vmatpush.msrb.mxu2 %v829_v19  ;;  %2859 = vmatpush.msrb.mxu3 %v830_v16  ;;  %v5533_v19 = vadd.f32 %v5247_v17, %v5415_v50  ;;  %v5541_v46 = vpop.f32.mrf.mxu0  ;;  %v5545_v17 = vadd.f32 %v5257_v26, %v5439_v47  ;;  %v3692_v16 = vadd.f32 %v3691_v22, %v3515_v8  ;;  %v475_v8 = vld [vmem:[#allocation5 + $0xd20] sm:$0xff] }
 0x1a9   :  { %2791 = vmatpush.msrb.mxu0 %v739_v60  ;;  %2814 = vmatpush.msrb.mxu1 %v740_v61  ;;  %v3604_v61 = vadd.f32 %v3603_v9, %v3429_v4  ;;  %v5557_v26 = vadd.f32 %v5249_v38, %v5415_v50  ;;  %v3337_v22 = vadd.f32 %v3336_v13, %v5525_v24  ;;  %v478_v9 = vld [vmem:[#allocation5 + $0xd38] sm:$0xff]  ;;  %v387_v4 = vld [vmem:[#allocation5 + $0xa60] sm:$0xff] }
 0x1aa   :  { %7737 = vst [vmem:[#allocation38_spill] sm:$0xff] %v5533_v19  ;;  %2837 = vmatpush.msrb.mxu2 %v741_v29  ;;  %2860 = vmatpush.msrb.mxu3 %v742_v49  ;;  %v3516_v29 = vmul.f32 %v5525_v24, %v5525_v24  ;;  %v5549_v60 = vpop.f32.mrf.mxu1  ;;  %v3430_v49 = vmul.f32 %v5533_v19, %v5533_v19 }
 0x1ab   :  { %2792 = vmatpush.msrb.mxu0 %v651_v7  ;;  %2815 = vmatpush.msrb.mxu1 %v652_v34  ;;  %7738 = vst [vmem:[#allocation39_spill] sm:$0xff] %v5545_v17  ;;  %v566_v7 = vld [vmem:[#allocation5 + $0xff8] sm:$0xff]  ;;  %v476_v34 = vld [vmem:[#allocation5 + $0xd28] sm:$0xff]  ;;  %v5568_v38 = vadd.f32 %v5267_v53, %v5415_v50  ;;  %v5574_v13 = vadd.f32 %v5263_v40, %v5439_v47 }
 0x1ac   :  { %2838 = vmatpush.msrb.mxu2 %v653_v59  ;;  %2861 = vmatpush.msrb.mxu3 %v654_v23  ;;  %7739 = vst [vmem:[#allocation40_spill] sm:$0xff] %v5557_v26  ;;  %v477_v59 = vld [vmem:[#allocation5 + $0xd30] sm:$0xff]  ;;  %v3517_v23 = vmul.f32 %v5545_v17, %v5545_v17  ;;  %v3693_v33 = vadd.f32 %v3692_v16, %v3516_v29  ;;  %v299_v29 = vld [vmem:[#allocation5 + $0x7a0] sm:$0xff]  ;;  %v300_v40 = vld [vmem:[#allocation5 + $0x7a8] sm:$0xff] }
 0x1ad   :  { %4758 = vmatmul.msk.f32.gmra.mxu0 %vm947_vm1, %v5293_v20  ;;  %4761 = vmatmul.msk.f32.gmra.mxu1 %vm947_vm1, %v5293_v20  ;;  %7740 = vst [vmem:[#allocation41_spill] sm:$0xff] %v5568_v38  ;;  %v3248_v24 = vadd.f32 %v3247_v44, %v5533_v19  ;;  %v3605_v53 = vadd.f32 %v3604_v61, %v3430_v49  ;;  %v302_v49 = vld [vmem:[#allocation5 + $0x7b8] sm:$0xff] }
 0x1ae   :  { %4764 = vmatmul.msk.f32.gmra.mxu2 %vm947_vm1, %v5293_v20  ;;  %4767 = vmatmul.msk.f32.gmra.mxu3 %vm947_vm1, %v5293_v20  ;;  %7741 = vst [vmem:[#allocation42_spill] sm:$0xff] %v5574_v13  ;;  %v388_v20 = vld [vmem:[#allocation5 + $0xa68] sm:$0xff]  ;;  %v3338_v16 = vadd.f32 %v3337_v22, %v5545_v17  ;;  %v5586_v44 = vadd.f32 %v5269_v55, %v5415_v50  ;;  %v213_v17 = vld [vmem:[#allocation5 + $0x4f0] sm:$0xff] }
 0x1af   :  { %2793 = vmatpush.msrb.mxu0 %v563_v28  ;;  %2816 = vmatpush.msrb.mxu1 %v564_v39  ;;  %v389_v28 = vld [vmem:[#allocation5 + $0xa70] sm:$0xff]  ;;  %v3431_v39 = vmul.f32 %v5557_v26, %v5557_v26  ;;  %v5588_v61 = vpop.f32.mrf.mxu3  ;;  %v3518_v22 = vmul.f32 %v5574_v13, %v5574_v13  ;;  %v3249_v55 = vadd.f32 %v3248_v24, %v5557_v26 }
 0x1b0   :  { %2839 = vmatpush.msrb.mxu2 %v565_v58  ;;  %2862 = vmatpush.msrb.mxu3 %v566_v7  ;;  %v5579_v58 = vpop.f32.mrf.mxu2  ;;  %v301_v7 = vld [vmem:[#allocation5 + $0x7b0] sm:$0xff]  ;;  %7742 = vst [vmem:[#allocation43_spill] sm:$0xff] %v5586_v44  ;;  %v5674_v26 = vadd.f32 %v5311_v63, %v5415_v50 }
 0x1b1   :  { %2794 = vmatpush.msrb.mxu0 %v475_v8  ;;  %2817 = vmatpush.msrb.mxu1 %v476_v34  ;;  %v3432_v8 = vmul.f32 %v5568_v38, %v5568_v38  ;;  %v211_v34 = vld [vmem:[#allocation5 + $0x4e0] sm:$0xff]  ;;  %v3606_v19 = vadd.f32 %v3605_v53, %v3431_v39  ;;  %v3250_v24 = vadd.f32 %v3249_v55, %v5568_v38  ;;  %v126_v39 = vld [vmem:[#allocation5 + $0x238] sm:$0xff] }
 0x1b2   :  { %2840 = vmatpush.msrb.mxu2 %v477_v59  ;;  %2863 = vmatpush.msrb.mxu3 %v478_v9  ;;  %v3694_v59 = vadd.f32 %v3693_v33, %v3517_v23  ;;  %v5594_v9 = vadd.f32 %v5265_v45, %v5439_v47  ;;  %v214_v33 = vld [vmem:[#allocation5 + $0x4f8] sm:$0xff]  ;;  %v123_v23 = vld [vmem:[#allocation5 + $0x220] sm:$0xff]  ;;  %v3339_v45 = vadd.f32 %v3338_v16, %v5574_v13  ;;  %v5604_v62 = vpop.f32.mrf.mxu1 }
 0x1b3   :  { %2795 = vmatpush.msrb.mxu0 %v387_v4  ;;  %2818 = vmatpush.msrb.mxu1 %v388_v20  ;;  %v212_v4 = vld [vmem:[#allocation5 + $0x4e8] sm:$0xff]  ;;  %v5599_v20 = vadd.f32 %v5282_v3, %v5415_v50  ;;  %v3607_v53 = vadd.f32 %v3606_v19, %v3432_v8  ;;  %v3433_v3 = vmul.f32 %v5586_v44, %v5586_v44 }
 0x1b4   :  { %2841 = vmatpush.msrb.mxu2 %v389_v28  ;;  %7743 = vst [vmem:[#allocation44_spill] sm:$0xff] %v5594_v9  ;;  %2864 = vmatpush.msrb.mxu3 %v390_v0  ;;  %v5601_v28 = vpop.f32.mrf.mxu0  ;;  %v124_v0 = vld [vmem:[#allocation5 + $0x228] sm:$0xff]  ;;  %v5613_v16 = vadd.f32 %v5289_v15, %v5439_v47  ;;  %v5619_v19 = vadd.f32 %v5287_v11, %v5415_v50 }
 0x1b5   :  { %2796 = vmatpush.msrb.mxu0 %v299_v29  ;;  %7744 = vst [vmem:[#allocation45_spill] sm:$0xff] %v5599_v20  ;;  %2819 = vmatpush.msrb.mxu1 %v300_v40  ;;  %v125_v29 = vld [vmem:[#allocation5 + $0x230] sm:$0xff]  ;;  %v3695_v40 = vadd.f32 %v3694_v59, %v3518_v22  ;;  %v3340_v8 = vadd.f32 %v3339_v45, %v5594_v9  ;;  %v920_v15 = vld [vmem:[#allocation5 + $0x1b08] sm:$0x7] }
 0x1b6   :  { %2842 = vmatpush.msrb.mxu2 %v301_v7  ;;  %2865 = vmatpush.msrb.mxu3 %v302_v49  ;;  %v3519_v7 = vmul.f32 %v5594_v9, %v5594_v9  ;;  %7745 = vst [vmem:[#allocation46_spill] sm:$0xff] %v5613_v16  ;;  %v3434_v49 = vmul.f32 %v5599_v20, %v5599_v20  ;;  %v921_v59 = vld [vmem:[#allocation5 + $0x1b10] sm:$0x7]  ;;  %v743_v9 = vld [vmem:[#allocation5 + $0x1580] sm:$0xff] }
 0x1b7   :  { %2797 = vmatpush.msrb.mxu0 %v211_v34  ;;  %2820 = vmatpush.msrb.mxu1 %v212_v4  ;;  %7746 = vst [vmem:[#allocation47_spill] sm:$0xff] %v5619_v19  ;;  %v5622_v34 = vld [vmem:[#allocation2] sm:$0xff]  ;;  %v3251_v22 = vadd.f32 %v3250_v24, %v5586_v44  ;;  %v3608_v4 = vadd.f32 %v3607_v53, %v3433_v3 }
 0x1b8   :  { %2843 = vmatpush.msrb.mxu2 %v213_v17  ;;  %2866 = vmatpush.msrb.mxu3 %v214_v33  ;;  %v919_v17 = vld [vmem:[#allocation5 + $0x1b00] sm:$0x7]  ;;  %v5629_v11 = vadd.f32 %v5307_v37, %v5415_v50  ;;  %v5631_v55 = vpop.f32.mrf.mxu2  ;;  %v922_v33 = vld [vmem:[#allocation5 + $0x1b18] sm:$0x7]  ;;  %v3696_v45 = vadd.f32 %v3695_v40, %v3519_v7  ;;  %v832_v37 = vld [vmem:[#allocation5 + $0x1848] sm:$0xff]  ;;  %v5649_v40 = vpop.f32.mrf.mxu3  ;;  %v5658_v13 = vadd.f32 %v5303_v5, %v5439_v47 }
 0x1b9   :  { %2798 = vmatpush.msrb.mxu0 %v123_v23  ;;  %2821 = vmatpush.msrb.mxu1 %v124_v0  ;;  %v831_v23 = vld [vmem:[#allocation5 + $0x1840] sm:$0xff]  ;;  %v3520_v0 = vmul.f32 %v5613_v16, %v5613_v16  ;;  %v833_v24 = vld [vmem:[#allocation5 + $0x1850] sm:$0xff]  ;;  %v3252_v53 = vadd.f32 %v3251_v22, %v5599_v20  ;;  %v3609_v3 = vadd.f32 %v3608_v4, %v3434_v49  ;;  %v744_v22 = vld [vmem:[#allocation5 + $0x1588] sm:$0xff] }
 0x1ba   :  { %2844 = vmatpush.msrb.mxu2 %v125_v29  ;;  %2867 = vmatpush.msrb.mxu3 %v126_v39  ;;  %7747 = vst [vmem:[#allocation48_spill] sm:$0xff] %v5629_v11  ;;  %v5641_v29 = vadd.f32 %v5291_v18, %v5439_v47  ;;  %v3435_v39 = vmul.f32 %v5619_v19, %v5619_v19  ;;  %v834_v18 = vld [vmem:[#allocation5 + $0x1858] sm:$0xff]  ;;  %v5660_v49 = vpop.f32.mrf.mxu1  ;;  %v745_v4 = vld [vmem:[#allocation5 + $0x1590] sm:$0xff] }
 0x1bb   :  { %4769 = vmatmul.msk.f32.vlgmr.msrb.gmra.mxu0 %vm947_vm1, %v5622_v34  ;;  %4772 = vmatmul.msk.f32.vlgmr.msrb.gmra.mxu1 %vm947_vm1, %v5622_v34  ;;  %7749 = vst [vmem:[#allocation50_spill] sm:$0xff] %v5658_v13  ;;  %v3697_v5 = vadd.f32 %v3696_v45, %v3520_v0  ;;  %v3253_v44 = vadd.f32 %v3252_v53, %v5619_v19  ;;  %v7783_v19 = vld [vmem:[#allocation19_spill] sm:$0xff] }
 0x1bc   :  { %4775 = vmatmul.msk.f32.vlgmr.msrb.gmra.mxu2 %vm947_vm1, %v5622_v34  ;;  %7748 = vst [vmem:[#allocation49_spill] sm:$0xff] %v5641_v29  ;;  %4778 = vmatmul.msk.f32.vlgmr.msrb.gmra.mxu3 %vm947_vm1, %v5622_v34  ;;  %v5651_v7 = vpop.f32.mrf.mxu0  ;;  %v3521_v20 = vmul.f32 %v5641_v29, %v5641_v29  ;;  %v3610_v38 = vadd.f32 %v3609_v3, %v3435_v39  ;;  %v567_v3 = vld [vmem:[#allocation5 + $0x1000] sm:$0xff] }
 0x1bd   :  { %4780 = vmatpush.msk.msra.mxu0 %vm954_vm0, %v919_v17  ;;  %4783 = vmatpush.msk.msra.mxu1 %vm954_vm0, %v920_v15  ;;  %v3341_v17 = vadd.f32 %v3340_v8, %v5613_v16  ;;  %v3436_v15 = vmul.f32 %v5629_v11, %v5629_v11  ;;  %v746_v8 = vld [vmem:[#allocation5 + $0x1598] sm:$0xff]  ;;  %v655_v16 = vld [vmem:[#allocation5 + $0x12c0] sm:$0xff]  ;;  %7751 = vst [vmem:[#allocation52_spill] sm:$0xff] %v5674_v26 }
 0x1be   :  { %4786 = vmatpush.msk.msra.mxu2 %vm954_vm0, %v921_v59  ;;  %4789 = vmatpush.msk.msra.mxu3 %vm954_vm0, %v922_v33  ;;  %v5667_v59 = vadd.f32 %v5309_v57, %v5415_v50  ;;  %v656_v33 = vld [vmem:[#allocation5 + $0x12c8] sm:$0xff]  ;;  %v658_v57 = vld [vmem:[#allocation5 + $0x12d8] sm:$0xff]  ;;  %v3522_v45 = vmul.f32 %v5658_v13, %v5658_v13  ;;  %v3254_v0 = vadd.f32 %v3253_v44, %v5629_v11  ;;  %v569_v44 = vld [vmem:[#allocation5 + $0x1010] sm:$0xff] }
 0x1bf   :  { %2882 = vmatpush.msra.mxu0 %v831_v23  ;;  %2905 = vmatpush.msra.mxu1 %v832_v37  ;;  %v657_v23 = vld [vmem:[#allocation5 + $0x12d0] sm:$0xff]  ;;  %v3342_v37 = vadd.f32 %v3341_v17, %v5641_v29  ;;  %v3698_v39 = vadd.f32 %v3697_v5, %v3521_v20  ;;  %v3438_v17 = vmul.f32 %v5674_v26, %v5674_v26 }
 0x1c0   :  { %7750 = vst [vmem:[#allocation51_spill] sm:$0xff] %v5667_v59  ;;  %2928 = vmatpush.msra.mxu2 %v833_v24  ;;  %2951 = vmatpush.msra.mxu3 %v834_v18  ;;  %v3611_v24 = vadd.f32 %v3610_v38, %v3436_v15  ;;  %v3437_v63 = vmul.f32 %v5667_v59, %v5667_v59  ;;  %v5686_v53 = vpop.f32.mrf.mxu2  ;;  %v568_v38 = vld [vmem:[#allocation5 + $0x1008] sm:$0xff]  ;;  %v481_v5 = vld [vmem:[#allocation5 + $0xd50] sm:$0xff] }
 0x1c1   :  { %2883 = vmatpush.msra.mxu0 %v743_v9  ;;  %2906 = vmatpush.msra.mxu1 %v744_v22  ;;  %v5681_v9 = vadd.f32 %v5305_v36, %v5439_v47  ;;  %v3343_v18 = vadd.f32 %v3342_v37, %v5658_v13  ;;  %v5691_v36 = vadd.f32 %v5317_v10, %v5439_v47  ;;  %v5703_v22 = vpop.f32.mrf.mxu3  ;;  %v570_v10 = vld [vmem:[#allocation5 + $0x1018] sm:$0xff] }
 0x1c2   :  { %2929 = vmatpush.msra.mxu2 %v745_v4  ;;  %2952 = vmatpush.msra.mxu3 %v746_v8  ;;  %v5701_v20 = vadd.f32 %v5313_v2, %v5415_v50  ;;  %v479_v4 = vld [vmem:[#allocation5 + $0xd40] sm:$0xff]  ;;  %v3699_v15 = vadd.f32 %v3698_v39, %v3522_v45  ;;  %v480_v2 = vld [vmem:[#allocation5 + $0xd48] sm:$0xff]  ;;  %v482_v45 = vld [vmem:[#allocation5 + $0xd58] sm:$0xff]  ;;  %v5725_v29 = vadd.f32 %v5323_v52, %v5439_v47 }
 0x1c3   :  { %7752 = vst [vmem:[#allocation53_spill] sm:$0xff] %v5681_v9  ;;  %2884 = vmatpush.msra.mxu0 %v655_v16  ;;  %2907 = vmatpush.msra.mxu1 %v656_v33  ;;  %v5693_v16 = vld [vmem:[#allocation2 + $0x8] sm:$0xff]  ;;  %v3523_v8 = vmul.f32 %v5681_v9, %v5681_v9  ;;  %v3255_v33 = vadd.f32 %v3254_v0, %v5667_v59  ;;  %v391_v39 = vld [vmem:[#allocation5 + $0xa80] sm:$0xff]  ;;  %v5727_v0 = vpop.f32.mrf.mxu1 }
 0x1c4   :  { %2930 = vmatpush.msra.mxu2 %v657_v23  ;;  %7753 = vst [vmem:[#allocation54_spill] sm:$0xff] %v5691_v36  ;;  %2953 = vmatpush.msra.mxu3 %v658_v57  ;;  %v3612_v23 = vadd.f32 %v3611_v24, %v3437_v63  ;;  %v5716_v57 = vadd.f32 %v5335_v41, %v5415_v50  ;;  %v5718_v37 = vpop.f32.mrf.mxu0  ;;  %v392_v41 = vld [vmem:[#allocation5 + $0xa88] sm:$0xff]  ;;  %v393_v24 = vld [vmem:[#allocation5 + $0xa90] sm:$0xff] }
 0x1c5   :  { %4770 = vmatmul.msk.f32.gmra.mxu0 %vm947_vm1, %v5693_v16  ;;  %7754 = vst [vmem:[#allocation55_spill] sm:$0xff] %v5701_v20  ;;  %4773 = vmatmul.msk.f32.gmra.mxu1 %vm947_vm1, %v5693_v16  ;;  %v3344_v13 = vadd.f32 %v3343_v18, %v5681_v9  ;;  %v3256_v63 = vadd.f32 %v3255_v33, %v5674_v26  ;;  %v394_v18 = vld [vmem:[#allocation5 + $0xa98] sm:$0xff]  ;;  %v303_v9 = vld [vmem:[#allocation5 + $0x7c0] sm:$0xff]  ;;  %v217_v33 = vld [vmem:[#allocation5 + $0x510] sm:$0xff] }
 0x1c6   :  { %4776 = vmatmul.msk.f32.gmra.mxu2 %vm947_vm1, %v5693_v16  ;;  %4779 = vmatmul.msk.f32.gmra.mxu3 %vm947_vm1, %v5693_v16  ;;  %7755 = vst [vmem:[#allocation56_spill] sm:$0xff] %v5716_v57  ;;  %v3700_v59 = vadd.f32 %v3699_v15, %v3523_v8  ;;  %v5735_v11 = vadd.f32 %v5331_v32, %v5439_v47  ;;  %v306_v15 = vld [vmem:[#allocation5 + $0x7d8] sm:$0xff]  ;;  %v215_v8 = vld [vmem:[#allocation5 + $0x500] sm:$0xff] }
 0x1c7   :  { %2885 = vmatpush.msra.mxu0 %v567_v3  ;;  %2908 = vmatpush.msra.mxu1 %v568_v38  ;;  %v3524_v3 = vmul.f32 %v5691_v36, %v5691_v36  ;;  %7756 = vst [vmem:[#allocation57_spill] sm:$0xff] %v5725_v29  ;;  %v3613_v38 = vadd.f32 %v3612_v23, %v3438_v17 }
 0x1c8   :  { %2931 = vmatpush.msra.mxu2 %v569_v44  ;;  %2954 = vmatpush.msra.mxu3 %v570_v10  ;;  %v3439_v44 = vmul.f32 %v5701_v20, %v5701_v20  ;;  %v3345_v52 = vadd.f32 %v3344_v13, %v5691_v36  ;;  %7757 = vst [vmem:[#allocation58_spill] sm:$0xff] %v5735_v11  ;;  %v304_v10 = vld [vmem:[#allocation5 + $0x7c8] sm:$0xff] }
 0x1c9   :  { %2886 = vmatpush.msra.mxu0 %v479_v4  ;;  %2909 = vmatpush.msra.mxu1 %v480_v2  ;;  %v305_v4 = vld [vmem:[#allocation5 + $0x7d0] sm:$0xff]  ;;  %v3440_v17 = vmul.f32 %v5716_v57, %v5716_v57  ;;  %v5741_v2 = vadd.f32 %v5337_v43, %v5415_v50  ;;  %v3701_v13 = vadd.f32 %v3700_v59, %v3524_v3  ;;  %v5750_v43 = vpop.f32.mrf.mxu2  ;;  %v127_v59 = vld [vmem:[#allocation5 + $0x240] sm:$0xff] }
 0x1ca   :  { %2932 = vmatpush.msra.mxu2 %v481_v5  ;;  %2955 = vmatpush.msra.mxu3 %v482_v45  ;;  %v3525_v32 = vmul.f32 %v5725_v29, %v5725_v29  ;;  %v216_v5 = vld [vmem:[#allocation5 + $0x508] sm:$0xff]  ;;  %v3257_v23 = vadd.f32 %v3256_v63, %v5701_v20  ;;  %v3614_v45 = vadd.f32 %v3613_v38, %v3439_v44 }
 0x1cb   :  { %2887 = vmatpush.msra.mxu0 %v391_v39  ;;  %7758 = vst [vmem:[#allocation59_spill] sm:$0xff] %v5741_v2  ;;  %2910 = vmatpush.msra.mxu1 %v392_v41  ;;  %v5748_v39 = vadd.f32 %v5347_v6, %v5415_v50  ;;  %v218_v41 = vld [vmem:[#allocation5 + $0x518] sm:$0xff]  ;;  %v3346_v3 = vadd.f32 %v3345_v52, %v5725_v29  ;;  %v128_v63 = vld [vmem:[#allocation5 + $0x248] sm:$0xff]  ;;  %v129_v6 = vld [vmem:[#allocation5 + $0x250] sm:$0xff] }
 0x1cc   :  { %2933 = vmatpush.msra.mxu2 %v393_v24  ;;  %2956 = vmatpush.msra.mxu3 %v394_v18  ;;  %v5757_v24 = vadd.f32 %v5333_v35, %v5439_v47  ;;  %v3258_v38 = vadd.f32 %v3257_v23, %v5716_v57  ;;  %v3615_v44 = vadd.f32 %v3614_v45, %v3440_v17  ;;  %v5764_v52 = vpop.f32.mrf.mxu0 }
 0x1cd   :  { %2888 = vmatpush.msra.mxu0 %v303_v9  ;;  %7759 = vst [vmem:[#allocation60_spill] sm:$0xff] %v5748_v39  ;;  %2911 = vmatpush.msra.mxu1 %v304_v10  ;;  %v3526_v9 = vmul.f32 %v5735_v11, %v5735_v11  ;;  %v3441_v18 = vmul.f32 %v5741_v2, %v5741_v2  ;;  %v5762_v10 = vpop.f32.mrf.mxu3 }
 0x1ce   :  { %2934 = vmatpush.msra.mxu2 %v305_v4  ;;  %7760 = vst [vmem:[#allocation61_spill] sm:$0xff] %v5757_v24  ;;  %2957 = vmatpush.msra.mxu3 %v306_v15  ;;  %v130_v4 = vld [vmem:[#allocation5 + $0x258] sm:$0xff]  ;;  %v3702_v29 = vadd.f32 %v3701_v13, %v3525_v32  ;;  %v3347_v35 = vadd.f32 %v3346_v3, %v5735_v11  ;;  %v923_v13 = vld [vmem:[#allocation5 + $0x1b20] sm:$0x7] }
 0x1cf   :  { %2889 = vmatpush.msra.mxu0 %v215_v8  ;;  %2912 = vmatpush.msra.mxu1 %v216_v5  ;;  %v5769_v15 = vadd.f32 %v5351_v25, %v5439_v47  ;;  %v5771_v8 = vpop.f32.mrf.mxu1  ;;  %v3442_v17 = vmul.f32 %v5748_v39, %v5748_v39  ;;  %v5777_v23 = vadd.f32 %v5349_v14, %v5415_v50  ;;  %v924_v25 = vld [vmem:[#allocation5 + $0x1b28] sm:$0x7] }
 0x1d0   :  { %2935 = vmatpush.msra.mxu2 %v217_v33  ;;  %2958 = vmatpush.msra.mxu3 %v218_v41  ;;  %v3703_v32 = vadd.f32 %v3702_v29, %v3526_v9  ;;  %v3527_v5 = vmul.f32 %v5757_v24, %v5757_v24  ;;  %v925_v33 = vld [vmem:[#allocation5 + $0x1b30] sm:$0x7]  ;;  %v3259_v45 = vadd.f32 %v3258_v38, %v5741_v2  ;;  %v926_v29 = vld [vmem:[#allocation5 + $0x1b38] sm:$0x7] }
 0x1d1   :  { %7761 = vst [vmem:[#allocation62_spill] sm:$0xff] %v5769_v15  ;;  %2890 = vmatpush.msra.mxu0 %v127_v59  ;;  %2913 = vmatpush.msra.mxu1 %v128_v63  ;;  %v3616_v41 = vadd.f32 %v3615_v44, %v3441_v18  ;;  %v5786_v14 = vadd.f32 %v5368_v1, %v5415_v50  ;;  %v835_v59 = vld [vmem:[#allocation5 + $0x1860] sm:$0xff]  ;;  %v836_v1 = vld [vmem:[#allocation5 + $0x1868] sm:$0xff]  ;;  %v7776_v2 = vld [vmem:[#allocation14_spill] sm:$0xff] }
 0x1d2   :  { %7762 = vst [vmem:[#allocation63_spill] sm:$0xff] %v5777_v23  ;;  %2936 = vmatpush.msra.mxu2 %v129_v6  ;;  %2959 = vmatpush.msra.mxu3 %v130_v4  ;;  %v3348_v3 = vadd.f32 %v3347_v35, %v5757_v24  ;;  %v3528_v9 = vmul.f32 %v5769_v15, %v5769_v15  ;;  %v837_v6 = vld [vmem:[#allocation5 + $0x1870] sm:$0xff]  ;;  %v5805_v4 = vpop.f32.mrf.mxu2  ;;  %v747_v35 = vld [vmem:[#allocation5 + $0x15a0] sm:$0xff] }
 0x1d3   :  { %4781 = vmatmul.msk.f32.vlgmr.msra.gmra.mxu0 %vm947_vm1, %v5622_v34  ;;  %7763 = vst [vmem:[#allocation64_spill] sm:$0xff] %v5786_v14  ;;  %4784 = vmatmul.msk.f32.vlgmr.msra.gmra.mxu1 %vm947_vm1, %v5622_v34  ;;  %v5797_v63 = vadd.f32 %v5353_v30, %v5439_v47  ;;  %v3260_v38 = vadd.f32 %v3259_v45, %v5748_v39  ;;  %v838_v30 = vld [vmem:[#allocation5 + $0x1878] sm:$0xff]  ;;  %v749_v45 = vld [vmem:[#allocation5 + $0x15b0] sm:$0xff] }
 0x1d4   :  { %4787 = vmatmul.msk.f32.vlgmr.msra.gmra.mxu2 %vm947_vm1, %v5622_v34  ;;  %4790 = vmatmul.msk.f32.vlgmr.msra.gmra.mxu3 %vm947_vm1, %v5622_v34  ;;  %v3617_v44 = vadd.f32 %v3616_v41, %v3442_v17  ;;  %v3443_v18 = vmul.f32 %v5777_v23, %v5777_v23  ;;  %v3704_v24 = vadd.f32 %v3703_v32, %v3527_v5  ;;  %v748_v17 = vld [vmem:[#allocation5 + $0x15a8] sm:$0xff]  ;;  %v750_v32 = vld [vmem:[#allocation5 + $0x15b8] sm:$0xff]  ;;  %v659_v5 = vld [vmem:[#allocation5 + $0x12e0] sm:$0xff]  ;;  %v5830_v39 = vpop.f32.mrf.mxu0 }
 0x1d5   :  { %7764 = vst [vmem:[#allocation65_spill] sm:$0xff] %v5797_v63  ;;  %4792 = vmatpush.msk.msrb.mxu0 %vm954_vm0, %v923_v13  ;;  %4795 = vmatpush.msk.msrb.mxu1 %vm954_vm0, %v924_v25  ;;  %v3349_v11 = vadd.f32 %v3348_v3, %v5769_v15  ;;  %v5812_v13 = vadd.f32 %v5357_v51, %v5439_v47  ;;  %v661_v3 = vld [vmem:[#allocation5 + $0x12f0] sm:$0xff] }
 0x1d6   :  { %4798 = vmatpush.msk.msrb.mxu2 %vm954_vm0, %v925_v33  ;;  %4801 = vmatpush.msk.msrb.mxu3 %vm954_vm0, %v926_v29  ;;  %v3444_v41 = vmul.f32 %v5786_v14, %v5786_v14  ;;  %v5819_v25 = vadd.f32 %v5372_v12, %v5415_v50  ;;  %v5821_v33 = vpop.f32.mrf.mxu3  ;;  %v3705_v51 = vadd.f32 %v3704_v24, %v3528_v9 }
 0x1d7   :  { %7765 = vst [vmem:[#allocation66_spill] sm:$0xff] %v5812_v13  ;;  %2974 = vmatpush.msrb.mxu0 %v835_v59  ;;  %2997 = vmatpush.msrb.mxu1 %v836_v1  ;;  %v3529_v29 = vmul.f32 %v5797_v63, %v5797_v63  ;;  %v660_v59 = vld [vmem:[#allocation5 + $0x12e8] sm:$0xff]  ;;  %v3261_v15 = vadd.f32 %v3260_v38, %v5777_v23  ;;  %v662_v1 = vld [vmem:[#allocation5 + $0x12f8] sm:$0xff]  ;;  %v5839_v38 = vpop.f32.mrf.mxu1 }
 0x1d8   :  { %7766 = vst [vmem:[#allocation67_spill] sm:$0xff] %v5819_v25  ;;  %3020 = vmatpush.msrb.mxu2 %v837_v6  ;;  %3043 = vmatpush.msrb.mxu3 %v838_v30  ;;  %v3618_v36 = vadd.f32 %v3617_v44, %v3443_v18  ;;  %v5828_v12 = vadd.f32 %v5375_v31, %v5415_v50  ;;  %v7768_v6 = vld [vmem:[#allocation11_spill] sm:$0xff] }
 0x1d9   :  { %2975 = vmatpush.msrb.mxu0 %v747_v35  ;;  %2998 = vmatpush.msrb.mxu1 %v748_v17  ;;  %v3350_v24 = vadd.f32 %v3349_v11, %v5797_v63  ;;  %v3530_v9 = vmul.f32 %v5812_v13, %v5812_v13  ;;  %v5837_v30 = vadd.f32 %v7768_v6, %v5439_v47  ;;  %v571_v11 = vld [vmem:[#allocation5 + $0x1020] sm:$0xff] }
 0x1da   :  { %7767 = vst [vmem:[#allocation68_spill] sm:$0xff] %v5828_v12  ;;  %3021 = vmatpush.msrb.mxu2 %v749_v45  ;;  %3044 = vmatpush.msrb.mxu3 %v750_v32  ;;  %v3262_v31 = vadd.f32 %v3261_v15, %v5786_v14  ;;  %v3619_v44 = vadd.f32 %v3618_v36, %v3444_v41  ;;  %v7770_v45 = vld [vmem:[#allocation13_spill] sm:$0xff]  ;;  %v572_v32 = vld [vmem:[#allocation5 + $0x1028] sm:$0xff]  ;;  %v5870_v14 = vpop.f32.mrf.mxu2 }
 0x1db   :  { %7769 = vst [vmem:[#allocation11_spill] sm:$0xff] %v5837_v30  ;;  %2976 = vmatpush.msrb.mxu0 %v659_v5  ;;  %v3445_v18 = vmul.f32 %v5819_v25, %v5819_v25  ;;  %2999 = vmatpush.msrb.mxu1 %v660_v59  ;;  %v3706_v35 = vadd.f32 %v3705_v51, %v3529_v29  ;;  %v573_v15 = vld [vmem:[#allocation5 + $0x1030] sm:$0xff]  ;;  %v7772_v41 = vld [vmem:[#allocation12_spill] sm:$0xff]  ;;  %v574_v51 = vld [vmem:[#allocation5 + $0x1038] sm:$0xff] }
 0x1dc   :  { %3022 = vmatpush.msrb.mxu2 %v661_v3  ;;  %v3351_v17 = vadd.f32 %v3350_v24, %v5812_v13  ;;  %v5847_v6 = vadd.f32 %v7770_v45, %v5439_v47  ;;  %3045 = vmatpush.msrb.mxu3 %v662_v1  ;;  %v3446_v36 = vmul.f32 %v5828_v12, %v5828_v12  ;;  %v483_v29 = vld [vmem:[#allocation5 + $0xd60] sm:$0xff]  ;;  %v484_v1 = vld [vmem:[#allocation5 + $0xd68] sm:$0xff]  ;;  %v485_v24 = vld [vmem:[#allocation5 + $0xd70] sm:$0xff] }
 0x1dd   :  { %4782 = vmatmul.msk.f32.gmra.mxu0 %vm947_vm1, %v5693_v16  ;;  %v5855_v5 = vadd.f32 %v7772_v41, %v5415_v50  ;;  %4785 = vmatmul.msk.f32.gmra.mxu1 %vm947_vm1, %v5693_v16  ;;  %v3707_v59 = vadd.f32 %v3706_v35, %v3530_v9  ;;  %v3531_v3 = vmul.f32 %v5837_v30, %v5837_v30  ;;  %v7774_v13 = vld [vmem:[#allocation17_spill] sm:$0xff]  ;;  %v486_v9 = vld [vmem:[#allocation5 + $0xd78] sm:$0xff]  ;;  %v395_v35 = vld [vmem:[#allocation5 + $0xaa0] sm:$0xff] }
 0x1de   :  { %7771 = vst [vmem:[#allocation13_spill] sm:$0xff] %v5847_v6  ;;  %4788 = vmatmul.msk.f32.gmra.mxu2 %vm947_vm1, %v5693_v16  ;;  %4791 = vmatmul.msk.f32.gmra.mxu3 %vm947_vm1, %v5693_v16  ;;  %v3263_v45 = vadd.f32 %v3262_v31, %v5819_v25  ;;  %v3620_v41 = vadd.f32 %v3619_v44, %v3445_v18  ;;  %v396_v31 = vld [vmem:[#allocation5 + $0xaa8] sm:$0xff]  ;;  %v307_v25 = vld [vmem:[#allocation5 + $0x7e0] sm:$0xff] }
 0x1df   :  { %7773 = vst [vmem:[#allocation12_spill] sm:$0xff] %v5855_v5  ;;  %2977 = vmatpush.msrb.mxu0 %v571_v11  ;;  %v5868_v63 = vadd.f32 %v7774_v13, %v5415_v50  ;;  %3000 = vmatpush.msrb.mxu1 %v572_v32  ;;  %v3352_v23 = vadd.f32 %v3351_v17, %v5837_v30  ;;  %v397_v13 = vld [vmem:[#allocation5 + $0xab0] sm:$0xff]  ;;  %v5884_v17 = vpop.f32.mrf.mxu0  ;;  %v398_v30 = vld [vmem:[#allocation5 + $0xab8] sm:$0xff] }
 0x1e0   :  { %3023 = vmatpush.msrb.mxu2 %v573_v15  ;;  %v3532_v11 = vmul.f32 %v5847_v6, %v5847_v6  ;;  %v5877_v57 = vadd.f32 %v7776_v2, %v5439_v47  ;;  %3046 = vmatpush.msrb.mxu3 %v574_v51  ;;  %v3264_v44 = vadd.f32 %v3263_v45, %v5828_v12  ;;  %v5882_v15 = vpop.f32.mrf.mxu3  ;;  %v5891_v45 = vpop.f32.mrf.mxu1 }
 0x1e1   :  { %7775 = vst [vmem:[#allocation17_spill] sm:$0xff] %v5868_v63  ;;  %2978 = vmatpush.msrb.mxu0 %v483_v29  ;;  %v3621_v18 = vadd.f32 %v3620_v41, %v3446_v36  ;;  %v3447_v32 = vmul.f32 %v5855_v5, %v5855_v5  ;;  %3001 = vmatpush.msrb.mxu1 %v484_v1  ;;  %v7779_v29 = vld [vmem:[#allocation15_spill] sm:$0xff]  ;;  %v308_v36 = vld [vmem:[#allocation5 + $0x7e8] sm:$0xff]  ;;  %v309_v41 = vld [vmem:[#allocation5 + $0x7f0] sm:$0xff] }
 0x1e2   :  { %7777 = vst [vmem:[#allocation14_spill] sm:$0xff] %v5877_v57  ;;  %3024 = vmatpush.msrb.mxu2 %v485_v24  ;;  %v3708_v2 = vadd.f32 %v3707_v59, %v3531_v3  ;;  %v3353_v51 = vadd.f32 %v3352_v23, %v5847_v6  ;;  %v5889_v20 = vadd.f32 %v7779_v29, %v5439_v47  ;;  %v7781_v1 = vld [vmem:[#allocation18_spill] sm:$0xff]  ;;  %v219_v59 = vld [vmem:[#allocation5 + $0x520] sm:$0xff] }
 0x1e3   :  { %7778 = vst [vmem:[#allocation69_spill] sm:$0xff] %v5882_v15  ;;  %3047 = vmatpush.msrb.mxu3 %v486_v9  ;;  %2979 = vmatpush.msrb.mxu0 %v395_v35  ;;  %v3448_v12 = vmul.f32 %v5868_v63, %v5868_v63  ;;  %v5897_v24 = vadd.f32 %v7781_v1, %v5415_v50  ;;  %v310_v23 = vld [vmem:[#allocation5 + $0x7f8] sm:$0xff]  ;;  %v220_v9 = vld [vmem:[#allocation5 + $0x528] sm:$0xff]  ;;  %v221_v35 = vld [vmem:[#allocation5 + $0x530] sm:$0xff] }
 0x1e4   :  { %7780 = vst [vmem:[#allocation15_spill] sm:$0xff] %v5889_v20  ;;  %3002 = vmatpush.msrb.mxu1 %v396_v31  ;;  %3025 = vmatpush.msrb.mxu2 %v397_v13  ;;  %v3709_v3 = vadd.f32 %v3708_v2, %v3532_v11  ;;  %v3533_v29 = vmul.f32 %v5877_v57, %v5877_v57  ;;  %v222_v31 = vld [vmem:[#allocation5 + $0x538] sm:$0xff]  ;;  %v131_v13 = vld [vmem:[#allocation5 + $0x260] sm:$0xff] }
 0x1e5   :  { %7782 = vst [vmem:[#allocation18_spill] sm:$0xff] %v5897_v24  ;;  %3048 = vmatpush.msrb.mxu3 %v398_v30  ;;  %2980 = vmatpush.msrb.mxu0 %v307_v25  ;;  %v3265_v6 = vadd.f32 %v3264_v44, %v5855_v5  ;;  %v3622_v26 = vadd.f32 %v3621_v18, %v3447_v32  ;;  %v7785_v25 = vld [vmem:[#allocation16_spill] sm:$0xff]  ;;  %v133_v18 = vld [vmem:[#allocation5 + $0x270] sm:$0xff] }
 0x1e6   :  { %v5904_v15 = vadd.f32 %v7783_v19, %v5415_v50  ;;  %3003 = vmatpush.msrb.mxu1 %v308_v36  ;;  %3026 = vmatpush.msrb.mxu2 %v309_v41  ;;  %v3354_v11 = vadd.f32 %v3353_v51, %v5877_v57  ;;  %v3534_v2 = vmul.f32 %v5889_v20, %v5889_v20  ;;  %v132_v44 = vld [vmem:[#allocation5 + $0x268] sm:$0xff]  ;;  %v5916_v41 = vpop.f32.mrf.mxu2  ;;  %v134_v51 = vld [vmem:[#allocation5 + $0x278] sm:$0xff] }
 0x1e7   :  { %v5911_v30 = vadd.f32 %v7785_v25, %v5439_v47  ;;  %3049 = vmatpush.msrb.mxu3 %v310_v23  ;;  %2981 = vmatpush.msrb.mxu0 %v219_v59  ;;  %v3266_v19 = vadd.f32 %v3265_v6, %v5868_v63  ;;  %v3623_v32 = vadd.f32 %v3622_v26, %v3448_v12  ;;  %v7787_v25 = vld [vmem:[#allocation21_spill] sm:$0xff]  ;;  %v7789_v12 = vld [vmem:[#allocation20_spill] sm:$0xff] }
 0x1e8   :  { %7784 = vst [vmem:[#allocation19_spill] sm:$0xff] %v5904_v15  ;;  %v3449_v36 = vmul.f32 %v5897_v24, %v5897_v24  ;;  %3004 = vmatpush.msrb.mxu1 %v220_v9  ;;  %3027 = vmatpush.msrb.mxu2 %v221_v35  ;;  %v3710_v1 = vadd.f32 %v3709_v3, %v3533_v29  ;;  %v5929_v59 = vpop.f32.mrf.mxu3  ;;  %v927_v3 = vld [vmem:[#allocation5 + $0x1b40] sm:$0x7]  ;;  %v928_v35 = vld [vmem:[#allocation5 + $0x1b48] sm:$0x7] }
 0x1e9   :  { %7786 = vst [vmem:[#allocation16_spill] sm:$0xff] %v5911_v30  ;;  %v3355_v57 = vadd.f32 %v3354_v11, %v5889_v20  ;;  %v5921_v23 = vadd.f32 %v7787_v25, %v5439_v47  ;;  %3050 = vmatpush.msrb.mxu3 %v222_v31  ;;  %2982 = vmatpush.msrb.mxu0 %v131_v13  ;;  %v929_v31 = vld [vmem:[#allocation5 + $0x1b50] sm:$0x7] }
 0x1ea   :  { %v3450_v26 = vmul.f32 %v5904_v15, %v5904_v15  ;;  %v5927_v6 = vadd.f32 %v7789_v12, %v5415_v50  ;;  %7791 = vst [vmem:[#allocation70_spill] sm:$0xff] %v5929_v59  ;;  %3005 = vmatpush.msrb.mxu1 %v132_v44  ;;  %3028 = vmatpush.msrb.mxu2 %v133_v18  ;;  %v5940_v44 = vpop.f32.mrf.mxu0  ;;  %v839_v18 = vld [vmem:[#allocation5 + $0x1880] sm:$0xff]  ;;  %v841_v12 = vld [vmem:[#allocation5 + $0x1890] sm:$0xff] }
 0x1eb   :  { %7788 = vst [vmem:[#allocation21_spill] sm:$0xff] %v5921_v23  ;;  %v3711_v29 = vadd.f32 %v3710_v1, %v3534_v2  ;;  %v3535_v9 = vmul.f32 %v5911_v30, %v5911_v30  ;;  %3051 = vmatpush.msrb.mxu3 %v134_v51  ;;  %4793 = vmatmul.msk.f32.vlgmr.msrb.gmra.mxu0 %vm947_vm1, %v5622_v34  ;;  %v930_v2 = vld [vmem:[#allocation5 + $0x1b58] sm:$0x7]  ;;  %v840_v1 = vld [vmem:[#allocation5 + $0x1888] sm:$0xff] }
 0x1ec   :  { %7790 = vst [vmem:[#allocation20_spill] sm:$0xff] %v5927_v6  ;;  %v3267_v13 = vadd.f32 %v3266_v19, %v5897_v24  ;;  %v3624_v11 = vadd.f32 %v3623_v32, %v3449_v36  ;;  %v5938_v25 = vadd.f32 %v5451_v56, %v5415_v50  ;;  %4796 = vmatmul.msk.f32.vlgmr.msrb.gmra.mxu1 %vm947_vm1, %v5622_v34  ;;  %v7793_v32 = vld [vmem:[#allocation22_spill] sm:$0xff]  ;;  %v5953_v56 = vpop.f32.mrf.mxu1 }
 0x1ed   :  { %4799 = vmatmul.msk.f32.vlgmr.msrb.gmra.mxu2 %vm947_vm1, %v5622_v34  ;;  %v3356_v51 = vadd.f32 %v3355_v57, %v5911_v30  ;;  %v3536_v19 = vmul.f32 %v5921_v23, %v5921_v23  ;;  %v5951_v36 = vadd.f32 %v7793_v32, %v5439_v47  ;;  %7795 = vst [vmem:[#allocation72_spill] sm:$0xff] %v5953_v56  ;;  %v842_v32 = vld [vmem:[#allocation5 + $0x1898] sm:$0xff]  ;;  %v751_v30 = vld [vmem:[#allocation5 + $0x15c0] sm:$0xff]  ;;  %v7796_v56 = vld [vmem:[#allocation25_spill] sm:$0xff] }
 0x1ee   :  { %7792 = vst [vmem:[#allocation71_spill] sm:$0xff] %v5938_v25  ;;  %4802 = vmatmul.msk.f32.vlgmr.msrb.gmra.mxu3 %vm947_vm1, %v5622_v34  ;;  %4804 = vmatpush.msk.msra.mxu0 %vm954_vm0, %v927_v3  ;;  %v3268_v20 = vadd.f32 %v3267_v13, %v5904_v15  ;;  %v3625_v24 = vadd.f32 %v3624_v11, %v3450_v26  ;;  %v752_v26 = vld [vmem:[#allocation5 + $0x15c8] sm:$0xff]  ;;  %v753_v13 = vld [vmem:[#allocation5 + $0x15d0] sm:$0xff] }
 0x1ef   :  { %7794 = vst [vmem:[#allocation22_spill] sm:$0xff] %v5951_v36  ;;  %v3451_v57 = vmul.f32 %v5927_v6, %v5927_v6  ;;  %4807 = vmatpush.msk.msra.mxu1 %vm954_vm0, %v928_v35  ;;  %4810 = vmatpush.msk.msra.mxu2 %vm954_vm0, %v929_v31  ;;  %v3712_v63 = vadd.f32 %v3711_v29, %v3535_v9  ;;  %v7798_v35 = vld [vmem:[#allocation28_spill] sm:$0xff]  ;;  %v754_v29 = vld [vmem:[#allocation5 + $0x15d8] sm:$0xff]  ;;  %v663_v9 = vld [vmem:[#allocation5 + $0x1300] sm:$0xff] }
 0x1f0   :  { %v3357_v5 = vadd.f32 %v3356_v51, %v5921_v23  ;;  %v5966_v3 = vadd.f32 %v7796_v56, %v5439_v47  ;;  %4813 = vmatpush.msk.msra.mxu3 %vm954_vm0, %v930_v2  ;;  %3066 = vmatpush.msra.mxu0 %v839_v18  ;;  %v3452_v11 = vmul.f32 %v5938_v25, %v5938_v25  ;;  %v664_v2 = vld [vmem:[#allocation5 + $0x1308] sm:$0xff]  ;;  %v665_v18 = vld [vmem:[#allocation5 + $0x1310] sm:$0xff] }
 0x1f1   :  { %v5973_v31 = vadd.f32 %v7798_v35, %v5415_v50  ;;  %3089 = vmatpush.msra.mxu1 %v840_v1  ;;  %3112 = vmatpush.msra.mxu2 %v841_v12  ;;  %v3713_v51 = vadd.f32 %v3712_v63, %v3536_v19  ;;  %v3537_v56 = vmul.f32 %v5951_v36, %v5951_v36  ;;  %v5982_v35 = vpop.f32.mrf.mxu2  ;;  %v666_v1 = vld [vmem:[#allocation5 + $0x1318] sm:$0xff] }
 0x1f2   :  { %7797 = vst [vmem:[#allocation25_spill] sm:$0xff] %v5966_v3  ;;  %3135 = vmatpush.msra.mxu3 %v842_v32  ;;  %3067 = vmatpush.msra.mxu0 %v751_v30  ;;  %v3269_v23 = vadd.f32 %v3268_v20, %v5927_v6  ;;  %v3626_v15 = vadd.f32 %v3625_v24, %v3451_v57  ;;  %v7800_v30 = vld [vmem:[#allocation27_spill] sm:$0xff]  ;;  %v5994_v57 = vpop.f32.mrf.mxu3  ;;  %v5996_v32 = vpop.f32.mrf.mxu0 }
 0x1f3   :  { %7799 = vst [vmem:[#allocation28_spill] sm:$0xff] %v5973_v31  ;;  %v5980_v59 = vadd.f32 %v5472_v54, %v5415_v50  ;;  %3090 = vmatpush.msra.mxu1 %v752_v26  ;;  %3113 = vmatpush.msra.mxu2 %v753_v13  ;;  %v3358_v63 = vadd.f32 %v3357_v5, %v5951_v36  ;;  %v575_v5 = vld [vmem:[#allocation5 + $0x1040] sm:$0xff] }
 0x1f4   :  { %v3538_v19 = vmul.f32 %v5966_v3, %v5966_v3  ;;  %v5989_v12 = vadd.f32 %v7800_v30, %v5439_v47  ;;  %3136 = vmatpush.msra.mxu3 %v754_v29  ;;  %3068 = vmatpush.msra.mxu0 %v663_v9  ;;  %v3270_v20 = vadd.f32 %v3269_v23, %v5938_v25  ;;  %v577_v23 = vld [vmem:[#allocation5 + $0x1050] sm:$0xff] }
 0x1f5   :  { %v3627_v54 = vadd.f32 %v3626_v15, %v3452_v11  ;;  %v3453_v24 = vmul.f32 %v5973_v31, %v5973_v31  ;;  %3091 = vmatpush.msra.mxu1 %v664_v2  ;;  %3114 = vmatpush.msra.mxu2 %v665_v18  ;;  %v3714_v26 = vadd.f32 %v3713_v51, %v3537_v56  ;;  %v576_v15 = vld [vmem:[#allocation5 + $0x1048] sm:$0xff]  ;;  %v487_v51 = vld [vmem:[#allocation5 + $0xd80] sm:$0xff]  ;;  %v6017_v18 = vpop.f32.mrf.mxu1 }
 0x1f6   :  { %7801 = vst [vmem:[#allocation27_spill] sm:$0xff] %v5989_v12  ;;  %v3359_v13 = vadd.f32 %v3358_v63, %v5966_v3  ;;  %v6001_v29 = vadd.f32 %v5495_v27, %v5439_v47  ;;  %3137 = vmatpush.msra.mxu3 %v666_v1  ;;  %4794 = vmatmul.msk.f32.gmra.mxu0 %vm947_vm1, %v5693_v16  ;;  %v578_v27 = vld [vmem:[#allocation5 + $0x1058] sm:$0xff]  ;;  %v489_v1 = vld [vmem:[#allocation5 + $0xd90] sm:$0xff] }
 0x1f7   :  { %v3454_v11 = vmul.f32 %v5980_v59, %v5980_v59  ;;  %v6009_v9 = vadd.f32 %v5488_v42, %v5415_v50  ;;  %4797 = vmatmul.msk.f32.gmra.mxu1 %vm947_vm1, %v5693_v16  ;;  %4800 = vmatmul.msk.f32.gmra.mxu2 %vm947_vm1, %v5693_v16  ;;  %v3715_v56 = vadd.f32 %v3714_v26, %v3538_v19  ;;  %v488_v42 = vld [vmem:[#allocation5 + $0xd88] sm:$0xff]  ;;  %v490_v19 = vld [vmem:[#allocation5 + $0xd98] sm:$0xff]  ;;  %v399_v26 = vld [vmem:[#allocation5 + $0xac0] sm:$0xff] }
 0x1f8   :  { %7802 = vst [vmem:[#allocation73_spill] sm:$0xff] %v6001_v29  ;;  %v3539_v2 = vmul.f32 %v5989_v12, %v5989_v12  ;;  %4803 = vmatmul.msk.f32.gmra.mxu3 %vm947_vm1, %v5693_v16  ;;  %3069 = vmatpush.msra.mxu0 %v575_v5  ;;  %v3271_v63 = vadd.f32 %v3270_v20, %v5973_v31  ;;  %v7803_v5 = vld [vmem:[#allocation35_spill] sm:$0xff]  ;;  %v400_v20 = vld [vmem:[#allocation5 + $0xac8] sm:$0xff] }
 0x1f9   :  { %v3628_v30 = vadd.f32 %v3627_v54, %v3453_v24  ;;  %v6024_v3 = vadd.f32 %v5541_v46, %v5415_v50  ;;  %3092 = vmatpush.msra.mxu1 %v576_v15  ;;  %3115 = vmatpush.msra.mxu2 %v577_v23  ;;  %v3360_v36 = vadd.f32 %v3359_v13, %v5989_v12  ;;  %v401_v54 = vld [vmem:[#allocation5 + $0xad0] sm:$0xff]  ;;  %v6036_v23 = vpop.f32.mrf.mxu2  ;;  %v402_v13 = vld [vmem:[#allocation5 + $0xad8] sm:$0xff]  ;;  %v311_v12 = vld [vmem:[#allocation5 + $0x800] sm:$0xff] }
 0x1fa   :  { %v3540_v25 = vmul.f32 %v6001_v29, %v6001_v29  ;;  %v6031_v6 = vadd.f32 %v7803_v5, %v5439_v47  ;;  %3138 = vmatpush.msra.mxu3 %v578_v27  ;;  %3070 = vmatpush.msra.mxu0 %v487_v51  ;;  %v3272_v46 = vadd.f32 %v3271_v63, %v5980_v59  ;;  %v312_v51 = vld [vmem:[#allocation5 + $0x808] sm:$0xff] }
 0x1fb   :  { %v3629_v24 = vadd.f32 %v3628_v30, %v3454_v11  ;;  %v3455_v15 = vmul.f32 %v6009_v9, %v6009_v9  ;;  %3093 = vmatpush.msra.mxu1 %v488_v42  ;;  %3116 = vmatpush.msra.mxu2 %v489_v1  ;;  %v3716_v31 = vadd.f32 %v3715_v56, %v3539_v2  ;;  %v313_v11 = vld [vmem:[#allocation5 + $0x810] sm:$0xff]  ;;  %v314_v56 = vld [vmem:[#allocation5 + $0x818] sm:$0xff]  ;;  %v223_v2 = vld [vmem:[#allocation5 + $0x540] sm:$0xff] }
 0x1fc   :  { %7804 = vst [vmem:[#allocation35_spill] sm:$0xff] %v6031_v6  ;;  %v3361_v5 = vadd.f32 %v3360_v36, %v6001_v29  ;;  %v6041_v27 = vadd.f32 %v5535_v21, %v5439_v47  ;;  %3139 = vmatpush.msra.mxu3 %v490_v19  ;;  %3071 = vmatpush.msra.mxu0 %v399_v26  ;;  %v224_v1 = vld [vmem:[#allocation5 + $0x548] sm:$0xff]  ;;  %v225_v30 = vld [vmem:[#allocation5 + $0x550] sm:$0xff] }
 0x1fd   :  { %v3456_v63 = vmul.f32 %v6024_v3, %v6024_v3  ;;  %v6047_v42 = vadd.f32 %v5549_v60, %v5415_v50  ;;  %3094 = vmatpush.msra.mxu1 %v400_v20  ;;  %3117 = vmatpush.msra.mxu2 %v401_v54  ;;  %v3717_v36 = vadd.f32 %v3716_v31, %v3540_v25  ;;  %v6056_v60 = vpop.f32.mrf.mxu3  ;;  %v6058_v20 = vpop.f32.mrf.mxu0  ;;  %v226_v25 = vld [vmem:[#allocation5 + $0x558] sm:$0xff]  ;;  %v135_v31 = vld [vmem:[#allocation5 + $0x280] sm:$0xff] }
 0x1fe   :  { %7805 = vst [vmem:[#allocation74_spill] sm:$0xff] %v6041_v27  ;;  %v3541_v21 = vmul.f32 %v6031_v6, %v6031_v6  ;;  %3140 = vmatpush.msra.mxu3 %v402_v13  ;;  %3072 = vmatpush.msra.mxu0 %v311_v12  ;;  %v3273_v19 = vadd.f32 %v3272_v46, %v6009_v9 }
 0x1ff   :  { %v3630_v26 = vadd.f32 %v3629_v24, %v3455_v15  ;;  %v6054_v29 = vadd.f32 %v5579_v58, %v5415_v50  ;;  %3095 = vmatpush.msra.mxu1 %v312_v51  ;;  %3118 = vmatpush.msra.mxu2 %v313_v11  ;;  %v3362_v54 = vadd.f32 %v3361_v5, %v6031_v6  ;;  %v136_v58 = vld [vmem:[#allocation5 + $0x288] sm:$0xff]  ;;  %v137_v24 = vld [vmem:[#allocation5 + $0x290] sm:$0xff]  ;;  %v138_v5 = vld [vmem:[#allocation5 + $0x298] sm:$0xff] }
 0x200   :  { %v3542_v12 = vmul.f32 %v6041_v27, %v6041_v27  ;;  %v6065_v46 = vadd.f32 %v5539_v48, %v5439_v47  ;;  %3141 = vmatpush.msra.mxu3 %v314_v56  ;;  %3073 = vmatpush.msra.mxu0 %v223_v2  ;;  %v3274_v15 = vadd.f32 %v3273_v19, %v6024_v3  ;;  %v6075_v56 = vpop.f32.mrf.mxu1 }
 0x201   :  { %7806 = vst [vmem:[#allocation75_spill] sm:$0xff] %v6054_v29  ;;  %v3631_v13 = vadd.f32 %v3630_v26, %v3456_v63  ;;  %v3457_v51 = vmul.f32 %v6047_v42, %v6047_v42  ;;  %3096 = vmatpush.msra.mxu1 %v224_v1  ;;  %3119 = vmatpush.msra.mxu2 %v225_v30  ;;  %v933_v30 = vld [vmem:[#allocation5 + $0x1b70] sm:$0x7] }
 0x202   :  { %7807 = vst [vmem:[#allocation76_spill] sm:$0xff] %v6065_v46  ;;  %v3718_v11 = vadd.f32 %v3717_v36, %v3541_v21  ;;  %v3363_v6 = vadd.f32 %v3362_v54, %v6041_v27  ;;  %v6073_v48 = vadd.f32 %v5601_v28, %v5439_v47  ;;  %3142 = vmatpush.msra.mxu3 %v226_v25  ;;  %v931_v36 = vld [vmem:[#allocation5 + $0x1b60] sm:$0x7]  ;;  %v932_v28 = vld [vmem:[#allocation5 + $0x1b68] sm:$0x7]  ;;  %v6092_v25 = vpop.f32.mrf.mxu2 }
 0x203   :  { %3074 = vmatpush.msra.mxu0 %v135_v31  ;;  %v3458_v63 = vmul.f32 %v6054_v29, %v6054_v29  ;;  %v6081_v2 = vadd.f32 %v5588_v61, %v5415_v50  ;;  %3097 = vmatpush.msra.mxu1 %v136_v58  ;;  %v3543_v1 = vmul.f32 %v6065_v46, %v6065_v46  ;;  %v934_v31 = vld [vmem:[#allocation5 + $0x1b78] sm:$0x7]  ;;  %v843_v54 = vld [vmem:[#allocation5 + $0x18a0] sm:$0xff] }
 0x204   :  { %7808 = vst [vmem:[#allocation77_spill] sm:$0xff] %v6073_v48  ;;  %3120 = vmatpush.msra.mxu2 %v137_v24  ;;  %v3719_v21 = vadd.f32 %v3718_v11, %v3542_v12  ;;  %3143 = vmatpush.msra.mxu3 %v138_v5  ;;  %v3275_v19 = vadd.f32 %v3274_v15, %v6047_v42  ;;  %v845_v15 = vld [vmem:[#allocation5 + $0x18b0] sm:$0xff]  ;;  %v755_v11 = vld [vmem:[#allocation5 + $0x15e0] sm:$0xff] }
 0x205   :  { %4805 = vmatmul.msk.f32.vlgmr.msra.gmra.mxu0 %vm947_vm1, %v5622_v34  ;;  %v3632_v26 = vadd.f32 %v3631_v13, %v3457_v51  ;;  %v6090_v61 = vadd.f32 %v5651_v7, %v5415_v50  ;;  %4808 = vmatmul.msk.f32.vlgmr.msra.gmra.mxu1 %vm947_vm1, %v5622_v34  ;;  %v3364_v12 = vadd.f32 %v3363_v6, %v6065_v46  ;;  %v844_v7 = vld [vmem:[#allocation5 + $0x18a8] sm:$0xff]  ;;  %v6111_v5 = vpop.f32.mrf.mxu0 }
 0x206   :  { %4811 = vmatmul.msk.f32.vlgmr.msra.gmra.mxu2 %vm947_vm1, %v5622_v34  ;;  %v3544_v58 = vmul.f32 %v6073_v48, %v6073_v48  ;;  %v6103_v24 = vadd.f32 %v5604_v62, %v5439_v47  ;;  %4814 = vmatmul.msk.f32.vlgmr.msra.gmra.mxu3 %vm947_vm1, %v5622_v34  ;;  %v3276_v13 = vadd.f32 %v3275_v19, %v6054_v29  ;;  %v846_v62 = vld [vmem:[#allocation5 + $0x18b8] sm:$0xff]  ;;  %v757_v19 = vld [vmem:[#allocation5 + $0x15f0] sm:$0xff] }
 0x207   :  { %4816 = vmatpush.msk.msrb.mxu0 %vm954_vm0, %v931_v36  ;;  %v3633_v51 = vadd.f32 %v3632_v26, %v3458_v63  ;;  %v3459_v6 = vmul.f32 %v6081_v2, %v6081_v2  ;;  %4819 = vmatpush.msk.msrb.mxu1 %vm954_vm0, %v932_v28  ;;  %v3720_v46 = vadd.f32 %v3719_v21, %v3543_v1  ;;  %v756_v63 = vld [vmem:[#allocation5 + $0x15e8] sm:$0xff]  ;;  %v758_v21 = vld [vmem:[#allocation5 + $0x15f8] sm:$0xff]  ;;  %v667_v1 = vld [vmem:[#allocation5 + $0x1320] sm:$0xff] }
 0x208   :  { %7809 = vst [vmem:[#allocation78_spill] sm:$0xff] %v6103_v24  ;;  %4822 = vmatpush.msk.msrb.mxu2 %vm954_vm0, %v933_v30  ;;  %v3365_v34 = vadd.f32 %v3364_v12, %v6073_v48  ;;  %v6118_v36 = vadd.f32 %v5631_v55, %v5439_v47  ;;  %4825 = vmatpush.msk.msrb.mxu3 %vm954_vm0, %v934_v31  ;;  %v6127_v30 = vpop.f32.mrf.mxu3  ;;  %v668_v12 = vld [vmem:[#allocation5 + $0x1328] sm:$0xff]  ;;  %v669_v48 = vld [vmem:[#allocation5 + $0x1330] sm:$0xff] }
 0x209   :  { %3158 = vmatpush.msrb.mxu0 %v843_v54  ;;  %v3460_v26 = vmul.f32 %v6090_v61, %v6090_v61  ;;  %v6125_v28 = vadd.f32 %v5660_v49, %v5415_v50  ;;  %3181 = vmatpush.msrb.mxu1 %v844_v7  ;;  %v3721_v55 = vadd.f32 %v3720_v46, %v3544_v58  ;;  %v6131_v54 = vpop.f32.mrf.mxu1  ;;  %v670_v7 = vld [vmem:[#allocation5 + $0x1338] sm:$0xff] }
 0x20a   :  { %7810 = vst [vmem:[#allocation79_spill] sm:$0xff] %v6118_v36  ;;  %3204 = vmatpush.msrb.mxu2 %v845_v15  ;;  %v3545_v31 = vmul.f32 %v6103_v24, %v6103_v24  ;;  %3227 = vmatpush.msrb.mxu3 %v846_v62  ;;  %v3277_v27 = vadd.f32 %v3276_v13, %v6081_v2  ;;  %v579_v62 = vld [vmem:[#allocation5 + $0x1060] sm:$0xff] }
 0x20b   :  { %3159 = vmatpush.msrb.mxu0 %v755_v11  ;;  %v3634_v49 = vadd.f32 %v3633_v51, %v3459_v6  ;;  %v6136_v29 = vadd.f32 %v5686_v53, %v5415_v50  ;;  %3182 = vmatpush.msrb.mxu1 %v756_v63  ;;  %v3366_v46 = vadd.f32 %v3365_v34, %v6103_v24  ;;  %v6148_v6 = vpop.f32.mrf.mxu2  ;;  %v581_v63 = vld [vmem:[#allocation5 + $0x1070] sm:$0xff] }
 0x20c   :  { %3205 = vmatpush.msrb.mxu2 %v757_v19  ;;  %v3546_v58 = vmul.f32 %v6118_v36, %v6118_v36  ;;  %v6143_v15 = vadd.f32 %v5649_v40, %v5439_v47  ;;  %3228 = vmatpush.msrb.mxu3 %v758_v21  ;;  %v3278_v13 = vadd.f32 %v3277_v27, %v6090_v61  ;;  %v580_v27 = vld [vmem:[#allocation5 + $0x1068] sm:$0xff] }
 0x20d   :  { %3160 = vmatpush.msrb.mxu0 %v667_v1  ;;  %v3635_v51 = vadd.f32 %v3634_v49, %v3460_v26  ;;  %v3461_v53 = vmul.f32 %v6125_v28, %v6125_v28  ;;  %3183 = vmatpush.msrb.mxu1 %v668_v12  ;;  %v3722_v11 = vadd.f32 %v3721_v55, %v3545_v31  ;;  %v491_v26 = vld [vmem:[#allocation5 + $0xda0] sm:$0xff]  ;;  %v492_v55 = vld [vmem:[#allocation5 + $0xda8] sm:$0xff]  ;;  %v493_v31 = vld [vmem:[#allocation5 + $0xdb0] sm:$0xff] }
 0x20e   :  { %7811 = vst [vmem:[#allocation80_spill] sm:$0xff] %v6143_v15  ;;  %3206 = vmatpush.msrb.mxu2 %v669_v48  ;;  %v3367_v34 = vadd.f32 %v3366_v46, %v6118_v36  ;;  %v6153_v40 = vadd.f32 %v5718_v37, %v5439_v47  ;;  %3229 = vmatpush.msrb.mxu3 %v670_v7  ;;  %v582_v37 = vld [vmem:[#allocation5 + $0x1078] sm:$0xff]  ;;  %v6178_v46 = vpop.f32.mrf.mxu0 }
 0x20f   :  { %4806 = vmatmul.msk.f32.gmra.mxu0 %vm947_vm1, %v5693_v16  ;;  %v3462_v19 = vmul.f32 %v6136_v29, %v6136_v29  ;;  %v6161_v48 = vadd.f32 %v5703_v22, %v5415_v50  ;;  %4809 = vmatmul.msk.f32.gmra.mxu1 %vm947_vm1, %v5693_v16  ;;  %v3723_v21 = vadd.f32 %v3722_v11, %v3546_v58  ;;  %v494_v58 = vld [vmem:[#allocation5 + $0xdb8] sm:$0xff]  ;;  %v403_v11 = vld [vmem:[#allocation5 + $0xae0] sm:$0xff] }
 0x210   :  { %7812 = vst [vmem:[#allocation81_spill] sm:$0xff] %v6153_v40  ;;  %4812 = vmatmul.msk.f32.gmra.mxu2 %vm947_vm1, %v5693_v16  ;;  %v3547_v1 = vmul.f32 %v6143_v15, %v6143_v15  ;;  %4815 = vmatmul.msk.f32.gmra.mxu3 %vm947_vm1, %v5693_v16  ;;  %v3279_v22 = vadd.f32 %v3278_v13, %v6125_v28  ;;  %v6176_v7 = vpop.f32.mrf.mxu3 }
 0x211   :  { %3161 = vmatpush.msrb.mxu0 %v579_v62  ;;  %v3636_v12 = vadd.f32 %v3635_v51, %v3461_v53  ;;  %v6174_v49 = vadd.f32 %v5764_v52, %v5415_v50  ;;  %3184 = vmatpush.msrb.mxu1 %v580_v27  ;;  %v3368_v16 = vadd.f32 %v3367_v34, %v6143_v15  ;;  %v404_v52 = vld [vmem:[#allocation5 + $0xae8] sm:$0xff]  ;;  %v405_v51 = vld [vmem:[#allocation5 + $0xaf0] sm:$0xff]  ;;  %v406_v34 = vld [vmem:[#allocation5 + $0xaf8] sm:$0xff] }
 0x212   :  { %3207 = vmatpush.msrb.mxu2 %v581_v63  ;;  %v3548_v62 = vmul.f32 %v6153_v40, %v6153_v40  ;;  %v6185_v13 = vadd.f32 %v5727_v0, %v5439_v47  ;;  %3230 = vmatpush.msrb.mxu3 %v582_v37  ;;  %v3280_v53 = vadd.f32 %v3279_v22, %v6136_v29  ;;  %v315_v63 = vld [vmem:[#allocation5 + $0x820] sm:$0xff]  ;;  %v6195_v37 = vpop.f32.mrf.mxu1 }
 0x213   :  { %3162 = vmatpush.msrb.mxu0 %v491_v26  ;;  %v3637_v36 = vadd.f32 %v3636_v12, %v3462_v19  ;;  %v3463_v27 = vmul.f32 %v6161_v48, %v6161_v48  ;;  %3185 = vmatpush.msrb.mxu1 %v492_v55  ;;  %v3724_v15 = vadd.f32 %v3723_v21, %v3547_v1  ;;  %v316_v26 = vld [vmem:[#allocation5 + $0x828] sm:$0xff]  ;;  %v317_v19 = vld [vmem:[#allocation5 + $0x830] sm:$0xff]  ;;  %v318_v21 = vld [vmem:[#allocation5 + $0x838] sm:$0xff] }
 0x214   :  { %7813 = vst [vmem:[#allocation82_spill] sm:$0xff] %v6185_v13  ;;  %3208 = vmatpush.msrb.mxu2 %v493_v31  ;;  %v3369_v24 = vadd.f32 %v3368_v16, %v6153_v40  ;;  %v6193_v0 = vadd.f32 %v5750_v43, %v5439_v47  ;;  %3231 = vmatpush.msrb.mxu3 %v494_v58  ;;  %v227_v1 = vld [vmem:[#allocation5 + $0x560] sm:$0xff]  ;;  %v228_v12 = vld [vmem:[#allocation5 + $0x568] sm:$0xff]  ;;  %v229_v58 = vld [vmem:[#allocation5 + $0x570] sm:$0xff] }
 0x215   :  { %3163 = vmatpush.msrb.mxu0 %v403_v11  ;;  %v3464_v22 = vmul.f32 %v6174_v49, %v6174_v49  ;;  %v6201_v55 = vadd.f32 %v5771_v8, %v5415_v50  ;;  %3186 = vmatpush.msrb.mxu1 %v404_v52  ;;  %v3725_v31 = vadd.f32 %v3724_v15, %v3548_v62  ;;  %v6210_v8 = vpop.f32.mrf.mxu2  ;;  %v230_v52 = vld [vmem:[#allocation5 + $0x578] sm:$0xff]  ;;  %v139_v15 = vld [vmem:[#allocation5 + $0x2a0] sm:$0xff] }
 0x216   :  { %7814 = vst [vmem:[#allocation83_spill] sm:$0xff] %v6193_v0  ;;  %3209 = vmatpush.msrb.mxu2 %v405_v51  ;;  %v3549_v43 = vmul.f32 %v6185_v13, %v6185_v13  ;;  %3232 = vmatpush.msrb.mxu3 %v406_v34  ;;  %v3281_v11 = vadd.f32 %v3280_v53, %v6161_v48 }
 0x217   :  { %3164 = vmatpush.msrb.mxu0 %v315_v63  ;;  %v3638_v16 = vadd.f32 %v3637_v36, %v3463_v27  ;;  %v6208_v40 = vadd.f32 %v5805_v4, %v5415_v50  ;;  %3187 = vmatpush.msrb.mxu1 %v316_v26  ;;  %v3370_v62 = vadd.f32 %v3369_v24, %v6185_v13  ;;  %v140_v36 = vld [vmem:[#allocation5 + $0x2a8] sm:$0xff]  ;;  %v141_v4 = vld [vmem:[#allocation5 + $0x2b0] sm:$0xff]  ;;  %v6222_v26 = vpop.f32.mrf.mxu0  ;;  %v142_v24 = vld [vmem:[#allocation5 + $0x2b8] sm:$0xff] }
 0x218   :  { %3210 = vmatpush.msrb.mxu2 %v317_v19  ;;  %v3550_v51 = vmul.f32 %v6193_v0, %v6193_v0  ;;  %v6217_v34 = vadd.f32 %v5762_v10, %v5439_v47  ;;  %3233 = vmatpush.msrb.mxu3 %v318_v21  ;;  %v3282_v53 = vadd.f32 %v3281_v11, %v6174_v49 }
 0x219   :  { %3165 = vmatpush.msrb.mxu0 %v227_v1  ;;  %v3639_v27 = vadd.f32 %v3638_v16, %v3464_v22  ;;  %v3465_v63 = vmul.f32 %v6201_v55, %v6201_v55  ;;  %3188 = vmatpush.msrb.mxu1 %v228_v12  ;;  %v3726_v19 = vadd.f32 %v3725_v31, %v3549_v43  ;;  %v6235_v1 = vpop.f32.mrf.mxu3 }
 0x21a   :  { %7815 = vst [vmem:[#allocation84_spill] sm:$0xff] %v6217_v34  ;;  %3211 = vmatpush.msrb.mxu2 %v229_v58  ;;  %v3371_v13 = vadd.f32 %v3370_v62, %v6193_v0  ;;  %v6227_v10 = vadd.f32 %v5830_v39, %v5439_v47  ;;  %3234 = vmatpush.msrb.mxu3 %v230_v52  ;;  %v6239_v12 = vpop.f32.mrf.mxu1  ;;  %v4849_v39 = vld [vmem:[#allocation2] sm:$0xff]  ;;  %v7818_v62 = vmov 0  }
 0x21b   :  { %3166 = vmatpush.msrb.mxu0 %v139_v15  ;;  %v3466_v22 = vmul.f32 %v6208_v40, %v6208_v40  ;;  %v6233_v21 = vadd.f32 %v5821_v33, %v5415_v50  ;;  %3189 = vmatpush.msrb.mxu1 %v140_v36  ;;  %v3727_v31 = vadd.f32 %v3726_v19, %v3550_v51 }
 0x21c   :  { %7816 = vst [vmem:[#allocation85_spill] sm:$0xff] %v6227_v10  ;;  %3212 = vmatpush.msrb.mxu2 %v141_v4  ;;  %v3551_v43 = vmul.f32 %v6217_v34, %v6217_v34  ;;  %3235 = vmatpush.msrb.mxu3 %v142_v24  ;;  %v3283_v58 = vadd.f32 %v3282_v53, %v6201_v55 }
 0x21d   :  { %4817 = vmatmul.msk.f32.vlgmr.msrb.gmra.mxu0 %vm947_vm1, %v4849_v39  ;;  %v3640_v11 = vadd.f32 %v3639_v27, %v3465_v63  ;;  %v6245_v33 = vadd.f32 %v5884_v17, %v5415_v50  ;;  %4820 = vmatmul.msk.f32.vlgmr.msrb.gmra.mxu1 %vm947_vm1, %v4849_v39  ;;  %v3372_v16 = vadd.f32 %v3371_v13, %v6217_v34  ;;  %v6261_v4 = vpop.f32.mrf.mxu2 }
 0x21e   :  { %4823 = vmatmul.msk.f32.vlgmr.msrb.gmra.mxu2 %vm947_vm1, %v4849_v39  ;;  %v3552_v52 = vmul.f32 %v6227_v10, %v6227_v10  ;;  %v6254_v15 = vadd.f32 %v5839_v38, %v5439_v47  ;;  %4826 = vmatmul.msk.f32.vlgmr.msrb.gmra.mxu3 %vm947_vm1, %v4849_v39  ;;  %v3284_v17 = vadd.f32 %v3283_v58, %v6208_v40 }
 0x21f   :  { %4838 = vset.pattern.permute.xlu2 %v7818_v62  ;;  %v3641_v51 = vadd.f32 %v3640_v11, %v3466_v22  ;;  %v3467_v36 = vmul.f32 %v6233_v21, %v6233_v21  ;;  %4837 = vset.pattern.permute.xlu1 %v7818_v62  ;;  %v3728_v13 = vadd.f32 %v3727_v31, %v3551_v43  ;;  %v6284_v39 = vpop.f32.mrf.mxu0  ;;  %v7820_v11 = vld [vmem:[#allocation69_spill] sm:$0xff] }
 0x220   :  { %7817 = vst [vmem:[#allocation86_spill] sm:$0xff] %v6254_v15  ;;  %v3373_v53 = vadd.f32 %v3372_v16, %v6227_v10  ;;  %v6267_v38 = vadd.f32 %v5870_v14, %v5439_v47  ;;  %v3468_v27 = vmul.f32 %v6245_v33, %v6245_v33  ;;  %v6273_v63 = vadd.f32 %v5891_v45, %v5415_v50 }
 0x221   :  { %v3729_v24 = vadd.f32 %v3728_v13, %v3552_v52  ;;  %v3553_v19 = vmul.f32 %v6254_v15, %v6254_v15  ;;  %v3285_v22 = vadd.f32 %v3284_v17, %v6233_v21  ;;  %v3642_v31 = vadd.f32 %v3641_v51, %v3467_v36  ;;  %v6282_v14 = vpop.f32.mrf.mxu3  ;;  %v4850_v52 = vld [vmem:[#allocation2 + $0x8] sm:$0xff] }
 0x222   :  { %7819 = vst [vmem:[#allocation87_spill] sm:$0xff] %v6267_v38  ;;  %v6280_v43 = vadd.f32 %v5916_v41, %v5415_v50  ;;  %v3374_v58 = vadd.f32 %v3373_v53, %v6254_v15  ;;  %v3554_v45 = vmul.f32 %v6267_v38, %v6267_v38  ;;  %v6291_v16 = vadd.f32 %v7820_v11, %v5439_v47  ;;  %v6303_v13 = vpop.f32.mrf.mxu1 }
 0x223   :  { %v3286_v62 = vadd.f32 %v3285_v22, %v6245_v33  ;;  %v3643_v41 = vadd.f32 %v3642_v31, %v3468_v27  ;;  %v3469_v17 = vmul.f32 %v6273_v63, %v6273_v63  ;;  %v3730_v51 = vadd.f32 %v3729_v24, %v3553_v19  ;;  %v7823_v22 = vld [vmem:[#allocation70_spill] sm:$0xff] }
 0x224   :  { %7821 = vst [vmem:[#allocation69_spill] sm:$0xff] %v6291_v16  ;;  %v6301_v36 = vadd.f32 %v5940_v44, %v5439_v47  ;;  %v3375_v53 = vadd.f32 %v3374_v58, %v6267_v38  ;;  %v3470_v27 = vmul.f32 %v6280_v43, %v6280_v43  ;;  %v6311_v31 = vadd.f32 %v7823_v22, %v5415_v50  ;;  %v7824_v38 = vld [vmem:[#allocation72_spill] sm:$0xff] }
 0x225   :  { %4818 = vmatmul.msk.f32.gmra.mxu0 %vm947_vm1, %v4850_v52  ;;  %4821 = vmatmul.msk.f32.gmra.mxu1 %vm947_vm1, %v4850_v52  ;;  %v3731_v11 = vadd.f32 %v3730_v51, %v3554_v45  ;;  %v3555_v24 = vmul.f32 %v6291_v16, %v6291_v16  ;;  %v3287_v44 = vadd.f32 %v3286_v62, %v6273_v63 }
 0x226   :  { %4824 = vmatmul.msk.f32.gmra.mxu2 %vm947_vm1, %v4850_v52  ;;  %7822 = vst [vmem:[#allocation88_spill] sm:$0xff] %v6301_v36  ;;  %4827 = vmatmul.msk.f32.gmra.mxu3 %vm947_vm1, %v4850_v52  ;;  %v3644_v19 = vadd.f32 %v3643_v41, %v3469_v17  ;;  %v6318_v15 = vadd.f32 %v5996_v32, %v5415_v50  ;;  %v6320_v52 = vpop.f32.mrf.mxu2 }
 0x227   :  { %v3556_v58 = vmul.f32 %v6301_v36, %v6301_v36  ;;  %v6326_v22 = vadd.f32 %v7824_v38, %v5439_v47  ;;  %v3376_v45 = vadd.f32 %v3375_v53, %v6291_v16  ;;  %v3288_v51 = vadd.f32 %v3287_v44, %v6280_v43  ;;  %v6332_v41 = vpop.f32.mrf.mxu0 }
 0x228   :  { %v3645_v10 = vadd.f32 %v3644_v19, %v3470_v27  ;;  %v3471_v62 = vmul.f32 %v6311_v31, %v6311_v31  ;;  %v3732_v32 = vadd.f32 %v3731_v11, %v3555_v24  ;;  %v6336_v17 = vadd.f32 %v5982_v35, %v5439_v47 }
 0x229   :  { %7825 = vst [vmem:[#allocation70_spill] sm:$0xff] %v6326_v22  ;;  %v3377_v34 = vadd.f32 %v3376_v45, %v6301_v36  ;;  %v3472_v38 = vmul.f32 %v6318_v15, %v6318_v15  ;;  %v6343_v53 = vadd.f32 %v6017_v18, %v5415_v50  ;;  %v6345_v27 = vpop.f32.mrf.mxu3  ;;  %v3557_v19 = vmul.f32 %v6326_v22, %v6326_v22 }
 0x22a   :  { %7826 = vst [vmem:[#allocation72_spill] sm:$0xff] %v6336_v17  ;;  %v3733_v44 = vadd.f32 %v3732_v32, %v3556_v58  ;;  %v6349_v11 = vpop.f32.mrf.mxu1  ;;  %v3289_v35 = vadd.f32 %v3288_v51, %v6311_v31  ;;  %v3646_v24 = vadd.f32 %v3645_v10, %v3471_v62  ;;  %v6354_v45 = vadd.f32 %v6036_v23, %v5415_v50 }
 0x22b   :  { %7827 = vst [vmem:[#allocation89_spill] sm:$0xff] %v6343_v53  ;;  %v3558_v36 = vmul.f32 %v6336_v17, %v6336_v17  ;;  %v6360_v18 = vadd.f32 %v5994_v57, %v5439_v47  ;;  %v3378_v58 = vadd.f32 %v3377_v34, %v6326_v22  ;;  %v3473_v51 = vmul.f32 %v6343_v53, %v6343_v53 }
 0x22c   :  { %v3290_v32 = vadd.f32 %v3289_v35, %v6318_v15  ;;  %v3647_v16 = vadd.f32 %v3646_v24, %v3472_v38  ;;  %v3734_v62 = vadd.f32 %v3733_v44, %v3557_v19  ;;  %v6370_v23 = vadd.f32 %v6058_v20, %v5439_v47 }
 0x22d   :  { %7828 = vst [vmem:[#allocation90_spill] sm:$0xff] %v6360_v18  ;;  %v3379_v0 = vadd.f32 %v3378_v58, %v6336_v17  ;;  %v3474_v57 = vmul.f32 %v6354_v45, %v6354_v45  ;;  %v6377_v34 = vadd.f32 %v6056_v60, %v5415_v50  ;;  %v3559_v35 = vmul.f32 %v6360_v18, %v6360_v18 }
 0x22e   :  { %v6366_v10 = vpop.f32.mrf.mxu2  ;;  %7829 = vst [vmem:[#allocation91_spill] sm:$0xff] %v6370_v23  ;;  %v3735_v38 = vadd.f32 %v3734_v62, %v3558_v36  ;;  %v3291_v24 = vadd.f32 %v3290_v32, %v6343_v53  ;;  %v3648_v44 = vadd.f32 %v3647_v16, %v3473_v51  ;;  %v6384_v20 = vadd.f32 %v6111_v5, %v5415_v50 }
 0x22f   :  { %v6388_v58 = vpop.f32.mrf.mxu0  ;;  %v3560_v17 = vmul.f32 %v6370_v23, %v6370_v23  ;;  %v3380_v60 = vadd.f32 %v3379_v0, %v6360_v18  ;;  %v3475_v32 = vmul.f32 %v6377_v34, %v6377_v34  ;;  %v6398_v5 = vadd.f32 %v6075_v56, %v5439_v47 }
 0x230   :  { %v3292_v36 = vadd.f32 %v3291_v24, %v6354_v45  ;;  %v3649_v62 = vadd.f32 %v3648_v44, %v3474_v57  ;;  %v3736_v16 = vadd.f32 %v3735_v38, %v3559_v35  ;;  %v6402_v51 = vadd.f32 %v6092_v25, %v5439_v47 }
 0x231   :  { %v6386_v19 = vpop.f32.mrf.mxu3  ;;  %7830 = vst [vmem:[#allocation92_spill] sm:$0xff] %v6398_v5  ;;  %v3381_v53 = vadd.f32 %v3380_v60, %v6370_v23  ;;  %v3476_v0 = vmul.f32 %v6384_v20, %v6384_v20  ;;  %v6412_v38 = vadd.f32 %v6131_v54, %v5415_v50  ;;  %v6416_v56 = vadd.f32 %v6148_v6, %v5415_v50 }
 0x232   :  { %7831 = vst [vmem:[#allocation93_spill] sm:$0xff] %v6402_v51  ;;  %v6404_v22 = vpop.f32.mrf.mxu1  ;;  %v3737_v57 = vadd.f32 %v3736_v16, %v3560_v17  ;;  %v3293_v24 = vadd.f32 %v3292_v36, %v6377_v34  ;;  %v3650_v44 = vadd.f32 %v3649_v62, %v3475_v32  ;;  %v3561_v35 = vmul.f32 %v6398_v5, %v6398_v5 }
 0x233   :  { %7832 = vst [vmem:[#allocation94_spill] sm:$0xff] %v6412_v38  ;;  %v3562_v60 = vmul.f32 %v6402_v51, %v6402_v51  ;;  %v3382_v17 = vadd.f32 %v3381_v53, %v6398_v5  ;;  %v6430_v6 = vadd.f32 %v6127_v30, %v5439_v47  ;;  %v6434_v16 = vadd.f32 %v6178_v46, %v5439_v47 }
 0x234   :  { %v3294_v36 = vadd.f32 %v3293_v24, %v6384_v20  ;;  %v3651_v62 = vadd.f32 %v3650_v44, %v3476_v0  ;;  %v3738_v54 = vadd.f32 %v3737_v57, %v3561_v35  ;;  %v3477_v18 = vmul.f32 %v6412_v38, %v6412_v38 }
 0x235   :  { %7833 = vst [vmem:[#allocation95_spill] sm:$0xff] %v6430_v6  ;;  %v3383_v23 = vadd.f32 %v3382_v17, %v6402_v51  ;;  %v3478_v53 = vmul.f32 %v6416_v56, %v6416_v56  ;;  %v6448_v46 = vadd.f32 %v6176_v7, %v5415_v50  ;;  %v6452_v35 = vadd.f32 %v6222_v26, %v5415_v50 }
 0x236   :  { %v6418_v25 = vpop.f32.mrf.mxu2  ;;  %7834 = vst [vmem:[#allocation96_spill] sm:$0xff] %v6434_v16  ;;  %v3739_v24 = vadd.f32 %v3738_v54, %v3562_v60  ;;  %v3295_v30 = vadd.f32 %v3294_v36, %v6412_v38  ;;  %v3652_v44 = vadd.f32 %v3651_v62, %v3477_v18  ;;  %v3563_v17 = vmul.f32 %v6430_v6, %v6430_v6 }
 0x237   :  { %v6426_v32 = vpop.f32.mrf.mxu0  ;;  %7835 = vst [vmem:[#allocation97_spill] sm:$0xff] %v6448_v46  ;;  %v3564_v51 = vmul.f32 %v6434_v16, %v6434_v16  ;;  %v3384_v60 = vadd.f32 %v3383_v23, %v6430_v6  ;;  %v6464_v7 = vadd.f32 %v6195_v37, %v5439_v47  ;;  %v6468_v26 = vadd.f32 %v6210_v8, %v5439_v47 }
 0x238   :  { %v3296_v54 = vadd.f32 %v3295_v30, %v6416_v56  ;;  %v3653_v36 = vadd.f32 %v3652_v44, %v3478_v53  ;;  %v3740_v62 = vadd.f32 %v3739_v24, %v3563_v17  ;;  %v3479_v5 = vmul.f32 %v6448_v46, %v6448_v46 }
 0x239   :  { %v6441_v0 = vpop.f32.mrf.mxu3  ;;  %7836 = vst [vmem:[#allocation98_spill] sm:$0xff] %v6464_v7  ;;  %v3385_v38 = vadd.f32 %v3384_v60, %v6434_v16  ;;  %v3480_v23 = vmul.f32 %v6452_v35, %v6452_v35  ;;  %v6478_v37 = vadd.f32 %v6239_v12, %v5415_v50  ;;  %v6482_v8 = vadd.f32 %v6261_v4, %v5415_v50 }
 0x23a   :  { %v6443_v57 = vpop.f32.mrf.mxu1  ;;  %7837 = vst [vmem:[#allocation99_spill] sm:$0xff] %v6468_v26  ;;  %v3741_v53 = vadd.f32 %v3740_v62, %v3564_v51  ;;  %v3297_v30 = vadd.f32 %v3296_v54, %v6448_v46  ;;  %v3654_v24 = vadd.f32 %v3653_v36, %v3479_v5  ;;  %v3565_v60 = vmul.f32 %v6464_v7, %v6464_v7 }
 0x23b   :  { %v3566_v51 = vmul.f32 %v6468_v26, %v6468_v26  ;;  %v3386_v5 = vadd.f32 %v3385_v38, %v6464_v7  ;;  %v6496_v4 = vadd.f32 %v6235_v1, %v5439_v47  ;;  %v6500_v62 = vadd.f32 %v6284_v39, %v5439_v47 }
 0x23c   :  { %v3298_v54 = vadd.f32 %v3297_v30, %v6452_v35  ;;  %v3655_v12 = vadd.f32 %v3654_v24, %v3480_v23  ;;  %v3742_v36 = vadd.f32 %v3741_v53, %v3565_v60  ;;  %v3481_v46 = vmul.f32 %v6478_v37, %v6478_v37 }
 0x23d   :  { %7838 = vst [vmem:[#allocation100_spill] sm:$0xff] %v6496_v4  ;;  %v3387_v6 = vadd.f32 %v3386_v5, %v6468_v26  ;;  %v3482_v38 = vmul.f32 %v6482_v8, %v6482_v8  ;;  %v6512_v1 = vadd.f32 %v6282_v14, %v5415_v50  ;;  %v6516_v39 = vadd.f32 %v6332_v41, %v5415_v50 }
 0x23e   :  { %v6460_v18 = vpop.f32.mrf.mxu2  ;;  %7839 = vst [vmem:[#allocation101_spill] sm:$0xff] %v6500_v62  ;;  %v3743_v23 = vadd.f32 %v3742_v36, %v3566_v51  ;;  %v3299_v53 = vadd.f32 %v3298_v54, %v6478_v37  ;;  %v3656_v30 = vadd.f32 %v3655_v12, %v3481_v46  ;;  %v3567_v60 = vmul.f32 %v6496_v4, %v6496_v4 }
 0x23f   :  { %v6486_v17 = vpop.f32.mrf.mxu0  ;;  %7840 = vst [vmem:[#allocation102_spill] sm:$0xff] %v6512_v1  ;;  %v3568_v5 = vmul.f32 %v6500_v62, %v6500_v62  ;;  %v3388_v51 = vadd.f32 %v3387_v6, %v6496_v4  ;;  %v6530_v41 = vadd.f32 %v6303_v13, %v5439_v47  ;;  %v6534_v36 = vadd.f32 %v6320_v52, %v5439_v47 }
 0x240   :  { %v3300_v46 = vadd.f32 %v3299_v53, %v6482_v8  ;;  %v3657_v54 = vadd.f32 %v3656_v30, %v3482_v38  ;;  %v3744_v14 = vadd.f32 %v3743_v23, %v3567_v60  ;;  %v3483_v26 = vmul.f32 %v6512_v1, %v6512_v1 }
 0x241   :  { %v6484_v44 = vpop.f32.mrf.mxu3  ;;  %7841 = vst [vmem:[#allocation103_spill] sm:$0xff] %v6530_v41  ;;  %v3389_v7 = vadd.f32 %v3388_v51, %v6500_v62  ;;  %v3484_v6 = vmul.f32 %v6516_v39, %v6516_v39  ;;  %v6548_v52 = vadd.f32 %v6349_v11, %v5415_v50  ;;  %v6552_v60 = vadd.f32 %v6366_v10, %v5415_v50 }
 0x242   :  { %v6502_v16 = vpop.f32.mrf.mxu1  ;;  %7842 = vst [vmem:[#allocation104_spill] sm:$0xff] %v6534_v36  ;;  %v3745_v53 = vadd.f32 %v3744_v14, %v3568_v5  ;;  %v3301_v13 = vadd.f32 %v3300_v46, %v6512_v1  ;;  %v3658_v30 = vadd.f32 %v3657_v54, %v3483_v26  ;;  %v3569_v51 = vmul.f32 %v6530_v41, %v6530_v41 }
 0x243   :  { %7843 = vst [vmem:[#allocation105_spill] sm:$0xff] %v6548_v52  ;;  %v3570_v62 = vmul.f32 %v6534_v36, %v6534_v36  ;;  %v3390_v5 = vadd.f32 %v3389_v7, %v6530_v41  ;;  %v6564_v11 = vadd.f32 %v6345_v27, %v5439_v47  ;;  %v6568_v10 = vadd.f32 %v6388_v58, %v5439_v47 }
 0x244   :  { %v3302_v14 = vadd.f32 %v3301_v13, %v6516_v39  ;;  %v3659_v46 = vadd.f32 %v3658_v30, %v3484_v6  ;;  %v3746_v54 = vadd.f32 %v3745_v53, %v3569_v51  ;;  %v3485_v1 = vmul.f32 %v6548_v52, %v6548_v52 }
 0x245   :  { %7844 = vst [vmem:[#allocation106_spill] sm:$0xff] %v6564_v11  ;;  %v3391_v4 = vadd.f32 %v3390_v5, %v6534_v36  ;;  %v3486_v7 = vmul.f32 %v6552_v60, %v6552_v60  ;;  %v6578_v27 = vadd.f32 %v6386_v19, %v5415_v50  ;;  %v6582_v58 = vadd.f32 %v6426_v32, %v5415_v50 }
 0x246   :  { %v6518_v24 = vpop.f32.mrf.mxu2  ;;  %7845 = vst [vmem:[#allocation107_spill] sm:$0xff] %v6568_v10  ;;  %v3747_v6 = vadd.f32 %v3746_v54, %v3570_v62  ;;  %v3303_v13 = vadd.f32 %v3302_v14, %v6548_v52  ;;  %v3660_v53 = vadd.f32 %v3659_v46, %v3485_v1  ;;  %v3571_v5 = vmul.f32 %v6564_v11, %v6564_v11 }
 0x247   :  { %v6526_v12 = vpop.f32.mrf.mxu0  ;;  %v3572_v62 = vmul.f32 %v6568_v10, %v6568_v10  ;;  %v3392_v1 = vadd.f32 %v3391_v4, %v6564_v11  ;;  %v6596_v32 = vadd.f32 %v6404_v22, %v5439_v47  ;;  %v6600_v54 = vadd.f32 %v6418_v25, %v5439_v47 }
 0x248   :  { %v3304_v14 = vadd.f32 %v3303_v13, %v6552_v60  ;;  %v3661_v19 = vadd.f32 %v3660_v53, %v3486_v7  ;;  %v3748_v46 = vadd.f32 %v3747_v6, %v3571_v5  ;;  %v3487_v41 = vmul.f32 %v6578_v27, %v6578_v27 }
 0x249   :  { %v6541_v38 = vpop.f32.mrf.mxu3  ;;  %7846 = vst [vmem:[#allocation108_spill] sm:$0xff] %v6596_v32  ;;  %v3393_v52 = vadd.f32 %v3392_v1, %v6568_v10  ;;  %v3488_v4 = vmul.f32 %v6582_v58, %v6582_v58  ;;  %v6612_v22 = vadd.f32 %v6443_v57, %v5415_v50  ;;  %v6616_v25 = vadd.f32 %v6460_v18, %v5415_v50 }
 0x24a   :  { %v6543_v23 = vpop.f32.mrf.mxu1  ;;  %7847 = vst [vmem:[#allocation109_spill] sm:$0xff] %v6600_v54  ;;  %v3749_v7 = vadd.f32 %v3748_v46, %v3572_v62  ;;  %v3305_v6 = vadd.f32 %v3304_v14, %v6578_v27  ;;  %v3662_v13 = vadd.f32 %v3661_v19, %v3487_v41  ;;  %v3573_v5 = vmul.f32 %v6596_v32, %v6596_v32 }
 0x24b   :  { %7848 = vst [vmem:[#allocation110_spill] sm:$0xff] %v6612_v22  ;;  %v3574_v1 = vmul.f32 %v6600_v54, %v6600_v54  ;;  %v3394_v62 = vadd.f32 %v3393_v52, %v6596_v32  ;;  %v6628_v46 = vadd.f32 %v6441_v0, %v5439_v47  ;;  %v6632_v18 = vadd.f32 %v6486_v17, %v5439_v47 }
 0x24c   :  { %v3306_v41 = vadd.f32 %v3305_v6, %v6582_v58  ;;  %v3663_v14 = vadd.f32 %v3662_v13, %v3488_v4  ;;  %v3750_v57 = vadd.f32 %v3749_v7, %v3573_v5  ;;  %v3489_v11 = vmul.f32 %v6612_v22, %v6612_v22 }
 0x24d   :  { %7849 = vst [vmem:[#allocation111_spill] sm:$0xff] %v6628_v46  ;;  %v3395_v10 = vadd.f32 %v3394_v62, %v6600_v54  ;;  %v3490_v52 = vmul.f32 %v6616_v25, %v6616_v25  ;;  %v6644_v5 = vadd.f32 %v6484_v44, %v5415_v50  ;;  %v6648_v17 = vadd.f32 %v6526_v12, %v5415_v50 }
 0x24e   :  { %v6560_v26 = vpop.f32.mrf.mxu2  ;;  %7850 = vst [vmem:[#allocation112_spill] sm:$0xff] %v6632_v18  ;;  %v3751_v4 = vadd.f32 %v3750_v57, %v3574_v1  ;;  %v3307_v13 = vadd.f32 %v3306_v41, %v6612_v22  ;;  %v3664_v0 = vadd.f32 %v3663_v14, %v3489_v11  ;;  %v3575_v62 = vmul.f32 %v6628_v46, %v6628_v46 }
 0x24f   :  { %v6586_v51 = vpop.f32.mrf.mxu0  ;;  %7851 = vst [vmem:[#allocation113_spill] sm:$0xff] %v6644_v5  ;;  %v3576_v54 = vmul.f32 %v6632_v18, %v6632_v18  ;;  %v3396_v1 = vadd.f32 %v3395_v10, %v6628_v46  ;;  %v6658_v44 = vadd.f32 %v6502_v16, %v5439_v47  ;;  %v6662_v12 = vadd.f32 %v6518_v24, %v5439_v47 }
 0x250   :  { %v3308_v57 = vadd.f32 %v3307_v13, %v6616_v25  ;;  %v3665_v41 = vadd.f32 %v3664_v0, %v3490_v52  ;;  %v3752_v14 = vadd.f32 %v3751_v4, %v3575_v62  ;;  %v3491_v32 = vmul.f32 %v6644_v5, %v6644_v5 }
 0x251   :  { %v6584_v30 = vpop.f32.mrf.mxu3  ;;  %7852 = vst [vmem:[#allocation114_spill] sm:$0xff] %v6658_v44  ;;  %v3397_v22 = vadd.f32 %v3396_v1, %v6632_v18  ;;  %v3492_v10 = vmul.f32 %v6648_v17, %v6648_v17  ;;  %v6672_v16 = vadd.f32 %v6543_v23, %v5415_v50  ;;  %v6676_v24 = vadd.f32 %v6560_v26, %v5415_v50 }
 0x252   :  { %v6602_v36 = vpop.f32.mrf.mxu1  ;;  %7853 = vst [vmem:[#allocation115_spill] sm:$0xff] %v6662_v12  ;;  %v3753_v13 = vadd.f32 %v3752_v14, %v3576_v54  ;;  %v3309_v52 = vadd.f32 %v3308_v57, %v6644_v5  ;;  %v3666_v4 = vadd.f32 %v3665_v41, %v3491_v32  ;;  %v3577_v1 = vmul.f32 %v6658_v44, %v6658_v44 }
 0x253   :  { %7854 = vst [vmem:[#allocation116_spill] sm:$0xff] %v6676_v24  ;;  %v3578_v46 = vmul.f32 %v6662_v12, %v6662_v12  ;;  %v3398_v54 = vadd.f32 %v3397_v22, %v6658_v44  ;;  %v6686_v23 = vadd.f32 %v6541_v38, %v5439_v47  ;;  %v6690_v26 = vadd.f32 %v6586_v51, %v5439_v47 }
 0x254   :  { %v3310_v32 = vadd.f32 %v3309_v52, %v6648_v17  ;;  %v3667_v57 = vadd.f32 %v3666_v4, %v3492_v10  ;;  %v3754_v41 = vadd.f32 %v3753_v13, %v3577_v1  ;;  %v3493_v5 = vmul.f32 %v6672_v16, %v6672_v16 }
 0x255   :  { %7855 = vst [vmem:[#allocation117_spill] sm:$0xff] %v6686_v23  ;;  %v3399_v18 = vadd.f32 %v3398_v54, %v6662_v12  ;;  %v3494_v22 = vmul.f32 %v6676_v24, %v6676_v24  ;;  %v6700_v38 = vadd.f32 %v6584_v30, %v5415_v50  ;;  %v3579_v1 = vmul.f32 %v6686_v23, %v6686_v23 }
 0x256   :  { %v6618_v53 = vpop.f32.mrf.mxu2  ;;  %7856 = vst [vmem:[#allocation118_spill] sm:$0xff] %v6690_v26  ;;  %v3755_v52 = vadd.f32 %v3754_v41, %v3578_v46  ;;  %v3311_v10 = vadd.f32 %v3310_v32, %v6672_v16  ;;  %v3668_v13 = vadd.f32 %v3667_v57, %v3493_v5  ;;  %v3580_v54 = vmul.f32 %v6690_v26, %v6690_v26 }
 0x257   :  { %v2892_v19 = vpop.f32.mrf.mxu0  ;;  %v3400_v12 = vadd.f32 %v3399_v18, %v6686_v23  ;;  %v6713_v30 = vadd.f32 %v6602_v36, %v5439_v47  ;;  %v3495_v41 = vmul.f32 %v6700_v38, %v6700_v38 }
 0x258   :  { %v6703_v51 = vadd.f32 %v2892_v19, %v5415_v50  ;;  %v3312_v46 = vadd.f32 %v3311_v10, %v6676_v24  ;;  %v3669_v32 = vadd.f32 %v3668_v13, %v3494_v22  ;;  %v3756_v57 = vadd.f32 %v3755_v52, %v3579_v1 }
 0x259   :  { %v6639_v6 = vpop.f32.mrf.mxu3  ;;  %7858 = vst [vmem:[#allocation120_spill] sm:$0xff] %v6713_v30  ;;  %v6717_v19 = vadd.f32 %v6618_v53, %v5439_v47  ;;  %v3401_v44 = vadd.f32 %v3400_v12, %v6690_v26  ;;  %v3581_v23 = vmul.f32 %v6713_v30, %v6713_v30 }
 0x25a   :  { %v2915_v7 = vpop.f32.mrf.mxu1  ;;  %7857 = vst [vmem:[#allocation119_spill] sm:$0xff] %v6703_v51  ;;  %v3496_v18 = vmul.f32 %v6703_v51, %v6703_v51  ;;  %v3757_v22 = vadd.f32 %v3756_v57, %v3580_v54  ;;  %v3313_v52 = vadd.f32 %v3312_v46, %v6700_v38  ;;  %v3670_v1 = vadd.f32 %v3669_v32, %v3495_v41 }
 0x25b   :  { %7859 = vst [vmem:[#allocation121_spill] sm:$0xff] %v6717_v19  ;;  %v6726_v36 = vadd.f32 %v2915_v7, %v5415_v50  ;;  %v3582_v12 = vmul.f32 %v6717_v19, %v6717_v19  ;;  %v3402_v26 = vadd.f32 %v3401_v44, %v6713_v30  ;;  %v6739_v7 = vadd.f32 %v6639_v6, %v5439_v47 }
 0x25c   :  { %v3314_v54 = vadd.f32 %v3313_v52, %v6703_v51  ;;  %v3671_v57 = vadd.f32 %v3670_v1, %v3496_v18  ;;  %v3758_v46 = vadd.f32 %v3757_v22, %v3581_v23 }
 0x25d   :  { %7860 = vst [vmem:[#allocation122_spill] sm:$0xff] %v6726_v36  ;;  %v3403_v32 = vadd.f32 %v3402_v26, %v6717_v19  ;;  %v3497_v41 = vmul.f32 %v6726_v36, %v6726_v36 }
 0x25e   :  { %v2938_v11 = vpop.f32.mrf.mxu2  ;;  %7861 = vst [vmem:[#allocation123_spill] sm:$0xff] %v6739_v7  ;;  %v3759_v30 = vadd.f32 %v3758_v46, %v3582_v12  ;;  %v3315_v18 = vadd.f32 %v3314_v54, %v6726_v36 }
 0x25f   :  { %v2895_v62 = vpop.f32.mrf.mxu0  ;;  %v6729_v53 = vadd.f32 %v2938_v11, %v5415_v50  ;;  %v3672_v52 = vadd.f32 %v3671_v57, %v3497_v41  ;;  %v3404_v19 = vadd.f32 %v3403_v32, %v6739_v7 }
 0x260   :  { %v6742_v11 = vadd.f32 %v2895_v62, %v5439_v47  ;;  %v3583_v62 = vmul.f32 %v6739_v7, %v6739_v7 }
 0x261   :  { %v2961_v0 = vpop.f32.mrf.mxu3  ;;  %v3498_v44 = vmul.f32 %v6729_v53, %v6729_v53  ;;  %v3316_v12 = vadd.f32 %v3315_v18, %v6729_v53 }
 0x262   :  { %v2918_v14 = vpop.f32.mrf.mxu1  ;;  %7862 = vst [vmem:[#allocation124_spill] sm:$0xff] %v6742_v11  ;;  %v6751_v23 = vadd.f32 %v2961_v0, %v5415_v50  ;;  %v3584_v26 = vmul.f32 %v6742_v11, %v6742_v11  ;;  %v3760_v57 = vadd.f32 %v3759_v30, %v3583_v62  ;;  %v3405_v51 = vadd.f32 %v3404_v19, %v6742_v11 }
 0x263   :  { %v3673_v54 = vadd.f32 %v3672_v52, %v3498_v44  ;;  %v6763_v0 = vadd.f32 %v2918_v14, %v5439_v47 }
 0x264   :  { %7863 = vst [vmem:[#allocation125_spill] sm:$0xff] %v6751_v23  ;;  %v3499_v36 = vmul.f32 %v6751_v23, %v6751_v23  ;;  %v3317_v18 = vadd.f32 %v3316_v12, %v6751_v23 }
 0x265   :  { %7864 = vst [vmem:[#allocation126_spill] sm:$0xff] %v6763_v0  ;;  %v3585_v14 = vmul.f32 %v6763_v0, %v6763_v0  ;;  %v3406_v19 = vadd.f32 %v3405_v51, %v6763_v0 }
 0x266   :  { %v2941_v4 = vpop.f32.mrf.mxu2  ;;  %v3674_v44 = vadd.f32 %v3673_v54, %v3499_v36 }
 0x267   :  { %v6766_v46 = vadd.f32 %v2941_v4, %v5439_v47 }
 0x268   :  { %v2984_v5 = vpop.f32.mrf.mxu0 }
 0x269   :  { %v2964_v10 = vpop.f32.mrf.mxu3  ;;  %v6758_v1 = vadd.f32 %v2984_v5, %v5415_v50  ;;  %7865 = vst [vmem:[#allocation127_spill] sm:$0xff] %v6766_v46  ;;  %v3761_v5 = vadd.f32 %v3760_v57, %v3584_v26  ;;  %v3586_v4 = vmul.f32 %v6766_v46, %v6766_v46  ;;  %v3407_v7 = vadd.f32 %v3406_v19, %v6766_v46 }
 0x26a   :  { %v3007_v13 = vpop.f32.mrf.mxu1  ;;  %v6787_v36 = vadd.f32 %v2964_v10, %v5439_v47 }
 0x26b   :  { %v3500_v32 = vmul.f32 %v6758_v1, %v6758_v1  ;;  %v6779_v52 = vadd.f32 %v3007_v13, %v5415_v50  ;;  %v3318_v26 = vadd.f32 %v3317_v18, %v6758_v1  ;;  %v3762_v12 = vadd.f32 %v3761_v5, %v3585_v14 }
 0x26c   :  { %7867 = vst [vmem:[#allocation129_spill] sm:$0xff] %v6787_v36  ;;  %v3587_v10 = vmul.f32 %v6787_v36, %v6787_v36  ;;  %v3408_v14 = vadd.f32 %v3407_v7, %v6787_v36 }
 0x26d   :  { %v3675_v54 = vadd.f32 %v3674_v44, %v3500_v32  ;;  %v3763_v23 = vadd.f32 %v3762_v12, %v3586_v4  ;;  %v3319_v5 = vadd.f32 %v3318_v26, %v6779_v52 }
 0x26f   :  { %v3764_v46 = vadd.f32 %v3763_v23, %v3587_v10 }
 0x270   :  { %v3030_v24 = vpop.f32.mrf.mxu2 }
 0x271   :  { %v3053_v6 = vpop.f32.mrf.mxu3  ;;  %v6782_v62 = vadd.f32 %v3030_v24, %v5415_v50  ;;  %v3501_v24 = vmul.f32 %v6779_v52, %v6779_v52 }
 0x273   :  { %v2987_v22 = vpop.f32.mrf.mxu0  ;;  %7866 = vst [vmem:[#allocation128_spill] sm:$0xff] %v6782_v62  ;;  %v3502_v51 = vmul.f32 %v6782_v62, %v6782_v62  ;;  %v3676_v32 = vadd.f32 %v3675_v54, %v3501_v24  ;;  %v3320_v4 = vadd.f32 %v3319_v5, %v6782_v62 }
 0x274   :  { %v3010_v41 = vpop.f32.mrf.mxu1  ;;  %v6790_v11 = vadd.f32 %v2987_v22, %v5439_v47  ;;  %v6801_v22 = vadd.f32 %v3053_v6, %v5415_v50 }
 0x275   :  { %v3677_v26 = vadd.f32 %v3676_v32, %v3502_v51  ;;  %v6811_v0 = vadd.f32 %v3010_v41, %v5439_v47 }
 0x276   :  { %7868 = vst [vmem:[#allocation130_spill] sm:$0xff] %v6790_v11  ;;  %v3588_v44 = vmul.f32 %v6790_v11, %v6790_v11  ;;  %v3409_v6 = vadd.f32 %v3408_v14, %v6790_v11  ;;  %v3503_v24 = vmul.f32 %v6801_v22, %v6801_v22  ;;  %v3321_v5 = vadd.f32 %v3320_v4, %v6801_v22 }
 0x277   :  { %7869 = vst [vmem:[#allocation131_spill] sm:$0xff] %v6801_v22  ;;  %v3589_v41 = vmul.f32 %v6811_v0, %v6811_v0 }
 0x278   :  { %7871 = vst [vmem:[#allocation133_spill] sm:$0xff] %v6811_v0  ;;  %v3765_v7 = vadd.f32 %v3764_v46, %v3588_v44  ;;  %v3678_v51 = vadd.f32 %v3677_v26, %v3503_v24  ;;  %v3410_v10 = vadd.f32 %v3409_v6, %v6811_v0 }
 0x27a   :  { %v3033_v30 = vpop.f32.mrf.mxu2  ;;  %v3766_v14 = vadd.f32 %v3765_v7, %v3589_v41 }
 0x27b   :  { %v3056_v13 = vpop.f32.mrf.mxu3  ;;  %v6814_v54 = vadd.f32 %v3033_v30, %v5439_v47 }
 0x27c   :  { %v6835_v4 = vadd.f32 %v3056_v13, %v5439_v47 }
 0x27d   :  { %7872 = vst [vmem:[#allocation134_spill] sm:$0xff] %v6814_v54  ;;  %v3590_v30 = vmul.f32 %v6814_v54, %v6814_v54  ;;  %v3411_v11 = vadd.f32 %v3410_v10, %v6814_v54 }
 0x27e   :  { %7874 = vst [vmem:[#allocation136_spill] sm:$0xff] %v6835_v4  ;;  %v3591_v13 = vmul.f32 %v6835_v4, %v6835_v4 }
 0x27f   :  { %v3767_v6 = vadd.f32 %v3766_v14, %v3590_v30  ;;  %v3412_v41 = vadd.f32 %v3411_v11, %v6835_v4 }
 0x281   :  { %v3768_v30 = vadd.f32 %v3767_v6, %v3591_v13 }
 0x282   :  { %v3076_v57 = vpop.f32.mrf.mxu0  ;;  %v3099_v18 = vpop.f32.mrf.mxu1 }
 0x283   :  { %v6808_v19 = vadd.f32 %v3076_v57, %v5415_v50  ;;  %v6829_v46 = vadd.f32 %v3099_v18, %v5415_v50 }
 0x285   :  { %7870 = vst [vmem:[#allocation132_spill] sm:$0xff] %v6808_v19  ;;  %v3504_v57 = vmul.f32 %v6808_v19, %v6808_v19  ;;  %v3322_v32 = vadd.f32 %v3321_v5, %v6808_v19  ;;  %v3505_v18 = vmul.f32 %v6829_v46, %v6829_v46 }
 0x286   :  { %7873 = vst [vmem:[#allocation135_spill] sm:$0xff] %v6829_v46 }
 0x287   :  { %v3679_v22 = vadd.f32 %v3678_v51, %v3504_v57  ;;  %v3323_v5 = vadd.f32 %v3322_v32, %v6829_v46 }
 0x289   :  { %v3122_v12 = vpop.f32.mrf.mxu2  ;;  %v3145_v36 = vpop.f32.mrf.mxu3  ;;  %v3680_v10 = vadd.f32 %v3679_v22, %v3505_v18 }
 0x28a   :  { %v6832_v44 = vadd.f32 %v3122_v12, %v5415_v50  ;;  %v6853_v51 = vadd.f32 %v3145_v36, %v5415_v50 }
 0x28c   :  { %v3079_v23 = vpop.f32.mrf.mxu0  ;;  %v3102_v24 = vpop.f32.mrf.mxu1  ;;  %v3506_v12 = vmul.f32 %v6832_v44, %v6832_v44  ;;  %v3324_v57 = vadd.f32 %v3323_v5, %v6832_v44  ;;  %7876 = vst [vmem:[#allocation138_spill] sm:$0xff] %v6853_v51  ;;  %v3507_v6 = vmul.f32 %v6853_v51, %v6853_v51 }
 0x28d   :  { %v6838_v26 = vadd.f32 %v3079_v23, %v5439_v47  ;;  %v6856_v32 = vadd.f32 %v3102_v24, %v5439_v47 }
 0x28e   :  { %v3681_v54 = vadd.f32 %v3680_v10, %v3506_v12  ;;  %v3325_v36 = vadd.f32 %v3324_v57, %v6853_v51 }
 0x28f   :  { %7875 = vst [vmem:[#allocation137_spill] sm:$0xff] %v6838_v26  ;;  %v3592_v23 = vmul.f32 %v6838_v26, %v6838_v26  ;;  %v3413_v0 = vadd.f32 %v3412_v41, %v6838_v26  ;;  %v3593_v24 = vmul.f32 %v6856_v32, %v6856_v32 }
 0x290   :  { %7877 = vst [vmem:[#allocation139_spill] sm:$0xff] %v6856_v32  ;;  %v3682_v12 = vadd.f32 %v3681_v54, %v3507_v6 }
 0x291   :  { %v3769_v62 = vadd.f32 %v3768_v30, %v3592_v23 }
 0x293   :  { %v3125_v7 = vpop.f32.mrf.mxu2  ;;  %v3148_v46 = vpop.f32.mrf.mxu3  ;;  %v3770_v23 = vadd.f32 %v3769_v62, %v3593_v24 }
 0x294   :  { %v6859_v14 = vadd.f32 %v3125_v7, %v5439_v47  ;;  %v3414_v7 = vadd.f32 %v3413_v0, %v6856_v32  ;;  %v6880_v41 = vadd.f32 %v3148_v46, %v5439_v47 }
 0x296   :  { %7878 = vst [vmem:[#allocation140_spill] sm:$0xff] %v6859_v14  ;;  %v3594_v5 = vmul.f32 %v6859_v14, %v6859_v14  ;;  %v3415_v10 = vadd.f32 %v3414_v7, %v6859_v14  ;;  %v3595_v62 = vmul.f32 %v6880_v41, %v6880_v41 }
 0x297   :  { %7881 = vst [vmem:[#allocation143_spill] sm:$0xff] %v6880_v41 }
 0x298   :  { %v3771_v30 = vadd.f32 %v3770_v23, %v3594_v5  ;;  %v3416_v5 = vadd.f32 %v3415_v10, %v6880_v41 }
 0x29a   :  { %v3168_v19 = vpop.f32.mrf.mxu0  ;;  %v3191_v22 = vpop.f32.mrf.mxu1  ;;  %v3772_v7 = vadd.f32 %v3771_v30, %v3595_v62 }
 0x29b   :  { %v6863_v11 = vadd.f32 %v3168_v19, %v5415_v50  ;;  %v6877_v13 = vadd.f32 %v3191_v22, %v5415_v50 }
 0x29d   :  { %7879 = vst [vmem:[#allocation141_spill] sm:$0xff] %v6863_v11  ;;  %v3508_v18 = vmul.f32 %v6863_v11, %v6863_v11  ;;  %v3326_v19 = vadd.f32 %v3325_v36, %v6863_v11  ;;  %v3509_v4 = vmul.f32 %v6877_v13, %v6877_v13 }
 0x29e   :  { %7880 = vst [vmem:[#allocation142_spill] sm:$0xff] %v6877_v13 }
 0x29f   :  { %v3683_v57 = vadd.f32 %v3682_v12, %v3508_v18  ;;  %v3327_v22 = vadd.f32 %v3326_v19, %v6877_v13 }
 0x2a1   :  { %v3214_v26 = vpop.f32.mrf.mxu2  ;;  %v3237_v0 = vpop.f32.mrf.mxu3  ;;  %v3684_v12 = vadd.f32 %v3683_v57, %v3509_v4 }
 0x2a2   :  { %v6886_v54 = vadd.f32 %v3214_v26, %v5415_v50  ;;  %v3171_v36 = vpop.f32.mrf.mxu0  ;;  %v6892_v46 = vadd.f32 %v3237_v0, %v5415_v50  ;;  %v3194_v24 = vpop.f32.mrf.mxu1 }
 0x2a3   :  { %v6895_v6 = vadd.f32 %v3171_v36, %v5439_v47  ;;  %v6909_v10 = vadd.f32 %v3194_v24, %v5439_v47 }
 0x2a4   :  { %7882 = vst [vmem:[#allocation144_spill] sm:$0xff] %v6886_v54  ;;  %v3328_v26 = vadd.f32 %v3327_v22, %v6886_v54  ;;  %v3510_v18 = vmul.f32 %v6886_v54, %v6886_v54  ;;  %v3330_v50 = vsel %vm3329_vm2, %v6892_v46, 0.0  ;;  %v3511_v23 = vmul.f32 %v6892_v46, %v6892_v46  ;;  %v7899_v54 = vld [vmem:[#allocation47_spill] sm:$0xff] }
 0x2a5   :  { %7883 = vst [vmem:[#allocation145_spill] sm:$0xff] %v6892_v46  ;;  %v3596_v19 = vmul.f32 %v6895_v6, %v6895_v6  ;;  %v3417_v0 = vadd.f32 %v3416_v5, %v6895_v6  ;;  %v3597_v14 = vmul.f32 %v6909_v10, %v6909_v10 }
 0x2a6   :  { %7884 = vst [vmem:[#allocation146_spill] sm:$0xff] %v6895_v6  ;;  %v3331_v36 = vadd.f32 %v3330_v50, %v3328_v26  ;;  %v3685_v22 = vadd.f32 %v3684_v12, %v3510_v18  ;;  %v3686_v41 = vsel %vm3329_vm2, %v3511_v23, 0.0 }
 0x2a7   :  { %7885 = vst [vmem:[#allocation147_spill] sm:$0xff] %v6909_v10  ;;  %v3773_v4 = vadd.f32 %v3772_v7, %v3596_v19  ;;  %v3418_v62 = vadd.f32 %v3417_v0, %v6909_v10 }
 0x2a8   :  { %3332 = vadd.xlane.f32.xlu1 %v3331_v36  ;;  %v3687_v57 = vadd.f32 %v3686_v41, %v3685_v22 }
 0x2a9   :  { %v3217_v30 = vpop.f32.mrf.mxu2  ;;  %v3240_v5 = vpop.f32.mrf.mxu3  ;;  %v3774_v41 = vadd.f32 %v3773_v4, %v3597_v14 }
 0x2aa   :  { %v6916_v32 = vadd.f32 %v3217_v30, %v5439_v47  ;;  %3688 = vadd.xlane.f32.xlu2 %v3687_v57  ;;  %v6919_v24 = vadd.f32 %v3240_v5, %v5439_v47 }
 0x2ac   :  { %7886 = vst [vmem:[#allocation148_spill] sm:$0xff] %v6916_v32  ;;  %v3598_v26 = vmul.f32 %v6916_v32, %v6916_v32  ;;  %v3419_v18 = vadd.f32 %v3418_v62, %v6916_v32  ;;  %v3420_v12 = vsel %vm3329_vm2, %v6919_v24, 0.0  ;;  %v3599_v7 = vmul.f32 %v6919_v24, %v6919_v24 }
 0x2ad   :  { %7887 = vst [vmem:[#allocation149_spill] sm:$0xff] %v6919_v24 }
 0x2ae   :  { %v3421_v19 = vadd.f32 %v3420_v12, %v3419_v18  ;;  %v3775_v50 = vadd.f32 %v3774_v41, %v3598_v26  ;;  %v3776_v23 = vsel %vm3329_vm2, %v3599_v7, 0.0 }
 0x2b0   :  { %3422 = vadd.xlane.f32.xlu1 %v3421_v19  ;;  %v3777_v0 = vadd.f32 %v3776_v23, %v3775_v50 }
 0x2b2   :  { %3778 = vadd.xlane.f32.xlu2 %v3777_v0 }
 0x31b   :  { %v3333_v47 = vpop.xlane.xlu1 %3332 }
 0x31c   :  { %v3780_v36 = vmul.f32 8.928571e-05, %v3333_v47 }
 0x31d   :  { %v3689_v22 = vpop.xlane.xlu2 %3688 }
 0x31e   :  { %v3784_v57 = vmul.f32 %v3780_v36, %v3780_v36  ;;  %v3782_v30 = vmul.f32 8.928571e-05, %v3689_v22  ;;  %v3810_v22 = vld [vmem:[%s7566_s3] sm:$0xff] }
 0x320   :  { %v3786_v62 = vsub.f32 %v3782_v30, %v3784_v57  ;;  %v3814_v30 = vld [vmem:[%s7567_s4] sm:$0xff] }
 0x322   :  { %v3788_v14 = vadd.f32 1e-05, %v3786_v62 }
 0x323   :  { %v3423_v4 = vpop.xlane.xlu1 %3422 }
 0x324   :  { %4839 = vrsqrt.f32 %v3788_v14  ;;  %v3781_v5 = vmul.f32 8.928571e-05, %v3423_v4  ;;  %vm3796_vm4 = vweird.f32 %v3788_v14 }
 0x325   :  { %v3779_v32 = vpop.xlane.xlu2 %3778 }
 0x326   :  { %v3785_v10 = vmul.f32 %v3781_v5, %v3781_v5  ;;  %v3783_v24 = vmul.f32 8.928571e-05, %v3779_v32 }
 0x328   :  { %v3787_v18 = vsub.f32 %v3783_v24, %v3785_v10 }
 0x32a   :  { %v4840_v26 = vpop.eup %4839  ;;  %v3789_v41 = vadd.f32 1e-05, %v3787_v18 }
 0x32b   :  { %v3791_v12 = vmul.f32 %v4840_v26, %v3788_v14  ;;  %vm3797_vm3 = vweird.f32 %v4840_v26 }
 0x32c   :  { %4841 = vrsqrt.f32 %v3789_v41  ;;  %vm3798_vm5 = vmor %vm3796_vm4, %vm3797_vm3  ;;  %vm3806_vm7 = vweird.f32 %v3789_v41 }
 0x32d   :  { %v3792_v7 = vmul.f32 %v4840_v26, %v3791_v12  ;;  %v3811_v12 = vld [vmem:[%s7566_s3 + $0x8] sm:$0xff]  ;;  %s4936_s3 = smov [#allocation7]  }
 0x32f   :  { %v3793_v19 = vmul.f32 0.5, %v3792_v7 }
 0x331   :  { %v3794_v50 = vsub.f32 1.5, %v3793_v19  ;;  %v3815_v19 = vld [vmem:[%s7567_s4 + $0x8] sm:$0xff]  ;;  %s4548_s4 = sshll.u32 %s4936_s3, 4  ;;  %s4549_s4 = int_to_ptr.vmem [resolvable:$true] %s4548_s4 }
 0x332   :  { %v4842_v23 = vpop.eup %4841 }
 0x333   :  { %v3801_v0 = vmul.f32 %v4842_v23, %v3789_v41  ;;  %v3795_v47 = vmul.f32 %v4840_v26, %v3794_v50  ;;  %vm3807_vm6 = vweird.f32 %v4842_v23  ;;  %v7888_v41 = vld [vmem:[#allocation23_spill] sm:$0xff] }
 0x334   :  { %vm3808_vm8 = vmor %vm3806_vm7, %vm3807_vm6 }
 0x335   :  { %v3802_v57 = vmul.f32 %v4842_v23, %v3801_v0  ;;  %v3799_v32 = vsel %vm3798_vm5, %v4840_v26, %v3795_v47 }
 0x336   :  { %v3812_v10 = vmul.f32 %v3810_v22, %v3799_v32  ;;  %v7889_v22 = vld [vmem:[#allocation24_spill] sm:$0xff]  ;;  %v7890_v32 = vld [vmem:[#allocation26_spill] sm:$0xff] }
 0x337   :  { %v3803_v24 = vmul.f32 0.5, %v3802_v57 }
 0x338   :  { %3822 = vperm.xlu0 %4836, %v3812_v10   ;;  %v3816_v62 = vmul.f32 %v3812_v10, %v3780_v36  ;;  %v7891_v10 = vld [vmem:[#allocation31_spill] sm:$0xff] }
 0x339   :  { %v3804_v4 = vsub.f32 1.5, %v3803_v24 }
 0x33a   :  { %v3818_v14 = vsub.f32 %v3814_v30, %v3816_v62  ;;  %v7892_v30 = vld [vmem:[#allocation33_spill] sm:$0xff] }
 0x33b   :  { %v3805_v18 = vmul.f32 %v4842_v23, %v3804_v4  ;;  %v7893_v4 = vld [vmem:[#allocation36_spill] sm:$0xff] }
 0x33c   :  { %4008 = vperm.xlu2 %4838, %v3818_v14  }
 0x33d   :  { %v3809_v26 = vsel %vm3808_vm8, %v4842_v23, %v3805_v18  ;;  %v7894_v18 = vld [vmem:[#allocation38_spill] sm:$0xff] }
 0x33e   :  { %v3813_v7 = vmul.f32 %v3811_v12, %v3809_v26 }
 0x340   :  { %3827 = vperm.xlu1 %4837, %v3813_v7   ;;  %v3817_v50 = vmul.f32 %v3813_v7, %v3781_v5 }
 0x342   :  { %v3819_v36 = vsub.f32 %v3815_v19, %v3817_v50  ;;  %v7895_v50 = vld [vmem:[#allocation40_spill] sm:$0xff] }
 0x344   :  { %4013 = vperm.xlu0 %4836, %v3819_v36  }
 0x396   :  { %v6953_v5 = vpop.permute.xlu2 %4008 }
 0x3aa   :  { %v6941_v0 = vpop.permute.xlu0 %3822 }
 0x3ab   :  { %v3830_v47 = vmul.f32 %v6941_v0, %v7888_v41  ;;  %v3831_v57 = vmul.f32 %v6941_v0, %v7889_v22  ;;  %v3832_v23 = vmul.f32 %v6941_v0, %v7890_v32  ;;  %v3833_v24 = vmul.f32 %v6941_v0, %v7891_v10  ;;  %v7896_v22 = vld [vmem:[#allocation41_spill] sm:$0xff] }
 0x3ac   :  { %v3834_v62 = vmul.f32 %v6941_v0, %v7892_v30  ;;  %v3835_v14 = vmul.f32 %v6941_v0, %v7893_v4  ;;  %v3836_v12 = vmul.f32 %v6941_v0, %v7894_v18  ;;  %v3837_v36 = vmul.f32 %v6941_v0, %v7895_v50  ;;  %v7897_v30 = vld [vmem:[#allocation43_spill] sm:$0xff]  ;;  %v7898_v18 = vld [vmem:[#allocation45_spill] sm:$0xff] }
 0x3ad   :  { %v4016_v26 = vadd.f32 %v6953_v5, %v3830_v47  ;;  %v4017_v7 = vadd.f32 %v6953_v5, %v3831_v57  ;;  %v4018_v19 = vadd.f32 %v6953_v5, %v3832_v23  ;;  %v4019_v41 = vadd.f32 %v6953_v5, %v3833_v24 }
 0x3ae   :  { %v3838_v32 = vmul.f32 %v6941_v0, %v7896_v22  ;;  %v4020_v10 = vadd.f32 %v6953_v5, %v3834_v62  ;;  %v3839_v4 = vmul.f32 %v6941_v0, %v7897_v30  ;;  %v3840_v47 = vmul.f32 %v6941_v0, %v7898_v18  ;;  %v7900_v62 = vld [vmem:[#allocation48_spill] sm:$0xff]  ;;  %v7901_v18 = vld [vmem:[#allocation51_spill] sm:$0xff] }
 0x3af   :  { %v4021_v57 = vadd.f32 %v6953_v5, %v3835_v14  ;;  %v4022_v23 = vadd.f32 %v6953_v5, %v3836_v12  ;;  %v4192_v6 = vmax.f32 %v4016_v26, 0.0  ;;  %v4193_v46 = vmax.f32 %v4017_v7, 0.0  ;;  %v7902_v7 = vld [vmem:[#allocation52_spill] sm:$0xff] }
 0x3b0   :  { %v4194_v50 = vmax.f32 %v4018_v19, 0.0  ;;  %v3841_v24 = vmul.f32 %v6941_v0, %v7899_v54  ;;  %v4023_v22 = vadd.f32 %v6953_v5, %v3837_v36  ;;  %v4195_v13 = vmax.f32 %v4019_v41, 0.0  ;;  %v7903_v41 = vld [vmem:[#allocation55_spill] sm:$0xff] }
 0x3b1   :  { %v3842_v11 = vmul.f32 %v6941_v0, %v7900_v62  ;;  %v4024_v30 = vadd.f32 %v6953_v5, %v3838_v32  ;;  %v4196_v51 = vmax.f32 %v4020_v10, 0.0  ;;  %4368 = vst [vmem:[#allocation7] sm:$0xff] %v4192_v6  ;;  %v3843_v14 = vmul.f32 %v6941_v0, %v7901_v18  ;;  %v7904_v10 = vld [vmem:[#allocation56_spill] sm:$0xff] }
 0x3b2   :  { %v4025_v12 = vadd.f32 %v6953_v5, %v3839_v4  ;;  %v4197_v26 = vmax.f32 %v4021_v57, 0.0  ;;  %4369 = vst [vmem:[#allocation7 + $0x8] sm:$0xff] %v4193_v46  ;;  %v3844_v54 = vmul.f32 %v6941_v0, %v7902_v7  ;;  %v4026_v19 = vadd.f32 %v6953_v5, %v3840_v47  ;;  %v7905_v57 = vld [vmem:[#allocation59_spill] sm:$0xff] }
 0x3b3   :  { %v4198_v36 = vmax.f32 %v4022_v23, 0.0  ;;  %4370 = vst [vmem:[#allocation7 + $0x10] sm:$0xff] %v4194_v50  ;;  %v3845_v62 = vmul.f32 %v6941_v0, %v7903_v41  ;;  %v4027_v32 = vadd.f32 %v6953_v5, %v3841_v24  ;;  %v4199_v6 = vmax.f32 %v4023_v22, 0.0  ;;  %v7906_v50 = vld [vmem:[#allocation60_spill] sm:$0xff]  ;;  %v7907_v22 = vld [vmem:[#allocation63_spill] sm:$0xff] }
 0x3b4   :  { %4371 = vst [vmem:[#allocation7 + $0x18] sm:$0xff] %v4195_v13  ;;  %v3846_v18 = vmul.f32 %v6941_v0, %v7904_v10  ;;  %v4028_v4 = vadd.f32 %v6953_v5, %v3842_v11  ;;  %v4200_v46 = vmax.f32 %v4024_v30, 0.0  ;;  %v3847_v7 = vmul.f32 %v6941_v0, %v7905_v57  ;;  %v7908_v30 = vld [vmem:[#allocation64_spill] sm:$0xff] }
 0x3b5   :  { %4372 = vst [vmem:[#allocation7 + $0x20] sm:$0xff] %v4196_v51  ;;  %v4029_v47 = vadd.f32 %v6953_v5, %v3843_v14  ;;  %v4201_v23 = vmax.f32 %v4025_v12, 0.0  ;;  %v3848_v41 = vmul.f32 %v6941_v0, %v7906_v50  ;;  %v4030_v24 = vadd.f32 %v6953_v5, %v3844_v54 }
 0x3b6   :  { %4373 = vst [vmem:[#allocation7 + $0x28] sm:$0xff] %v4197_v26  ;;  %v4202_v13 = vmax.f32 %v4026_v19, 0.0  ;;  %v3849_v10 = vmul.f32 %v6941_v0, %v7907_v22  ;;  %v4031_v11 = vadd.f32 %v6953_v5, %v3845_v62  ;;  %v4203_v51 = vmax.f32 %v4027_v32, 0.0  ;;  %v7909_v26 = vld [vmem:[#allocation67_spill] sm:$0xff] }
 0x3b7   :  { %4374 = vst [vmem:[#allocation7 + $0x30] sm:$0xff] %v4198_v36  ;;  %v3850_v57 = vmul.f32 %v6941_v0, %v7908_v30  ;;  %v4032_v14 = vadd.f32 %v6953_v5, %v3846_v18  ;;  %v4204_v12 = vmax.f32 %v4028_v4, 0.0  ;;  %v3851_v50 = vmul.f32 %v6941_v0, %v7909_v26  ;;  %v7910_v36 = vld [vmem:[#allocation68_spill] sm:$0xff] }
 0x3b8   :  { %4375 = vst [vmem:[#allocation7 + $0x38] sm:$0xff] %v4199_v6  ;;  %v4033_v54 = vadd.f32 %v6953_v5, %v3847_v7  ;;  %v4205_v19 = vmax.f32 %v4029_v47, 0.0  ;;  %v3852_v22 = vmul.f32 %v6941_v0, %v7910_v36  ;;  %v4034_v62 = vadd.f32 %v6953_v5, %v3848_v41  ;;  %v7911_v6 = vld [vmem:[#allocation12_spill] sm:$0xff] }
 0x3b9   :  { %4376 = vst [vmem:[#allocation7 + $0x40] sm:$0xff] %v4200_v46  ;;  %v4206_v32 = vmax.f32 %v4030_v24, 0.0  ;;  %v3853_v30 = vmul.f32 %v6941_v0, %v7911_v6  ;;  %v4035_v18 = vadd.f32 %v6953_v5, %v3849_v10  ;;  %v4207_v4 = vmax.f32 %v4031_v11, 0.0  ;;  %v7912_v46 = vld [vmem:[#allocation17_spill] sm:$0xff] }
 0x3ba   :  { %4377 = vst [vmem:[#allocation7 + $0x48] sm:$0xff] %v4201_v23  ;;  %v3854_v26 = vmul.f32 %v6941_v0, %v7912_v46  ;;  %v4036_v7 = vadd.f32 %v6953_v5, %v3850_v57  ;;  %v4208_v47 = vmax.f32 %v4032_v14, 0.0  ;;  %v7913_v23 = vld [vmem:[#allocation18_spill] sm:$0xff]  ;;  %v4037_v41 = vadd.f32 %v6953_v5, %v3851_v50 }
 0x3bb   :  { %4378 = vst [vmem:[#allocation7 + $0x50] sm:$0xff] %v4202_v13  ;;  %v3855_v36 = vmul.f32 %v6941_v0, %v7913_v23  ;;  %v4209_v24 = vmax.f32 %v4033_v54, 0.0  ;;  %v7914_v13 = vld [vmem:[#allocation19_spill] sm:$0xff]  ;;  %v4038_v10 = vadd.f32 %v6953_v5, %v3852_v22  ;;  %v4210_v11 = vmax.f32 %v4034_v62, 0.0 }
 0x3bc   :  { %4379 = vst [vmem:[#allocation7 + $0x58] sm:$0xff] %v4203_v51  ;;  %v3856_v6 = vmul.f32 %v6941_v0, %v7914_v13  ;;  %v7915_v51 = vld [vmem:[#allocation20_spill] sm:$0xff]  ;;  %v4039_v57 = vadd.f32 %v6953_v5, %v3853_v30  ;;  %v4211_v14 = vmax.f32 %v4035_v18, 0.0  ;;  %v4040_v50 = vadd.f32 %v6953_v5, %v3854_v26 }
 0x3bd   :  { %4380 = vst [vmem:[#allocation7 + $0x60] sm:$0xff] %v4204_v12  ;;  %v3857_v46 = vmul.f32 %v6941_v0, %v7915_v51  ;;  %v7916_v12 = vld [vmem:[#allocation71_spill] sm:$0xff]  ;;  %v4212_v54 = vmax.f32 %v4036_v7, 0.0  ;;  %v4041_v22 = vadd.f32 %v6953_v5, %v3855_v36  ;;  %v4213_v62 = vmax.f32 %v4037_v41, 0.0 }
 0x3be   :  { %4381 = vst [vmem:[#allocation7 + $0x68] sm:$0xff] %v4205_v19  ;;  %v3858_v23 = vmul.f32 %v6941_v0, %v7916_v12  ;;  %v7917_v19 = vld [vmem:[#allocation28_spill] sm:$0xff]  ;;  %v4042_v30 = vadd.f32 %v6953_v5, %v3856_v6  ;;  %v4214_v18 = vmax.f32 %v4038_v10, 0.0  ;;  %v4215_v7 = vmax.f32 %v4039_v57, 0.0  ;;  %v7918_v10 = vld [vmem:[#allocation75_spill] sm:$0xff] }
 0x3bf   :  { %4382 = vst [vmem:[#allocation7 + $0x70] sm:$0xff] %v4206_v32  ;;  %v3859_v13 = vmul.f32 %v6941_v0, %v7917_v19  ;;  %v3860_v32 = vmul.f32 %v6941_v0, %v5980_v59  ;;  %v4043_v26 = vadd.f32 %v6953_v5, %v3857_v46  ;;  %v4216_v41 = vmax.f32 %v4040_v50, 0.0 }
 0x3c0   :  { %4383 = vst [vmem:[#allocation7 + $0x78] sm:$0xff] %v4207_v4  ;;  %v3861_v4 = vmul.f32 %v6941_v0, %v6009_v9  ;;  %v4044_v36 = vadd.f32 %v6953_v5, %v3858_v23  ;;  %v3863_v59 = vmul.f32 %v6941_v0, %v6047_v42  ;;  %v4217_v6 = vmax.f32 %v4041_v22, 0.0 }
 0x3c1   :  { %4384 = vst [vmem:[#allocation7 + $0x80] sm:$0xff] %v4208_v47  ;;  %v3862_v47 = vmul.f32 %v6941_v0, %v6024_v3  ;;  %v3864_v9 = vmul.f32 %v6941_v0, %v7918_v10  ;;  %v4218_v51 = vmax.f32 %v4042_v30, 0.0  ;;  %v3865_v3 = vmul.f32 %v6941_v0, %v6081_v2 }
 0x3c2   :  { %4385 = vst [vmem:[#allocation7 + $0x88] sm:$0xff] %v4209_v24  ;;  %v4045_v24 = vadd.f32 %v6953_v5, %v3859_v13  ;;  %v4047_v46 = vadd.f32 %v6953_v5, %v3861_v4  ;;  %v4219_v57 = vmax.f32 %v4043_v26, 0.0  ;;  %v3866_v42 = vmul.f32 %v6941_v0, %v6090_v61 }
 0x3c3   :  { %4386 = vst [vmem:[#allocation7 + $0x90] sm:$0xff] %v4210_v11  ;;  %v4046_v11 = vadd.f32 %v6953_v5, %v3860_v32  ;;  %v4220_v12 = vmax.f32 %v4044_v36, 0.0  ;;  %v3867_v23 = vmul.f32 %v6941_v0, %v6125_v28  ;;  %v4049_v50 = vadd.f32 %v6953_v5, %v3863_v59 }
 0x3c4   :  { %4387 = vst [vmem:[#allocation7 + $0x98] sm:$0xff] %v4211_v14  ;;  %v4048_v14 = vadd.f32 %v6953_v5, %v3862_v47  ;;  %v3868_v2 = vmul.f32 %v6941_v0, %v6136_v29  ;;  %v4050_v19 = vadd.f32 %v6953_v5, %v3864_v9  ;;  %v3869_v61 = vmul.f32 %v6941_v0, %v6161_v48 }
 0x3c5   :  { %4388 = vst [vmem:[#allocation7 + $0xa0] sm:$0xff] %v4212_v54  ;;  %v4221_v54 = vmax.f32 %v4045_v24, 0.0  ;;  %v4222_v13 = vmax.f32 %v4046_v11, 0.0  ;;  %v4051_v22 = vadd.f32 %v6953_v5, %v3865_v3  ;;  %v3870_v28 = vmul.f32 %v6941_v0, %v6174_v49 }
 0x3c6   :  { %4389 = vst [vmem:[#allocation7 + $0xa8] sm:$0xff] %v4213_v62  ;;  %v4223_v62 = vmax.f32 %v4047_v46, 0.0  ;;  %v4052_v32 = vadd.f32 %v6953_v5, %v3866_v42  ;;  %v4224_v30 = vmax.f32 %v4048_v14, 0.0  ;;  %v3871_v29 = vmul.f32 %v6941_v0, %v6201_v55 }
 0x3c7   :  { %4390 = vst [vmem:[#allocation7 + $0xb0] sm:$0xff] %v4214_v18  ;;  %v4053_v18 = vadd.f32 %v6953_v5, %v3867_v23  ;;  %v4225_v4 = vmax.f32 %v4049_v50, 0.0  ;;  %v3872_v48 = vmul.f32 %v6941_v0, %v6208_v40  ;;  %v4054_v26 = vadd.f32 %v6953_v5, %v3868_v2 }
 0x3c8   :  { %4391 = vst [vmem:[#allocation7 + $0xb8] sm:$0xff] %v4215_v7  ;;  %v4226_v7 = vmax.f32 %v4050_v19, 0.0  ;;  %v3873_v49 = vmul.f32 %v6941_v0, %v6233_v21  ;;  %v4055_v47 = vadd.f32 %v6953_v5, %v3869_v61  ;;  %v4227_v36 = vmax.f32 %v4051_v22, 0.0  ;;  %v7920_v61 = vld [vmem:[#allocation94_spill] sm:$0xff] }
 0x3c9   :  { %4392 = vst [vmem:[#allocation7 + $0xc0] sm:$0xff] %v4216_v41  ;;  %v3874_v55 = vmul.f32 %v6941_v0, %v6245_v33  ;;  %v4056_v41 = vadd.f32 %v6953_v5, %v3870_v28  ;;  %v4228_v59 = vmax.f32 %v4052_v32, 0.0  ;;  %v3875_v40 = vmul.f32 %v6941_v0, %v6273_v63 }
 0x3ca   :  { %4393 = vst [vmem:[#allocation7 + $0xc8] sm:$0xff] %v4217_v6  ;;  %v4057_v24 = vadd.f32 %v6953_v5, %v3871_v29  ;;  %v4229_v6 = vmax.f32 %v4053_v18, 0.0  ;;  %v3876_v21 = vmul.f32 %v6941_v0, %v6280_v43  ;;  %v4058_v10 = vadd.f32 %v6953_v5, %v3872_v48 }
 0x3cb   :  { %4394 = vst [vmem:[#allocation7 + $0xd0] sm:$0xff] %v4218_v51  ;;  %v4230_v9 = vmax.f32 %v4054_v26, 0.0  ;;  %v3877_v33 = vmul.f32 %v6941_v0, %v6311_v31  ;;  %v4059_v11 = vadd.f32 %v6953_v5, %v3873_v49  ;;  %v4231_v51 = vmax.f32 %v4055_v47, 0.0 }
 0x3cc   :  { %4395 = vst [vmem:[#allocation7 + $0xd8] sm:$0xff] %v4219_v57  ;;  %v3878_v63 = vmul.f32 %v6941_v0, %v6318_v15  ;;  %v4060_v3 = vadd.f32 %v6953_v5, %v3874_v55  ;;  %v4232_v46 = vmax.f32 %v4056_v41, 0.0  ;;  %v7919_v57 = vld [vmem:[#allocation89_spill] sm:$0xff]  ;;  %v4061_v42 = vadd.f32 %v6953_v5, %v3875_v40  ;;  %v7922_v41 = vld [vmem:[#allocation102_spill] sm:$0xff] }
 0x3cd   :  { %4396 = vst [vmem:[#allocation7 + $0xe0] sm:$0xff] %v4220_v12  ;;  %v3879_v43 = vmul.f32 %v6941_v0, %v7919_v57  ;;  %v4233_v14 = vmax.f32 %v4057_v24, 0.0  ;;  %v3880_v31 = vmul.f32 %v6941_v0, %v6354_v45  ;;  %v4062_v12 = vadd.f32 %v6953_v5, %v3876_v21  ;;  %v7923_v21 = vld [vmem:[#allocation105_spill] sm:$0xff] }
 0x3ce   :  { %4397 = vst [vmem:[#allocation7 + $0xe8] sm:$0xff] %v4221_v54  ;;  %v4234_v23 = vmax.f32 %v4058_v10, 0.0  ;;  %v3881_v15 = vmul.f32 %v6941_v0, %v6377_v34  ;;  %v4063_v50 = vadd.f32 %v6953_v5, %v3877_v33  ;;  %v4235_v54 = vmax.f32 %v4059_v11, 0.0 }
 0x3cf   :  { %4398 = vst [vmem:[#allocation7 + $0xf0] sm:$0xff] %v4222_v13  ;;  %v3882_v2 = vmul.f32 %v6941_v0, %v6384_v20  ;;  %v4064_v19 = vadd.f32 %v6953_v5, %v3878_v63  ;;  %v4236_v13 = vmax.f32 %v4060_v3, 0.0  ;;  %v3883_v45 = vmul.f32 %v6941_v0, %v7920_v61 }
 0x3d0   :  { %4399 = vst [vmem:[#allocation7 + $0xf8] sm:$0xff] %v4223_v62  ;;  %v4065_v22 = vadd.f32 %v6953_v5, %v3879_v43  ;;  %v4237_v62 = vmax.f32 %v4061_v42, 0.0  ;;  %v3884_v34 = vmul.f32 %v6941_v0, %v6416_v56  ;;  %v4066_v28 = vadd.f32 %v6953_v5, %v3880_v31  ;;  %v7924_v42 = vld [vmem:[#allocation110_spill] sm:$0xff] }
 0x3d1   :  { %4400 = vst [vmem:[#allocation7 + $0x100] sm:$0xff] %v4224_v30  ;;  %v4238_v32 = vmax.f32 %v4062_v12, 0.0  ;;  %v7921_v30 = vld [vmem:[#allocation97_spill] sm:$0xff]  ;;  %v4067_v29 = vadd.f32 %v6953_v5, %v3881_v15  ;;  %v4239_v18 = vmax.f32 %v4063_v50, 0.0  ;;  %v4068_v48 = vadd.f32 %v6953_v5, %v3882_v2 }
 0x3d2   :  { %4401 = vst [vmem:[#allocation7 + $0x108] sm:$0xff] %v4225_v4  ;;  %v3885_v20 = vmul.f32 %v6941_v0, %v7921_v30  ;;  %v3886_v4 = vmul.f32 %v6941_v0, %v6452_v35  ;;  %v4240_v26 = vmax.f32 %v4064_v19, 0.0  ;;  %v3887_v56 = vmul.f32 %v6941_v0, %v6478_v37  ;;  %v7925_v15 = vld [vmem:[#allocation113_spill] sm:$0xff] }
 0x3d3   :  { %4402 = vst [vmem:[#allocation7 + $0x110] sm:$0xff] %v4226_v7  ;;  %v4069_v7 = vadd.f32 %v6953_v5, %v3883_v45  ;;  %v4241_v49 = vmax.f32 %v4065_v22, 0.0  ;;  %v3888_v47 = vmul.f32 %v6941_v0, %v6482_v8  ;;  %v4242_v55 = vmax.f32 %v4066_v28, 0.0  ;;  %v7926_v22 = vld [vmem:[#allocation116_spill] sm:$0xff] }
 0x3d4   :  { %4403 = vst [vmem:[#allocation7 + $0x118] sm:$0xff] %v4227_v36  ;;  %v4070_v36 = vadd.f32 %v6953_v5, %v3884_v34  ;;  %v3889_v35 = vmul.f32 %v6941_v0, %v7922_v41  ;;  %v4243_v40 = vmax.f32 %v4067_v29, 0.0  ;;  %v3890_v37 = vmul.f32 %v6941_v0, %v6516_v39 }
 0x3d5   :  { %4404 = vst [vmem:[#allocation7 + $0x120] sm:$0xff] %v4228_v59  ;;  %v4071_v59 = vadd.f32 %v6953_v5, %v3885_v20  ;;  %v4072_v24 = vadd.f32 %v6953_v5, %v3886_v4  ;;  %v3891_v8 = vmul.f32 %v6941_v0, %v7923_v21  ;;  %v4073_v10 = vadd.f32 %v6953_v5, %v3887_v56  ;;  %v7927_v20 = vld [vmem:[#allocation119_spill] sm:$0xff]  ;;  %v7928_v4 = vld [vmem:[#allocation122_spill] sm:$0xff] }
 0x3d6   :  { %4405 = vst [vmem:[#allocation7 + $0x128] sm:$0xff] %v4229_v6  ;;  %v4244_v6 = vmax.f32 %v4068_v48, 0.0  ;;  %v3892_v33 = vmul.f32 %v6941_v0, %v6552_v60  ;;  %v4074_v11 = vadd.f32 %v6953_v5, %v3888_v47  ;;  %v3893_v39 = vmul.f32 %v6941_v0, %v6578_v27  ;;  %v7929_v47 = vld [vmem:[#allocation125_spill] sm:$0xff] }
 0x3d7   :  { %4406 = vst [vmem:[#allocation7 + $0x130] sm:$0xff] %v4230_v9  ;;  %v4245_v9 = vmax.f32 %v4069_v7, 0.0  ;;  %v4075_v63 = vadd.f32 %v6953_v5, %v3889_v35  ;;  %v4247_v3 = vmax.f32 %v4071_v59, 0.0  ;;  %v4076_v57 = vadd.f32 %v6953_v5, %v3890_v37 }
 0x3d8   :  { %4407 = vst [vmem:[#allocation7 + $0x138] sm:$0xff] %v4231_v51  ;;  %v4246_v51 = vmax.f32 %v4070_v36, 0.0  ;;  %v4248_v43 = vmax.f32 %v4072_v24, 0.0  ;;  %v3895_v60 = vmul.f32 %v6941_v0, %v7924_v42  ;;  %v4249_v31 = vmax.f32 %v4073_v10, 0.0 }
 0x3d9   :  { %4408 = vst [vmem:[#allocation7 + $0x140] sm:$0xff] %v4232_v46  ;;  %v3894_v46 = vmul.f32 %v6941_v0, %v6582_v58  ;;  %v3896_v27 = vmul.f32 %v6941_v0, %v6616_v25  ;;  %v4078_v12 = vadd.f32 %v6953_v5, %v3892_v33  ;;  %v3897_v58 = vmul.f32 %v6941_v0, %v7925_v15  ;;  %v7935_v15 = vld [vmem:[#allocation141_spill] sm:$0xff] }
 0x3da   :  { %4409 = vst [vmem:[#allocation7 + $0x148] sm:$0xff] %v4233_v14  ;;  %v4077_v14 = vadd.f32 %v6953_v5, %v3891_v8  ;;  %v4079_v50 = vadd.f32 %v6953_v5, %v3893_v39  ;;  %v3898_v2 = vmul.f32 %v6941_v0, %v6648_v17  ;;  %v3899_v25 = vmul.f32 %v6941_v0, %v6672_v16 }
 0x3db   :  { %4410 = vst [vmem:[#allocation7 + $0x150] sm:$0xff] %v4234_v23  ;;  %v4250_v23 = vmax.f32 %v4074_v11, 0.0  ;;  %v4080_v19 = vadd.f32 %v6953_v5, %v3894_v46  ;;  %v4081_v61 = vadd.f32 %v6953_v5, %v3895_v60  ;;  %v4082_v34 = vadd.f32 %v6953_v5, %v3896_v27 }
 0x3dc   :  { %4411 = vst [vmem:[#allocation7 + $0x158] sm:$0xff] %v4235_v54  ;;  %v4251_v54 = vmax.f32 %v4075_v63, 0.0  ;;  %v4253_v45 = vmax.f32 %v4077_v14, 0.0  ;;  %v4254_v28 = vmax.f32 %v4078_v12, 0.0  ;;  %v3901_v17 = vmul.f32 %v6941_v0, %v6700_v38 }
 0x3dd   :  { %4412 = vst [vmem:[#allocation7 + $0x160] sm:$0xff] %v4236_v13  ;;  %v4252_v13 = vmax.f32 %v4076_v57, 0.0  ;;  %v4255_v30 = vmax.f32 %v4079_v50, 0.0  ;;  %v3902_v16 = vmul.f32 %v6941_v0, %v7927_v20  ;;  %v4084_v29 = vadd.f32 %v6953_v5, %v3898_v2  ;;  %v7936_v2 = vld [vmem:[#allocation142_spill] sm:$0xff] }
 0x3de   :  { %4413 = vst [vmem:[#allocation7 + $0x168] sm:$0xff] %v4237_v62  ;;  %v3900_v62 = vmul.f32 %v6941_v0, %v7926_v22  ;;  %v3903_v48 = vmul.f32 %v6941_v0, %v7928_v4  ;;  %v4257_v56 = vmax.f32 %v4081_v61, 0.0  ;;  %v3904_v38 = vmul.f32 %v6941_v0, %v6729_v53 }
 0x3df   :  { %4414 = vst [vmem:[#allocation7 + $0x170] sm:$0xff] %v4238_v32  ;;  %v4083_v32 = vadd.f32 %v6953_v5, %v3897_v58  ;;  %v3905_v36 = vmul.f32 %v6941_v0, %v7929_v47  ;;  %v3906_v35 = vmul.f32 %v6941_v0, %v6758_v1  ;;  %v4088_v59 = vadd.f32 %v6953_v5, %v3902_v16 }
 0x3e0   :  { %4415 = vst [vmem:[#allocation7 + $0x178] sm:$0xff] %v4239_v18  ;;  %v4256_v18 = vmax.f32 %v4080_v19, 0.0  ;;  %v4086_v7 = vadd.f32 %v6953_v5, %v3900_v62  ;;  %v3907_v53 = vmul.f32 %v6941_v0, %v6779_v52  ;;  %v4089_v37 = vadd.f32 %v6953_v5, %v3903_v48  ;;  %v7938_v62 = vld [vmem:[#allocation145_spill] sm:$0xff] }
 0x3e1   :  { %4416 = vst [vmem:[#allocation7 + $0x180] sm:$0xff] %v4240_v26  ;;  %v4085_v26 = vadd.f32 %v6953_v5, %v3899_v25  ;;  %v4259_v41 = vmax.f32 %v4083_v32, 0.0  ;;  %v4090_v8 = vadd.f32 %v6953_v5, %v3904_v38  ;;  %v4091_v33 = vadd.f32 %v6953_v5, %v3905_v36  ;;  %v7937_v25 = vld [vmem:[#allocation144_spill] sm:$0xff]  ;;  %v7940_v36 = vld [vmem:[#allocation30_spill] sm:$0xff] }
 0x3e2   :  { %4417 = vst [vmem:[#allocation7 + $0x188] sm:$0xff] %v4241_v49  ;;  %v4258_v49 = vmax.f32 %v4082_v34, 0.0  ;;  %v4262_v10 = vmax.f32 %v4086_v7, 0.0  ;;  %v4092_v39 = vadd.f32 %v6953_v5, %v3906_v35  ;;  %v4264_v63 = vmax.f32 %v4088_v59, 0.0  ;;  %v7942_v35 = vld [vmem:[#allocation34_spill] sm:$0xff] }
 0x3e3   :  { %4418 = vst [vmem:[#allocation7 + $0x190] sm:$0xff] %v4242_v55  ;;  %v4087_v55 = vadd.f32 %v6953_v5, %v3901_v17  ;;  %v4261_v24 = vmax.f32 %v4085_v26, 0.0  ;;  %v4093_v57 = vadd.f32 %v6953_v5, %v3907_v53  ;;  %v3912_v42 = vmul.f32 %v6941_v0, %v6832_v44 }
 0x3e4   :  { %4419 = vst [vmem:[#allocation7 + $0x198] sm:$0xff] %v4243_v40  ;;  %v4260_v40 = vmax.f32 %v4084_v29, 0.0  ;;  %v4266_v14 = vmax.f32 %v4090_v8, 0.0  ;;  %v3914_v58 = vmul.f32 %v6941_v0, %v7935_v15  ;;  %v3915_v44 = vmul.f32 %v6941_v0, %v7936_v2  ;;  %v7946_v8 = vld [vmem:[#allocation44_spill] sm:$0xff] }
 0x3e5   :  { %4420 = vst [vmem:[#allocation7 + $0x1a0] sm:$0xff] %v4244_v6  ;;  %v7930_v6 = vld [vmem:[#allocation128_spill] sm:$0xff]  ;;  %v4263_v11 = vmax.f32 %v4087_v55, 0.0  ;;  %v3916_v61 = vmul.f32 %v6941_v0, %v7937_v25  ;;  %v3917_v34 = vmul.f32 %v6941_v0, %v7938_v62  ;;  %v7962_v62 = vld [vmem:[#allocation134_spill] sm:$0xff] }
 0x3e6   :  { %4421 = vst [vmem:[#allocation7 + $0x1a8] sm:$0xff] %v4245_v9  ;;  %v3908_v21 = vmul.f32 %v6941_v0, %v7930_v6  ;;  %v7931_v9 = vld [vmem:[#allocation131_spill] sm:$0xff]  ;;  %v4100_v32 = vadd.f32 %v6953_v5, %v3914_v58  ;;  %v4101_v20 = vadd.f32 %v6953_v5, %v3915_v44  ;;  %v7945_v6 = vld [vmem:[#allocation42_spill] sm:$0xff]  ;;  %v7959_v44 = vld [vmem:[#allocation129_spill] sm:$0xff] }
 0x3e7   :  { %4422 = vst [vmem:[#allocation7 + $0x1b0] sm:$0xff] %v4246_v51  ;;  %v3909_v1 = vmul.f32 %v6941_v0, %v7931_v9  ;;  %v7932_v51 = vld [vmem:[#allocation132_spill] sm:$0xff]  ;;  %v4102_v29 = vadd.f32 %v6953_v5, %v3916_v61  ;;  %v4103_v4 = vadd.f32 %v6953_v5, %v3917_v34  ;;  %v7947_v9 = vld [vmem:[#allocation46_spill] sm:$0xff]  ;;  %v7961_v61 = vld [vmem:[#allocation133_spill] sm:$0xff] }
 0x3e8   :  { %4423 = vst [vmem:[#allocation7 + $0x1b8] sm:$0xff] %v4247_v3  ;;  %v3910_v52 = vmul.f32 %v6941_v0, %v7932_v51  ;;  %v7933_v3 = vld [vmem:[#allocation135_spill] sm:$0xff]  ;;  %v4094_v60 = vadd.f32 %v6953_v5, %v3908_v21  ;;  %v4277_v26 = vmax.f32 %v4101_v20, 0.0  ;;  %v7949_v51 = vld [vmem:[#allocation114_spill] sm:$0xff] }
 0x3e9   :  { %4424 = vst [vmem:[#allocation7 + $0x1c0] sm:$0xff] %v4248_v43  ;;  %v3911_v46 = vmul.f32 %v6941_v0, %v7933_v3  ;;  %v4265_v43 = vmax.f32 %v4089_v37, 0.0  ;;  %v4095_v12 = vadd.f32 %v6953_v5, %v3909_v1  ;;  %v4278_v38 = vmax.f32 %v4102_v29, 0.0  ;;  %v7944_v37 = vld [vmem:[#allocation39_spill] sm:$0xff]  ;;  %v7951_v3 = vld [vmem:[#allocation117_spill] sm:$0xff]  ;;  %v7957_v58 = vld [vmem:[#allocation126_spill] sm:$0xff] }
 0x3ea   :  { %4425 = vst [vmem:[#allocation7 + $0x1c8] sm:$0xff] %v4249_v31  ;;  %v7934_v31 = vld [vmem:[#allocation138_spill] sm:$0xff]  ;;  %v4096_v50 = vadd.f32 %v6953_v5, %v3910_v52  ;;  %v4270_v22 = vmax.f32 %v4094_v60, 0.0  ;;  %v4279_v7 = vmax.f32 %v4103_v4, 0.0  ;;  %v7965_v20 = vld [vmem:[#allocation139_spill] sm:$0xff]  ;;  %v7966_v29 = vld [vmem:[#allocation140_spill] sm:$0xff] }
 0x3eb   :  { %4426 = vst [vmem:[#allocation7 + $0x1d0] sm:$0xff] %v4250_v23  ;;  %v3913_v27 = vmul.f32 %v6941_v0, %v7934_v31  ;;  %v4267_v23 = vmax.f32 %v4091_v33, 0.0  ;;  %v4097_v19 = vadd.f32 %v6953_v5, %v3911_v46  ;;  %v4271_v17 = vmax.f32 %v4095_v12, 0.0  ;;  %v7948_v33 = vld [vmem:[#allocation112_spill] sm:$0xff]  ;;  %v7967_v4 = vld [vmem:[#allocation143_spill] sm:$0xff] }
 0x3ec   :  { %4427 = vst [vmem:[#allocation7 + $0x1d8] sm:$0xff] %v4251_v54  ;;  %v4268_v54 = vmax.f32 %v4092_v39, 0.0  ;;  %v4276_v0 = vmax.f32 %v4100_v32, 0.0  ;;  %v7950_v39 = vld [vmem:[#allocation115_spill] sm:$0xff]  ;;  %v7964_v32 = vld [vmem:[#allocation137_spill] sm:$0xff] }
 0x3ed   :  { %4428 = vst [vmem:[#allocation7 + $0x1e0] sm:$0xff] %v4252_v13  ;;  %v4269_v13 = vmax.f32 %v4093_v57, 0.0  ;;  %v4273_v16 = vmax.f32 %v4097_v19, 0.0  ;;  %v7952_v57 = vld [vmem:[#allocation118_spill] sm:$0xff] }
 0x3ee   :  { %4429 = vst [vmem:[#allocation7 + $0x1e8] sm:$0xff] %v4253_v45  ;;  %v4098_v45 = vadd.f32 %v6953_v5, %v3912_v42  ;;  %v7953_v42 = vld [vmem:[#allocation120_spill] sm:$0xff] }
 0x3ef   :  { %4430 = vst [vmem:[#allocation7 + $0x1f0] sm:$0xff] %v4254_v28  ;;  %v4099_v28 = vadd.f32 %v6953_v5, %v3913_v27  ;;  %v7941_v5 = vld [vmem:[#allocation32_spill] sm:$0xff]  ;;  %v7955_v27 = vld [vmem:[#allocation123_spill] sm:$0xff] }
 0x3f0   :  { %4431 = vst [vmem:[#allocation7 + $0x1f8] sm:$0xff] %v4255_v30  ;;  %v4272_v30 = vmax.f32 %v4096_v50, 0.0 }
 0x3f1   :  { %4432 = vst [vmem:[#allocation7 + $0x200] sm:$0xff] %v4256_v18  ;;  %v4274_v18 = vmax.f32 %v4098_v45, 0.0  ;;  %v4275_v48 = vmax.f32 %v4099_v28, 0.0  ;;  %v7963_v28 = vld [vmem:[#allocation136_spill] sm:$0xff] }
 0x3f2   :  { %4433 = vst [vmem:[#allocation7 + $0x208] sm:$0xff] %v4257_v56  ;;  %v7209_v56 = vpop.permute.xlu1 %3827 }
 0x3f3   :  { %4434 = vst [vmem:[#allocation7 + $0x210] sm:$0xff] %v4258_v49  ;;  %v7939_v49 = vld [vmem:[#allocation29_spill] sm:$0xff]  ;;  %v3919_v55 = vmul.f32 %v7209_v56, %v7940_v36  ;;  %v3921_v59 = vmul.f32 %v7209_v56, %v7942_v35  ;;  %v3924_v21 = vmul.f32 %v7209_v56, %v7945_v6  ;;  %v7231_v1 = vmul.f32 %v7209_v56, %v7947_v9 }
 0x3f4   :  { %4435 = vst [vmem:[#allocation7 + $0x218] sm:$0xff] %v4259_v41  ;;  %v3918_v47 = vmul.f32 %v7209_v56, %v7939_v49  ;;  %v3920_v41 = vmul.f32 %v7209_v56, %v7941_v5  ;;  %v3983_v52 = vmul.f32 %v7209_v56, %v7949_v51  ;;  %v3985_v46 = vmul.f32 %v7209_v56, %v7951_v3  ;;  %v7970_v49 = vld [vmem:[#allocation148_spill] sm:$0xff]  ;;  %v7971_v5 = vld [vmem:[#allocation149_spill] sm:$0xff] }
 0x3f5   :  { %4436 = vst [vmem:[#allocation7 + $0x220] sm:$0xff] %v4260_v40  ;;  %v7943_v40 = vld [vmem:[#allocation37_spill] sm:$0xff]  ;;  %v3987_v60 = vmul.f32 %v7209_v56, %v7953_v42  ;;  %v3989_v12 = vmul.f32 %v7209_v56, %v7955_v27  ;;  %v3991_v50 = vmul.f32 %v7209_v56, %v7957_v58  ;;  %v3993_v19 = vmul.f32 %v7209_v56, %v7959_v44 }
 0x3f6   :  { %4437 = vst [vmem:[#allocation7 + $0x228] sm:$0xff] %v4261_v24  ;;  %v3922_v53 = vmul.f32 %v7209_v56, %v7943_v40  ;;  %v3923_v24 = vmul.f32 %v7209_v56, %v7944_v37  ;;  %v3995_v45 = vmul.f32 %v7209_v56, %v7961_v61  ;;  %v3996_v34 = vmul.f32 %v7209_v56, %v7962_v62 }
 0x3f7   :  { %4438 = vst [vmem:[#allocation7 + $0x230] sm:$0xff] %v4262_v10  ;;  %v7227_v10 = vmul.f32 %v7209_v56, %v7946_v8  ;;  %v4004_v36 = vmul.f32 %v7209_v56, %v7970_v49  ;;  %v4005_v35 = vmul.f32 %v7209_v56, %v7971_v5  ;;  %v7978_v49 = vld [vmem:[#allocation61_spill] sm:$0xff] }
 0x3f8   :  { %4439 = vst [vmem:[#allocation7 + $0x238] sm:$0xff] %v4263_v11  ;;  %v3982_v11 = vmul.f32 %v7209_v56, %v7948_v33 }
 0x3f9   :  { %4440 = vst [vmem:[#allocation7 + $0x240] sm:$0xff] %v4264_v63  ;;  %v3984_v63 = vmul.f32 %v7209_v56, %v7950_v39 }
 0x3fa   :  { %4441 = vst [vmem:[#allocation7 + $0x248] sm:$0xff] %v4265_v43  ;;  %v3986_v43 = vmul.f32 %v7209_v56, %v7952_v57 }
 0x3fb   :  { %4442 = vst [vmem:[#allocation7 + $0x250] sm:$0xff] %v4266_v14  ;;  %v7954_v14 = vld [vmem:[#allocation121_spill] sm:$0xff] }
 0x3fc   :  { %4443 = vst [vmem:[#allocation7 + $0x258] sm:$0xff] %v4267_v23  ;;  %v3988_v31 = vmul.f32 %v7209_v56, %v7954_v14  ;;  %v7956_v23 = vld [vmem:[#allocation124_spill] sm:$0xff] }
 0x3fd   :  { %4444 = vst [vmem:[#allocation7 + $0x260] sm:$0xff] %v4268_v54  ;;  %v3990_v15 = vmul.f32 %v7209_v56, %v7956_v23  ;;  %v7958_v54 = vld [vmem:[#allocation127_spill] sm:$0xff] }
 0x3fe   :  { %4445 = vst [vmem:[#allocation7 + $0x268] sm:$0xff] %v4269_v13  ;;  %v3992_v2 = vmul.f32 %v7209_v56, %v7958_v54  ;;  %v7960_v13 = vld [vmem:[#allocation130_spill] sm:$0xff] }
 0x3ff   :  { %4446 = vst [vmem:[#allocation7 + $0x270] sm:$0xff] %v4270_v22  ;;  %v3994_v25 = vmul.f32 %v7209_v56, %v7960_v13  ;;  %v7262_v22 = vpop.permute.xlu0 %4013 }
 0x400   :  { %4447 = vst [vmem:[#allocation7 + $0x278] sm:$0xff] %v4271_v17  ;;  %v3997_v17 = vmul.f32 %v7209_v56, %v7963_v28  ;;  %v4104_v40 = vadd.f32 %v7262_v22, %v3918_v47  ;;  %v4105_v37 = vadd.f32 %v7262_v22, %v3919_v55  ;;  %v4106_v6 = vadd.f32 %v7262_v22, %v3920_v41 }
 0x401   :  { %4448 = vst [vmem:[#allocation7 + $0x280] sm:$0xff] %v4272_v30  ;;  %v3998_v30 = vmul.f32 %v7209_v56, %v7964_v32  ;;  %v4107_v8 = vadd.f32 %v7262_v22, %v3921_v59  ;;  %v4108_v9 = vadd.f32 %v7262_v22, %v3922_v53  ;;  %v4109_v33 = vadd.f32 %v7262_v22, %v3923_v24 }
 0x402   :  { %4449 = vst [vmem:[#allocation7 + $0x288] sm:$0xff] %v4273_v16  ;;  %v3999_v16 = vmul.f32 %v7209_v56, %v7965_v20  ;;  %v7291_v51 = vadd.f32 %v7262_v22, %v3982_v11  ;;  %v7294_v39 = vadd.f32 %v7262_v22, %v3983_v52  ;;  %v7297_v3 = vadd.f32 %v7262_v22, %v3984_v63  ;;  %v7975_v20 = vld [vmem:[#allocation54_spill] sm:$0xff] }
 0x403   :  { %4450 = vst [vmem:[#allocation7 + $0x290] sm:$0xff] %v4274_v18  ;;  %v4000_v18 = vmul.f32 %v7209_v56, %v7966_v29  ;;  %v7300_v47 = vadd.f32 %v7262_v22, %v3985_v46  ;;  %v7303_v55 = vadd.f32 %v7262_v22, %v3986_v43  ;;  %v7306_v41 = vadd.f32 %v7262_v22, %v3987_v60 }
 0x404   :  { %4451 = vst [vmem:[#allocation7 + $0x298] sm:$0xff] %v4275_v48  ;;  %v4001_v48 = vmul.f32 %v7209_v56, %v7967_v4  ;;  %v7309_v59 = vadd.f32 %v7262_v22, %v3988_v31  ;;  %v7312_v53 = vadd.f32 %v7262_v22, %v3989_v12  ;;  %v7315_v24 = vadd.f32 %v7262_v22, %v3990_v15 }
 0x405   :  { %4452 = vst [vmem:[#allocation7 + $0x2a0] sm:$0xff] %v4276_v0  ;;  %v7968_v0 = vld [vmem:[#allocation146_spill] sm:$0xff]  ;;  %v7318_v11 = vadd.f32 %v7262_v22, %v3991_v50  ;;  %v7321_v52 = vadd.f32 %v7262_v22, %v3992_v2  ;;  %v7324_v63 = vadd.f32 %v7262_v22, %v3993_v19  ;;  %v7327_v46 = vadd.f32 %v7262_v22, %v3994_v25  ;;  %v7972_v19 = vld [vmem:[#allocation49_spill] sm:$0xff] }
 0x406   :  { %4453 = vst [vmem:[#allocation7 + $0x2a8] sm:$0xff] %v4277_v26  ;;  %v4002_v26 = vmul.f32 %v7209_v56, %v7968_v0  ;;  %v7330_v57 = vadd.f32 %v7262_v22, %v3995_v45  ;;  %v7333_v43 = vadd.f32 %v7262_v22, %v3996_v34  ;;  %v7336_v42 = vadd.f32 %v7262_v22, %v3997_v17  ;;  %v7973_v45 = vld [vmem:[#allocation50_spill] sm:$0xff]  ;;  %v7974_v17 = vld [vmem:[#allocation53_spill] sm:$0xff] }
 0x407   :  { %4454 = vst [vmem:[#allocation7 + $0x2b0] sm:$0xff] %v4278_v38  ;;  %v7969_v38 = vld [vmem:[#allocation147_spill] sm:$0xff]  ;;  %v7339_v60 = vadd.f32 %v7262_v22, %v3998_v30  ;;  %v7342_v14 = vadd.f32 %v7262_v22, %v3999_v16  ;;  %v7345_v31 = vadd.f32 %v7262_v22, %v4000_v18  ;;  %v7348_v27 = vadd.f32 %v7262_v22, %v4001_v48  ;;  %v7976_v18 = vld [vmem:[#allocation57_spill] sm:$0xff]  ;;  %v7977_v0 = vld [vmem:[#allocation58_spill] sm:$0xff] }
 0x408   :  { %4455 = vst.msk [vmem:[#allocation7 + $0x2b8] sm:$0xff] %vm3329_vm2, %v4279_v7  ;;  %v4003_v7 = vmul.f32 %v7209_v56, %v7969_v38  ;;  %v7351_v12 = vadd.f32 %v7262_v22, %v4002_v26  ;;  %v7357_v15 = vadd.f32 %v7262_v22, %v4004_v36  ;;  %v7360_v58 = vadd.f32 %v7262_v22, %v4005_v35 }
 0x409   :  { %v4110_v50 = vadd.f32 %v7262_v22, %v3924_v21  ;;  %v4280_v54 = vmax.f32 %v4104_v40, 0.0  ;;  %v4281_v2 = vmax.f32 %v4105_v37, 0.0  ;;  %v4282_v44 = vmax.f32 %v4106_v6, 0.0  ;;  %v7979_v40 = vld [vmem:[#allocation62_spill] sm:$0xff] }
 0x40a   :  { %v7354_v23 = vadd.f32 %v7262_v22, %v4003_v7  ;;  %v3927_v13 = vmul.f32 %v7209_v56, %v7972_v19  ;;  %v4111_v25 = vadd.f32 %v7262_v22, %v7227_v10  ;;  %v4283_v61 = vmax.f32 %v4107_v8, 0.0 }
 0x40b   :  { %v3928_v62 = vmul.f32 %v7209_v56, %v7973_v45  ;;  %v4112_v34 = vadd.f32 %v7262_v22, %v7231_v1  ;;  %v4284_v28 = vmax.f32 %v4108_v9, 0.0  ;;  %4456 = vst [vmem:[#allocation7 + $0x2c0] sm:$0xff] %v4280_v54  ;;  %v3929_v21 = vmul.f32 %v7209_v56, %v7974_v17  ;;  %v7980_v9 = vld [vmem:[#allocation65_spill] sm:$0xff] }
 0x40c   :  { %v4113_v32 = vadd.f32 %v7262_v22, %v3927_v13  ;;  %v4285_v30 = vmax.f32 %v4109_v33, 0.0  ;;  %4457 = vst [vmem:[#allocation7 + $0x2c8] sm:$0xff] %v4281_v2  ;;  %v3930_v16 = vmul.f32 %v7209_v56, %v7975_v20  ;;  %v4286_v29 = vmax.f32 %v4110_v50, 0.0  ;;  %v7981_v2 = vld [vmem:[#allocation66_spill] sm:$0xff] }
 0x40d   :  { %v4114_v10 = vadd.f32 %v7262_v22, %v3928_v62  ;;  %4458 = vst [vmem:[#allocation7 + $0x2d0] sm:$0xff] %v4282_v44  ;;  %v3931_v4 = vmul.f32 %v7209_v56, %v7976_v18  ;;  %v4115_v1 = vadd.f32 %v7262_v22, %v3929_v21  ;;  %v4287_v48 = vmax.f32 %v4111_v25, 0.0  ;;  %v7982_v25 = vld [vmem:[#allocation11_spill] sm:$0xff] }
 0x40e   :  { %4459 = vst [vmem:[#allocation7 + $0x2d8] sm:$0xff] %v4283_v61  ;;  %v3932_v26 = vmul.f32 %v7209_v56, %v7977_v0  ;;  %v4116_v38 = vadd.f32 %v7262_v22, %v3930_v16  ;;  %v4288_v7 = vmax.f32 %v4112_v34, 0.0  ;;  %v3933_v36 = vmul.f32 %v7209_v56, %v7978_v49  ;;  %v7983_v34 = vld [vmem:[#allocation13_spill] sm:$0xff] }
 0x40f   :  { %4460 = vst [vmem:[#allocation7 + $0x2e0] sm:$0xff] %v4284_v28  ;;  %v4117_v5 = vadd.f32 %v7262_v22, %v3931_v4  ;;  %v4289_v35 = vmax.f32 %v4113_v32, 0.0  ;;  %v3934_v37 = vmul.f32 %v7209_v56, %v7979_v40  ;;  %v4290_v8 = vmax.f32 %v4114_v10, 0.0  ;;  %v7984_v32 = vld [vmem:[#allocation14_spill] sm:$0xff]  ;;  %v7985_v10 = vld [vmem:[#allocation15_spill] sm:$0xff] }
 0x410   :  { %4461 = vst [vmem:[#allocation7 + $0x2e8] sm:$0xff] %v4285_v30  ;;  %v4118_v6 = vadd.f32 %v7262_v22, %v3932_v26  ;;  %v3935_v33 = vmul.f32 %v7209_v56, %v7980_v9  ;;  %v4119_v50 = vadd.f32 %v7262_v22, %v3933_v36  ;;  %v4291_v54 = vmax.f32 %v4115_v1, 0.0  ;;  %v7986_v1 = vld [vmem:[#allocation16_spill] sm:$0xff] }
 0x411   :  { %4462 = vst [vmem:[#allocation7 + $0x2f0] sm:$0xff] %v4286_v29  ;;  %v3936_v44 = vmul.f32 %v7209_v56, %v7981_v2  ;;  %v4120_v19 = vadd.f32 %v7262_v22, %v3934_v37  ;;  %v4292_v13 = vmax.f32 %v4116_v38, 0.0  ;;  %v3937_v61 = vmul.f32 %v7209_v56, %v7982_v25  ;;  %v7987_v38 = vld [vmem:[#allocation21_spill] sm:$0xff] }
 0x412   :  { %4463 = vst [vmem:[#allocation7 + $0x2f8] sm:$0xff] %v4287_v48  ;;  %v4121_v45 = vadd.f32 %v7262_v22, %v3935_v33  ;;  %v4293_v62 = vmax.f32 %v4117_v5, 0.0  ;;  %v3938_v28 = vmul.f32 %v7209_v56, %v7983_v34  ;;  %v4294_v21 = vmax.f32 %v4118_v6, 0.0  ;;  %v7988_v5 = vld [vmem:[#allocation22_spill] sm:$0xff]  ;;  %v7989_v6 = vld [vmem:[#allocation25_spill] sm:$0xff] }
 0x413   :  { %4464 = vst [vmem:[#allocation7 + $0x300] sm:$0xff] %v4288_v7  ;;  %v4122_v17 = vadd.f32 %v7262_v22, %v3936_v44  ;;  %v3939_v30 = vmul.f32 %v7209_v56, %v7984_v32  ;;  %v4123_v20 = vadd.f32 %v7262_v22, %v3937_v61  ;;  %v4295_v16 = vmax.f32 %v4119_v50, 0.0  ;;  %v7990_v50 = vld [vmem:[#allocation27_spill] sm:$0xff] }
 0x414   :  { %4465 = vst [vmem:[#allocation7 + $0x308] sm:$0xff] %v4289_v35  ;;  %v3940_v29 = vmul.f32 %v7209_v56, %v7985_v10  ;;  %v4124_v18 = vadd.f32 %v7262_v22, %v3938_v28  ;;  %v4296_v4 = vmax.f32 %v4120_v19, 0.0  ;;  %v3941_v48 = vmul.f32 %v7209_v56, %v7986_v1  ;;  %v7991_v19 = vld [vmem:[#allocation73_spill] sm:$0xff] }
 0x415   :  { %4466 = vst [vmem:[#allocation7 + $0x310] sm:$0xff] %v4290_v8  ;;  %v4125_v0 = vadd.f32 %v7262_v22, %v3939_v30  ;;  %v4297_v26 = vmax.f32 %v4121_v45, 0.0  ;;  %v3942_v7 = vmul.f32 %v7209_v56, %v7987_v38  ;;  %v4298_v36 = vmax.f32 %v4122_v17, 0.0  ;;  %v7992_v45 = vld [vmem:[#allocation35_spill] sm:$0xff]  ;;  %v7993_v17 = vld [vmem:[#allocation74_spill] sm:$0xff] }
 0x416   :  { %4467 = vst [vmem:[#allocation7 + $0x318] sm:$0xff] %v4291_v54  ;;  %v4126_v49 = vadd.f32 %v7262_v22, %v3940_v29  ;;  %v3943_v35 = vmul.f32 %v7209_v56, %v7988_v5  ;;  %v4127_v40 = vadd.f32 %v7262_v22, %v3941_v48  ;;  %v4299_v37 = vmax.f32 %v4123_v20, 0.0  ;;  %v7994_v20 = vld [vmem:[#allocation76_spill] sm:$0xff] }
 0x417   :  { %4468 = vst [vmem:[#allocation7 + $0x320] sm:$0xff] %v4292_v13  ;;  %v3944_v8 = vmul.f32 %v7209_v56, %v7989_v6  ;;  %v4128_v9 = vadd.f32 %v7262_v22, %v3942_v7  ;;  %v4300_v33 = vmax.f32 %v4124_v18, 0.0  ;;  %v3945_v54 = vmul.f32 %v7209_v56, %v7990_v50  ;;  %v7995_v18 = vld [vmem:[#allocation77_spill] sm:$0xff] }
 0x418   :  { %4469 = vst [vmem:[#allocation7 + $0x328] sm:$0xff] %v4293_v62  ;;  %v4129_v2 = vadd.f32 %v7262_v22, %v3943_v35  ;;  %v4301_v44 = vmax.f32 %v4125_v0, 0.0  ;;  %v3946_v13 = vmul.f32 %v7209_v56, %v7991_v19  ;;  %v4302_v61 = vmax.f32 %v4126_v49, 0.0  ;;  %v7996_v0 = vld [vmem:[#allocation78_spill] sm:$0xff]  ;;  %v7997_v49 = vld [vmem:[#allocation79_spill] sm:$0xff] }
 0x419   :  { %4470 = vst [vmem:[#allocation7 + $0x330] sm:$0xff] %v4294_v21  ;;  %v4130_v25 = vadd.f32 %v7262_v22, %v3944_v8  ;;  %v3947_v62 = vmul.f32 %v7209_v56, %v7992_v45  ;;  %v4131_v34 = vadd.f32 %v7262_v22, %v3945_v54  ;;  %v4303_v28 = vmax.f32 %v4127_v40, 0.0  ;;  %v7998_v40 = vld [vmem:[#allocation80_spill] sm:$0xff] }
 0x41a   :  { %4471 = vst [vmem:[#allocation7 + $0x338] sm:$0xff] %v4295_v16  ;;  %v3948_v21 = vmul.f32 %v7209_v56, %v7993_v17  ;;  %v4132_v32 = vadd.f32 %v7262_v22, %v3946_v13  ;;  %v4304_v30 = vmax.f32 %v4128_v9, 0.0  ;;  %v3949_v16 = vmul.f32 %v7209_v56, %v7994_v20  ;;  %v7999_v9 = vld [vmem:[#allocation81_spill] sm:$0xff] }
 0x41b   :  { %4472 = vst [vmem:[#allocation7 + $0x340] sm:$0xff] %v4296_v4  ;;  %v4133_v10 = vadd.f32 %v7262_v22, %v3947_v62  ;;  %v4305_v29 = vmax.f32 %v4129_v2, 0.0  ;;  %v3950_v4 = vmul.f32 %v7209_v56, %v7995_v18  ;;  %v4306_v48 = vmax.f32 %v4130_v25, 0.0  ;;  %v8000_v2 = vld [vmem:[#allocation82_spill] sm:$0xff]  ;;  %v8001_v25 = vld [vmem:[#allocation83_spill] sm:$0xff] }
 0x41c   :  { %4473 = vst [vmem:[#allocation7 + $0x348] sm:$0xff] %v4297_v26  ;;  %v4134_v1 = vadd.f32 %v7262_v22, %v3948_v21  ;;  %v3951_v26 = vmul.f32 %v7209_v56, %v7996_v0  ;;  %v4135_v38 = vadd.f32 %v7262_v22, %v3949_v16  ;;  %v4307_v7 = vmax.f32 %v4131_v34, 0.0  ;;  %v8002_v34 = vld [vmem:[#allocation84_spill] sm:$0xff] }
 0x41d   :  { %4474 = vst [vmem:[#allocation7 + $0x350] sm:$0xff] %v4298_v36  ;;  %v3952_v36 = vmul.f32 %v7209_v56, %v7997_v49  ;;  %v4136_v5 = vadd.f32 %v7262_v22, %v3950_v4  ;;  %v4308_v35 = vmax.f32 %v4132_v32, 0.0  ;;  %v4309_v8 = vmax.f32 %v4133_v10, 0.0  ;;  %v8003_v32 = vld [vmem:[#allocation85_spill] sm:$0xff]  ;;  %v8004_v10 = vld [vmem:[#allocation86_spill] sm:$0xff] }
 0x41e   :  { %4475 = vst [vmem:[#allocation7 + $0x358] sm:$0xff] %v4299_v37  ;;  %v3953_v37 = vmul.f32 %v7209_v56, %v7998_v40  ;;  %v4137_v6 = vadd.f32 %v7262_v22, %v3951_v26  ;;  %v4310_v54 = vmax.f32 %v4134_v1, 0.0  ;;  %v4311_v13 = vmax.f32 %v4135_v38, 0.0  ;;  %v8005_v1 = vld [vmem:[#allocation87_spill] sm:$0xff]  ;;  %v8006_v38 = vld [vmem:[#allocation69_spill] sm:$0xff] }
 0x41f   :  { %4476 = vst [vmem:[#allocation7 + $0x360] sm:$0xff] %v4300_v33  ;;  %v3954_v33 = vmul.f32 %v7209_v56, %v7999_v9  ;;  %v4138_v50 = vadd.f32 %v7262_v22, %v3952_v36  ;;  %v4312_v62 = vmax.f32 %v4136_v5, 0.0  ;;  %v8007_v5 = vld [vmem:[#allocation88_spill] sm:$0xff] }
 0x420   :  { %4477 = vst [vmem:[#allocation7 + $0x368] sm:$0xff] %v4301_v44  ;;  %v3955_v44 = vmul.f32 %v7209_v56, %v8000_v2  ;;  %v4139_v19 = vadd.f32 %v7262_v22, %v3953_v37  ;;  %v4313_v21 = vmax.f32 %v4137_v6, 0.0  ;;  %v8008_v6 = vld [vmem:[#allocation70_spill] sm:$0xff] }
 0x421   :  { %4478 = vst [vmem:[#allocation7 + $0x370] sm:$0xff] %v4302_v61  ;;  %v3956_v61 = vmul.f32 %v7209_v56, %v8001_v25  ;;  %v4140_v45 = vadd.f32 %v7262_v22, %v3954_v33  ;;  %v4314_v16 = vmax.f32 %v4138_v50, 0.0  ;;  %v8009_v50 = vld [vmem:[#allocation72_spill] sm:$0xff] }
 0x422   :  { %4479 = vst [vmem:[#allocation7 + $0x378] sm:$0xff] %v4303_v28  ;;  %v3957_v28 = vmul.f32 %v7209_v56, %v8002_v34  ;;  %v4141_v17 = vadd.f32 %v7262_v22, %v3955_v44  ;;  %v4315_v4 = vmax.f32 %v4139_v19, 0.0  ;;  %v8010_v19 = vld [vmem:[#allocation90_spill] sm:$0xff] }
 0x423   :  { %4480 = vst [vmem:[#allocation7 + $0x380] sm:$0xff] %v4304_v30  ;;  %v3958_v30 = vmul.f32 %v7209_v56, %v8003_v32  ;;  %v4142_v20 = vadd.f32 %v7262_v22, %v3956_v61  ;;  %v4316_v26 = vmax.f32 %v4140_v45, 0.0  ;;  %v8011_v45 = vld [vmem:[#allocation91_spill] sm:$0xff] }
 0x424   :  { %4481 = vst [vmem:[#allocation7 + $0x388] sm:$0xff] %v4305_v29  ;;  %v3959_v29 = vmul.f32 %v7209_v56, %v8004_v10  ;;  %v4143_v18 = vadd.f32 %v7262_v22, %v3957_v28  ;;  %v4317_v36 = vmax.f32 %v4141_v17, 0.0  ;;  %v8012_v17 = vld [vmem:[#allocation92_spill] sm:$0xff] }
 0x425   :  { %4482 = vst [vmem:[#allocation7 + $0x390] sm:$0xff] %v4306_v48  ;;  %v3960_v48 = vmul.f32 %v7209_v56, %v8005_v1  ;;  %v4144_v0 = vadd.f32 %v7262_v22, %v3958_v30  ;;  %v4318_v37 = vmax.f32 %v4142_v20, 0.0  ;;  %v8013_v20 = vld [vmem:[#allocation93_spill] sm:$0xff] }
 0x426   :  { %4483 = vst [vmem:[#allocation7 + $0x398] sm:$0xff] %v4307_v7  ;;  %v3961_v7 = vmul.f32 %v7209_v56, %v8006_v38  ;;  %v4145_v49 = vadd.f32 %v7262_v22, %v3959_v29  ;;  %v4319_v33 = vmax.f32 %v4143_v18, 0.0  ;;  %v8014_v18 = vld [vmem:[#allocation95_spill] sm:$0xff] }
 0x427   :  { %4484 = vst [vmem:[#allocation7 + $0x3a0] sm:$0xff] %v4308_v35  ;;  %v3962_v35 = vmul.f32 %v7209_v56, %v8007_v5  ;;  %v4146_v40 = vadd.f32 %v7262_v22, %v3960_v48  ;;  %v4320_v44 = vmax.f32 %v4144_v0, 0.0  ;;  %v8015_v0 = vld [vmem:[#allocation96_spill] sm:$0xff] }
 0x428   :  { %4485 = vst [vmem:[#allocation7 + $0x3a8] sm:$0xff] %v4309_v8  ;;  %v3963_v8 = vmul.f32 %v7209_v56, %v8008_v6  ;;  %v4147_v9 = vadd.f32 %v7262_v22, %v3961_v7  ;;  %v4321_v61 = vmax.f32 %v4145_v49, 0.0  ;;  %v8016_v49 = vld [vmem:[#allocation98_spill] sm:$0xff] }
 0x429   :  { %4486 = vst [vmem:[#allocation7 + $0x3b0] sm:$0xff] %v4310_v54  ;;  %v3964_v54 = vmul.f32 %v7209_v56, %v8009_v50  ;;  %v4148_v2 = vadd.f32 %v7262_v22, %v3962_v35  ;;  %v4322_v28 = vmax.f32 %v4146_v40, 0.0  ;;  %v8017_v40 = vld [vmem:[#allocation99_spill] sm:$0xff] }
 0x42a   :  { %4487 = vst [vmem:[#allocation7 + $0x3b8] sm:$0xff] %v4311_v13  ;;  %v3965_v13 = vmul.f32 %v7209_v56, %v8010_v19  ;;  %v4149_v25 = vadd.f32 %v7262_v22, %v3963_v8  ;;  %v4323_v30 = vmax.f32 %v4147_v9, 0.0  ;;  %v8018_v9 = vld [vmem:[#allocation100_spill] sm:$0xff] }
 0x42b   :  { %4488 = vst [vmem:[#allocation7 + $0x3c0] sm:$0xff] %v4312_v62  ;;  %v3966_v62 = vmul.f32 %v7209_v56, %v8011_v45  ;;  %v4150_v34 = vadd.f32 %v7262_v22, %v3964_v54  ;;  %v4324_v29 = vmax.f32 %v4148_v2, 0.0  ;;  %v8019_v2 = vld [vmem:[#allocation101_spill] sm:$0xff] }
 0x42c   :  { %4489 = vst [vmem:[#allocation7 + $0x3c8] sm:$0xff] %v4313_v21  ;;  %v3967_v21 = vmul.f32 %v7209_v56, %v8012_v17  ;;  %v4151_v32 = vadd.f32 %v7262_v22, %v3965_v13  ;;  %v4325_v48 = vmax.f32 %v4149_v25, 0.0  ;;  %v8020_v25 = vld [vmem:[#allocation103_spill] sm:$0xff] }
 0x42d   :  { %4490 = vst [vmem:[#allocation7 + $0x3d0] sm:$0xff] %v4314_v16  ;;  %v3968_v16 = vmul.f32 %v7209_v56, %v8013_v20  ;;  %v4152_v10 = vadd.f32 %v7262_v22, %v3966_v62  ;;  %v4326_v7 = vmax.f32 %v4150_v34, 0.0  ;;  %v8021_v34 = vld [vmem:[#allocation104_spill] sm:$0xff] }
 0x42e   :  { %4491 = vst [vmem:[#allocation7 + $0x3d8] sm:$0xff] %v4315_v4  ;;  %v3969_v4 = vmul.f32 %v7209_v56, %v8014_v18  ;;  %v4153_v1 = vadd.f32 %v7262_v22, %v3967_v21  ;;  %v4327_v35 = vmax.f32 %v4151_v32, 0.0  ;;  %v8022_v32 = vld [vmem:[#allocation106_spill] sm:$0xff] }
 0x42f   :  { %4492 = vst [vmem:[#allocation7 + $0x3e0] sm:$0xff] %v4316_v26  ;;  %v3970_v26 = vmul.f32 %v7209_v56, %v8015_v0  ;;  %v4154_v38 = vadd.f32 %v7262_v22, %v3968_v16  ;;  %v4328_v8 = vmax.f32 %v4152_v10, 0.0  ;;  %v8023_v10 = vld [vmem:[#allocation107_spill] sm:$0xff] }
 0x430   :  { %4493 = vst [vmem:[#allocation7 + $0x3e8] sm:$0xff] %v4317_v36  ;;  %v3971_v36 = vmul.f32 %v7209_v56, %v8016_v49  ;;  %v4155_v5 = vadd.f32 %v7262_v22, %v3969_v4  ;;  %v4329_v54 = vmax.f32 %v4153_v1, 0.0  ;;  %v8024_v1 = vld [vmem:[#allocation108_spill] sm:$0xff] }
 0x431   :  { %4494 = vst [vmem:[#allocation7 + $0x3f0] sm:$0xff] %v4318_v37  ;;  %v3972_v37 = vmul.f32 %v7209_v56, %v8017_v40  ;;  %v4156_v6 = vadd.f32 %v7262_v22, %v3970_v26  ;;  %v4330_v13 = vmax.f32 %v4154_v38, 0.0  ;;  %v8025_v38 = vld [vmem:[#allocation109_spill] sm:$0xff] }
 0x432   :  { %4495 = vst [vmem:[#allocation7 + $0x3f8] sm:$0xff] %v4319_v33  ;;  %v3973_v33 = vmul.f32 %v7209_v56, %v8018_v9  ;;  %v4157_v50 = vadd.f32 %v7262_v22, %v3971_v36  ;;  %v4331_v62 = vmax.f32 %v4155_v5, 0.0  ;;  %v8026_v5 = vld [vmem:[#allocation111_spill] sm:$0xff] }
 0x433   :  { %4496 = vst [vmem:[#allocation7 + $0x400] sm:$0xff] %v4320_v44  ;;  %v3974_v44 = vmul.f32 %v7209_v56, %v8019_v2  ;;  %v4158_v19 = vadd.f32 %v7262_v22, %v3972_v37  ;;  %v4332_v21 = vmax.f32 %v4156_v6, 0.0 }
 0x434   :  { %4497 = vst [vmem:[#allocation7 + $0x408] sm:$0xff] %v4321_v61  ;;  %v3975_v61 = vmul.f32 %v7209_v56, %v8020_v25  ;;  %v4159_v45 = vadd.f32 %v7262_v22, %v3973_v33  ;;  %v4333_v16 = vmax.f32 %v4157_v50, 0.0  ;;  %v4348_v25 = vmax.f32 %v7303_v55, 0.0 }
 0x435   :  { %4498 = vst [vmem:[#allocation7 + $0x410] sm:$0xff] %v4322_v28  ;;  %v3976_v28 = vmul.f32 %v7209_v56, %v8021_v34  ;;  %v4160_v17 = vadd.f32 %v7262_v22, %v3974_v44  ;;  %v4334_v4 = vmax.f32 %v4158_v19, 0.0  ;;  %v4345_v19 = vmax.f32 %v7294_v39, 0.0 }
 0x436   :  { %4499 = vst [vmem:[#allocation7 + $0x418] sm:$0xff] %v4323_v30  ;;  %v3977_v30 = vmul.f32 %v7209_v56, %v8022_v32  ;;  %v4161_v20 = vadd.f32 %v7262_v22, %v3975_v61  ;;  %v4335_v26 = vmax.f32 %v4159_v45, 0.0  ;;  %v4349_v61 = vmax.f32 %v7306_v41, 0.0 }
 0x437   :  { %4500 = vst [vmem:[#allocation7 + $0x420] sm:$0xff] %v4324_v29  ;;  %v3978_v29 = vmul.f32 %v7209_v56, %v8023_v10  ;;  %v4162_v18 = vadd.f32 %v7262_v22, %v3976_v28  ;;  %v4336_v36 = vmax.f32 %v4160_v17, 0.0  ;;  %v4350_v45 = vmax.f32 %v7309_v59, 0.0 }
 0x438   :  { %4501 = vst [vmem:[#allocation7 + $0x428] sm:$0xff] %v4325_v48  ;;  %v3979_v48 = vmul.f32 %v7209_v56, %v8024_v1  ;;  %v4163_v0 = vadd.f32 %v7262_v22, %v3977_v30  ;;  %v4337_v37 = vmax.f32 %v4161_v20, 0.0  ;;  %v4352_v39 = vmax.f32 %v7315_v24, 0.0 }
 0x439   :  { %4502 = vst [vmem:[#allocation7 + $0x430] sm:$0xff] %v4326_v7  ;;  %v3980_v7 = vmul.f32 %v7209_v56, %v8025_v38  ;;  %v4164_v49 = vadd.f32 %v7262_v22, %v3978_v29  ;;  %v4355_v55 = vmax.f32 %v7324_v63, 0.0  ;;  %v4356_v41 = vmax.f32 %v7327_v46, 0.0 }
 0x43a   :  { %4503 = vst [vmem:[#allocation7 + $0x438] sm:$0xff] %v4327_v35  ;;  %v3981_v35 = vmul.f32 %v7209_v56, %v8026_v5  ;;  %v4165_v40 = vadd.f32 %v7262_v22, %v3979_v48  ;;  %v4339_v33 = vmax.f32 %v4163_v0, 0.0  ;;  %v4344_v56 = vmax.f32 %v7291_v51, 0.0 }
 0x43b   :  { %4504 = vst [vmem:[#allocation7 + $0x440] sm:$0xff] %v4328_v8  ;;  %v4166_v6 = vadd.f32 %v7262_v22, %v3980_v7  ;;  %v4338_v8 = vmax.f32 %v4162_v18, 0.0  ;;  %v4340_v50 = vmax.f32 %v4164_v49, 0.0  ;;  %v4351_v51 = vmax.f32 %v7312_v53, 0.0 }
 0x43c   :  { %4505 = vst [vmem:[#allocation7 + $0x448] sm:$0xff] %v4329_v54  ;;  %v4167_v9 = vadd.f32 %v7262_v22, %v3981_v35  ;;  %v4341_v54 = vmax.f32 %v4165_v40, 0.0  ;;  %v4347_v22 = vmax.f32 %v7300_v47, 0.0  ;;  %v4354_v47 = vmax.f32 %v7321_v52, 0.0 }
 0x43d   :  { %4506 = vst [vmem:[#allocation7 + $0x450] sm:$0xff] %v4330_v13  ;;  %v4342_v2 = vmax.f32 %v4166_v6, 0.0  ;;  %v4346_v13 = vmax.f32 %v7297_v3, 0.0  ;;  %v4353_v3 = vmax.f32 %v7318_v11, 0.0  ;;  %v4357_v59 = vmax.f32 %v7330_v57, 0.0 }
 0x43e   :  { %4507 = vst [vmem:[#allocation7 + $0x458] sm:$0xff] %v4331_v62  ;;  %v4343_v44 = vmax.f32 %v4167_v9, 0.0  ;;  %v4358_v53 = vmax.f32 %v7333_v43, 0.0  ;;  %v4359_v24 = vmax.f32 %v7336_v42, 0.0  ;;  %v4360_v11 = vmax.f32 %v7339_v60, 0.0 }
 0x43f   :  { %4508 = vst [vmem:[#allocation7 + $0x460] sm:$0xff] %v4332_v21  ;;  %v4361_v52 = vmax.f32 %v7342_v14, 0.0  ;;  %v4362_v63 = vmax.f32 %v7345_v31, 0.0  ;;  %v4363_v46 = vmax.f32 %v7348_v27, 0.0  ;;  %v4364_v57 = vmax.f32 %v7351_v12, 0.0 }
 0x440   :  { %4509 = vst [vmem:[#allocation7 + $0x468] sm:$0xff] %v4333_v16  ;;  %v4365_v43 = vmax.f32 %v7354_v23, 0.0  ;;  %v4366_v42 = vmax.f32 %v7357_v15, 0.0  ;;  %v4367_v60 = vmax.f32 %v7360_v58, 0.0 }
 0x441   :  { %4510 = vst [vmem:[#allocation7 + $0x470] sm:$0xff] %v4334_v4 }
 0x442   :  { %4511 = vst [vmem:[#allocation7 + $0x478] sm:$0xff] %v4335_v26 }
 0x443   :  { %4512 = vst [vmem:[#allocation7 + $0x480] sm:$0xff] %v4336_v36 }
 0x444   :  { %4513 = vst [vmem:[#allocation7 + $0x488] sm:$0xff] %v4337_v37 }
 0x445   :  { %4514 = vst [vmem:[#allocation7 + $0x490] sm:$0xff] %v4338_v8 }
 0x446   :  { %4515 = vst [vmem:[#allocation7 + $0x498] sm:$0xff] %v4339_v33 }
 0x447   :  { %4516 = vst [vmem:[#allocation7 + $0x4a0] sm:$0xff] %v4340_v50 }
 0x448   :  { %4517 = vst [vmem:[#allocation7 + $0x4a8] sm:$0xff] %v4341_v54 }
 0x449   :  { %4518 = vst [vmem:[#allocation7 + $0x4b0] sm:$0xff] %v4342_v2 }
 0x44a   :  { %4519 = vst [vmem:[#allocation7 + $0x4b8] sm:$0xff] %v4343_v44 }
 0x44b   :  { %4520 = vst [vmem:[#allocation7 + $0x4c0] sm:$0xff] %v4344_v56 }
 0x44c   :  { %4521 = vst [vmem:[#allocation7 + $0x4c8] sm:$0xff] %v4345_v19 }
 0x44d   :  { %4522 = vst [vmem:[#allocation7 + $0x4d0] sm:$0xff] %v4346_v13 }
 0x44e   :  { %4523 = vst [vmem:[#allocation7 + $0x4d8] sm:$0xff] %v4347_v22 }
 0x44f   :  { %4524 = vst [vmem:[#allocation7 + $0x4e0] sm:$0xff] %v4348_v25 }
 0x450   :  { %4525 = vst [vmem:[#allocation7 + $0x4e8] sm:$0xff] %v4349_v61 }
 0x451   :  { %4526 = vst [vmem:[#allocation7 + $0x4f0] sm:$0xff] %v4350_v45 }
 0x452   :  { %4527 = vst [vmem:[#allocation7 + $0x4f8] sm:$0xff] %v4351_v51 }
 0x453   :  { %4528 = vst [vmem:[#allocation7 + $0x500] sm:$0xff] %v4352_v39 }
 0x454   :  { %4529 = vst [vmem:[#allocation7 + $0x508] sm:$0xff] %v4353_v3 }
 0x455   :  { %4530 = vst [vmem:[#allocation7 + $0x510] sm:$0xff] %v4354_v47 }
 0x456   :  { %4531 = vst [vmem:[#allocation7 + $0x518] sm:$0xff] %v4355_v55 }
 0x457   :  { %4532 = vst [vmem:[#allocation7 + $0x520] sm:$0xff] %v4356_v41 }
 0x458   :  { %4533 = vst [vmem:[#allocation7 + $0x528] sm:$0xff] %v4357_v59 }
 0x459   :  { %4534 = vst [vmem:[#allocation7 + $0x530] sm:$0xff] %v4358_v53 }
 0x45a   :  { %4535 = vst [vmem:[#allocation7 + $0x538] sm:$0xff] %v4359_v24 }
 0x45b   :  { %4536 = vst [vmem:[#allocation7 + $0x540] sm:$0xff] %v4360_v11 }
 0x45c   :  { %4537 = vst [vmem:[#allocation7 + $0x548] sm:$0xff] %v4361_v52 }
 0x45d   :  { %4538 = vst [vmem:[#allocation7 + $0x550] sm:$0xff] %v4362_v63 }
 0x45e   :  { %4539 = vst [vmem:[#allocation7 + $0x558] sm:$0xff] %v4363_v46 }
 0x45f   :  { %4540 = vst [vmem:[#allocation7 + $0x560] sm:$0xff] %v4364_v57 }
 0x460   :  { %4541 = vst [vmem:[#allocation7 + $0x568] sm:$0xff] %v4365_v43 }
 0x461   :  { %4542 = vst [vmem:[#allocation7 + $0x570] sm:$0xff] %v4366_v42 }
 0x462   :  { %4543 = vst.msk [vmem:[#allocation7 + $0x578] sm:$0xff] %vm3329_vm2, %v4367_v60 }
 0x463   :  { %4556 = dma.vmem_to_hbm [thread:$0]  %s4549_s4, 22528, %s4551_s18, [#allocation4], %s4933_s30, %s4933_s30, %s4934_s6  }
 0x464   :  { %4927 = dma.done.wait [#allocation4], 22528  }
 0x465   :  { %4928 = vsyncadd [#allocation4], 4294944768 }
 0x466   :  { %4561 = vsyncpa [#allocation3], 1 }
 0x467   :  { %4562 = vsyncpa [#allocation6], 1 }
 0x468   :  { %4563 = vsyncpa [#allocation4], 1 }

</bundles_post_ra>
